<compile_context>
chip_gen: v7x
topology: tpu7x:2x2x1
jax: 0.10.0
libtpu: 0.0.40
codegen_flags: <defaults>
</compile_context>

<pallas_src>
import functools

import numpy as np

import jax
import jax.numpy as jnp
from jax.experimental import pallas as pl
from jax.experimental.pallas import tpu as pltpu


# ---------------------------------------------------------------------------
# Kernels
# ---------------------------------------------------------------------------

def _rope_kernel_full(inv_freq_ref, sin_ref, cos_ref, *, block_rows, head_dim):
    """One (block_rows, head_dim) tile of sin/cos.

    inv_freq_ref is (1, head_dim), already duplicated [f | f] in the wrapper,
    so angle = pos * inv_freq directly reproduces cat([freqs, freqs], -1).
    """
    row0 = pl.program_id(0) * block_rows
    pos = (jax.lax.broadcasted_iota(jnp.int32, (block_rows, head_dim), 0)
           + row0).astype(jnp.float32)
    angle = pos * inv_freq_ref[...]
    sin_ref[...] = jnp.sin(angle).astype(sin_ref.dtype)
    cos_ref[...] = jnp.cos(angle).astype(cos_ref.dtype)


def _rope_kernel_half(inv_freq_ref, sin_ref, cos_ref, *, block_rows, half):
    """Half-width variant (only used when head_dim % 256 == 0, i.e. half is a
    multiple of 128).  sin/cos are evaluated once on (block_rows, half) and
    stored to both 128-aligned halves -- no concat, no lane shifts."""
    row0 = pl.program_id(0) * block_rows
    pos = (jax.lax.broadcasted_iota(jnp.int32, (block_rows, half), 0)
           + row0).astype(jnp.float32)
    angle = pos * inv_freq_ref[...]
    s = jnp.sin(angle).astype(sin_ref.dtype)
    c = jnp.cos(angle).astype(cos_ref.dtype)
    sin_ref[:, :half] = s
    sin_ref[:, half:] = s
    cos_ref[:, :half] = c
    cos_ref[:, half:] = c


# ---------------------------------------------------------------------------
# Wrapper
# ---------------------------------------------------------------------------

_VMEM_OUT_BUDGET = 8 * 1024 * 1024   # double-buffered sin+cos outputs (v5e-safe)
_MAX_BLOCK_ROWS = 4096
_MIN_PALLAS_BYTES = 128 * 1024       # below this, launch overhead dominates


def _round_up(x: int, m: int) -> int:
    return ((x + m - 1) // m) * m


def make_rope_tables(head_dim: int, max_pos: int, base: float = 10000.0,
                     dtype=jnp.float32, force_pallas: bool = False):
    """Builds RoPE sin/cos tables.

    Returns (sin, cos) with shape (padded_rows, head_dim), padded_rows >= max_pos.
    Rows [0, max_pos) match the PyTorch reference; rows beyond are padding that
    callers slice off lazily (never materialized separately).
    """
    if head_dim % 2 != 0:
        raise ValueError("head_dim must be even for RoPE")
    half = head_dim // 2
    itemsize = np.dtype(dtype).itemsize

    # inv_freq exactly as the PyTorch reference (one-time tiny host-side op).
    inv_freq = 1.0 / base ** (
        jnp.arange(0, head_dim, 2, dtype=jnp.float32) / head_dim
    )

    # Tiny tables: kernel launch + pipeline setup + masked sub-128-lane stores
    # dominate; plain XLA is as fast or faster.
    if (2 * max_pos * head_dim * itemsize) < _MIN_PALLAS_BYTES and not force_pallas:
        t = jnp.arange(max_pos, dtype=jnp.float32)
        freqs = jnp.einsum("i,j->ij", t, inv_freq)
        emb = jnp.concatenate((freqs, freqs), axis=-1)
        return jnp.sin(emb).astype(dtype), jnp.cos(emb).astype(dtype)

    padded8 = _round_up(max(max_pos, 8), 8)

    # Largest row tile such that the double-buffered sin+cos output footprint
    # (2 outputs * 2 buffers * block_rows * head_dim * itemsize) stays under
    # the budget (well inside v5e's 16 MiB scoped-VMEM default), capped at 4096.
    vmem_rows = max(8, (_VMEM_OUT_BUDGET // (4 * head_dim * itemsize)) // 8 * 8)
    target = min(_MAX_BLOCK_ROWS, vmem_rows)

    # Even number of grid steps (>= 2) so both v7x TensorCores get equal work;
    # rows are padded up to n_steps * block_rows (waste is < one tile).
    n_steps = 2 * max(1, pl.cdiv(padded8, 2 * target))
    block_rows = _round_up(pl.cdiv(padded8, n_steps), 8)
    padded = n_steps * block_rows

    use_half = (head_dim % 256 == 0)   # half is a multiple of 128 lanes
    if use_half:
        kernel = functools.partial(_rope_kernel_half,
                                   block_rows=block_rows, half=half)
        inv_in = inv_freq.reshape(1, half)
        in_width = half
    else:
        kernel = functools.partial(_rope_kernel_full,
                                   block_rows=block_rows, head_dim=head_dim)
        inv_in = jnp.concatenate([inv_freq, inv_freq], axis=-1).reshape(1, head_dim)
        in_width = head_dim

    sin_pad, cos_pad = pl.pallas_call(
        kernel,
        out_shape=(jax.ShapeDtypeStruct((padded, head_dim), dtype),
                   jax.ShapeDtypeStruct((padded, head_dim), dtype)),
        grid=(n_steps,),
        in_specs=[pl.BlockSpec((1, in_width), lambda i: (0, 0))],
        out_specs=(pl.BlockSpec((block_rows, head_dim), lambda i: (i, 0)),
                   pl.BlockSpec((block_rows, head_dim), lambda i: (i, 0))),
        compiler_params=pltpu.CompilerParams(
            dimension_semantics=("parallel",)),
    )(inv_in)

    return sin_pad, cos_pad


class RotaryEmbedding:
    """JAX/Pallas equivalent of the PyTorch RotaryEmbedding module."""

    def __init__(self, head_dim: int, max_pos: int, base: float = 10000.0,
                 dtype=jnp.float32, force_pallas: bool = False):
        if head_dim % 2 != 0:
            raise ValueError("head_dim must be even for RoPE")
        self.head_dim = head_dim
        self.max_pos = max_pos
        sin_pad, cos_pad = make_rope_tables(head_dim, max_pos, base,
                                            dtype=dtype,
                                            force_pallas=force_pallas)
        # Keep the (possibly row-padded) tables as the stored buffers; no
        # [:max_pos] full-table copy.  __call__'s slice to T does all trimming.
        self._sin4d = sin_pad[None, None]   # (1, 1, padded, head_dim)
        self._cos4d = cos_pad[None, None]

    # PyTorch-buffer-like views (only used for inspection / tests).
    @property
    def sin(self):
        return self._sin4d[0, 0, :self.max_pos]

    @property
    def cos(self):
        return self._cos4d[0, 0, :self.max_pos]

    def __call__(self, x: jax.Array):
        T = x.shape[-2]
        sin = jax.lax.slice(self._sin4d, (0, 0, 0, 0),
                            (1, 1, T, self.head_dim))
        cos = jax.lax.slice(self._cos4d, (0, 0, 0, 0),
                            (1, 1, T, self.head_dim))
        return sin, cos


# ---------------------------------------------------------------------------
# Reference + self-test
# ---------------------------------------------------------------------------

def _reference_tables(head_dim, max_pos, base=10000.0):
    inv_freq = 1.0 / base ** (
        jnp.arange(0, head_dim, 2, dtype=jnp.float32) / head_dim)
    t = jnp.arange(max_pos, dtype=jnp.float32)
    freqs = jnp.einsum("i,j->ij", t, inv_freq)
    emb = jnp.concatenate((freqs, freqs), axis=-1)
    return jnp.sin(emb), jnp.cos(emb)


if __name__ == "__main__":
    # Main check: full-width kernel path (head_dim=128, max_pos=512).
    head_dim = 128
    max_pos = 512
    seq = 8

    rope = RotaryEmbedding(head_dim=head_dim, max_pos=max_pos)

    key = jax.random.PRNGKey(0)
    x = jax.random.normal(key, (2, 4, seq, head_dim), dtype=jnp.float32)

    sin_out, cos_out = rope(x)
    jax.block_until_ready((sin_out, cos_out))

    assert sin_out.shape == (1, 1, seq, head_dim)
    assert cos_out.shape == (1, 1, seq, head_dim)

    ref_sin, ref_cos = _reference_tables(head_dim, max_pos)
    assert jnp.allclose(sin_out[0, 0], ref_sin[:seq], atol=1e-4), "sin mismatch"
    assert jnp.allclose(cos_out[0, 0], ref_cos[:seq], atol=1e-4), "cos mismatch"
    assert jnp.allclose(rope.sin, ref_sin, atol=1e-4), "full sin table mismatch"
    assert jnp.allclose(rope.cos, ref_cos, atol=1e-4), "full cos table mismatch"

    # Secondary check: half-width kernel path (head_dim % 256 == 0).
    rope2 = RotaryEmbedding(head_dim=256, max_pos=128, force_pallas=True)
    ref_sin2, ref_cos2 = _reference_tables(256, 128)
    jax.block_until_ready((rope2.sin, rope2.cos))
    assert jnp.allclose(rope2.sin, ref_sin2, atol=1e-4), "half-path sin mismatch"
    assert jnp.allclose(rope2.cos, ref_cos2, atol=1e-4), "half-path cos mismatch"

    print("KERNEL_OK")
</pallas_src>

<mosaic_0001>
module attributes {stable_mosaic.version = 11 : i64} {
  func.func @_rope_kernel_full(%arg0: i32, %arg1: memref<1x128xf32, #tpu.memory_space<vmem>>, %arg2: memref<256x128xf32, #tpu.memory_space<vmem>>, %arg3: memref<256x128xf32, #tpu.memory_space<vmem>>) attributes {dimension_semantics = [#tpu.dimension_semantics<parallel>], iteration_bounds = array<i64: 2>, scalar_prefetch = 0 : i64, scratch_operands = 0 : i64, tpu.core_type = #tpu.core_type<tc>, window_params = [{pipeline_mode = #tpu.pipeline_mode<synchronous>, transform_indices = @transform_0, window_bounds = array<i64: 1, 128>}, {transform_indices = @transform_1, window_bounds = array<i64: 256, 128>}, {transform_indices = @transform_2, window_bounds = array<i64: 256, 128>}]} {
    %c256_i32 = arith.constant 256 : i32
    %0 = arith.muli %arg0, %c256_i32 : i32
    %1 = tpu.iota {dimensions = array<i32: 0>} : vector<256x128xi32>
    %2 = vector.broadcast %0 : i32 to vector<256x128xi32>
    %3 = arith.addi %1, %2 : vector<256x128xi32>
    %4 = arith.sitofp %3 : vector<256x128xi32> to vector<256x128xf32>
    %c0 = arith.constant 0 : index
    %c0_0 = arith.constant 0 : index
    %5 = vector.load %arg1[%c0, %c0_0] : memref<1x128xf32, #tpu.memory_space<vmem>>, vector<1x128xf32>
    %6 = vector.broadcast %5 : vector<1x128xf32> to vector<256x128xf32>
    %7 = arith.mulf %4, %6 : vector<256x128xf32>
    %8 = math.sin %7 : vector<256x128xf32>
    %c0_1 = arith.constant 0 : index
    %c0_2 = arith.constant 0 : index
    %9 = vector.load %arg2[%c0_1, %c0_2] : memref<256x128xf32, #tpu.memory_space<vmem>>, vector<256x128xf32>
    tpu.vector_store %arg2[%c0_1, %c0_2], %8 {strides = array<i32>} : memref<256x128xf32, #tpu.memory_space<vmem>>, vector<256x128xf32>,
    %10 = math.cos %7 : vector<256x128xf32>
    %c0_3 = arith.constant 0 : index
    %c0_4 = arith.constant 0 : index
    %11 = vector.load %arg3[%c0_3, %c0_4] : memref<256x128xf32, #tpu.memory_space<vmem>>, vector<256x128xf32>
    tpu.vector_store %arg3[%c0_3, %c0_4], %10 {strides = array<i32>} : memref<256x128xf32, #tpu.memory_space<vmem>>, vector<256x128xf32>,
    return
  }
  func.func @transform_0(%arg0: i32) -> (i32, i32) {
    %c0_i32 = arith.constant 0 : i32
    %c0_i32_0 = arith.constant 0 : i32
    %c0_i32_1 = arith.constant 0 : i32
    return %c0_i32, %c0_i32_0 : i32, i32
  }
  func.func @transform_1(%arg0: i32) -> (i32, i32) {
    %c0_i32 = arith.constant 0 : i32
    %c0_i32_0 = arith.constant 0 : i32
    return %arg0, %c0_i32 : i32, i32
  }
  func.func @transform_2(%arg0: i32) -> (i32, i32) {
    %c0_i32 = arith.constant 0 : i32
    %c0_i32_0 = arith.constant 0 : i32
    return %arg0, %c0_i32 : i32, i32
  }
}

</mosaic_0001>

<bundles_post_ra>
// kernel: tpu_custom_call.1
= control target key start
LH: loop header
LB: loop body
LE: loop exit
PB: predicated region body
PF: predicated region fallthrough
CT: control target
= control target key end

     0   :  { %8 = vsyncpa [#allocation3], 0  ;;  %s11665_s0 = inlined_call_operand.hbm [shape: f32[1,128], index: 0, kind: input, shape index: {}]   ;;  %s11666_s1 = inlined_call_operand.hbm [shape: f32[512,128], index: 1, kind: output, shape index: {0}]   ;;  %s11667_s2 = inlined_call_operand.hbm [shape: f32[512,128], index: 2, kind: output, shape index: {1}]  }
   0x1   :  { %9 = vsyncpa [#allocation4], 0 }
   0x2   :  { %11 = vsyncpa [#allocation4 + $0x1], 0 }
   0x3   :  { %12 = vsyncpa [#allocation7], 0 }
   0x4   :  { %14 = vsyncpa [#allocation7 + $0x1], 0  ;;  %s7856_s9 = smov 0   ;;  %s7858_s10 = smov 0  }
   0x5   :  { %s7860_s11 = smov 0   ;;  %s7862_s12 = smov 0  }
   0x6 LB: > { %s7877_s13 = sadd.s32 4294967295, %s7828_s12   ;;  %s7103_s14 = sadd.s32 4294967294, %s7828_s12   ;;  %s7828_s12 = sphi %s7862_s12, %s12296_s12   ;;  %s7824_s11 = sphi %s7860_s11, %s12295_s11   ;;  %s7820_s10 = sphi %s7858_s10, %s12294_s10   ;;  %s7816_s9 = sphi %s7856_s9, %s12293_s9  }
   0x7   : > { %s7881_s15 = sadd.s32 1, %s7828_s12   ;;  %s48_s16 = sadd.s32 1, %s7824_s11 }
   0x8   : > { %s45_s17 = ssub.s32 %s7828_s12, %s7881_s15  ;;  %p58_p0 = scmp.ne.s32.totalorder %s7824_s11, %s7820_s10 }
   0x9   : > { %p46_p1 = scmp.eq.s32.totalorder %s45_s17, 0  ;;  %p59_p2 = scmp.eq.s32.totalorder %s7877_s13, 1 }
   0xa   : > { %p64_p3 = scmp.ne.s32.totalorder %s7820_s10, %s7816_s9  ;;  %p65_p4 = scmp.eq.s32.totalorder %s7103_s14, 1 }
   0xb   : > { %s7892_s18 = scalar_select %p46_p1, %s7824_s11, %s48_s16  }
   0xc   : > { %p7894_p5 = por %p59_p2, %p58_p0  ;;  %p7898_p6 = por %p65_p4, %p64_p3 }
   0xd   : > { %p7104_p7 = scmp.ge.s32.totalorder %s7828_s12, 1  ;;  %p98_p8 = scmp.lt.s32.totalorder %s7828_s12, 3 }
   0xe   : > { %s11924_s19 = scalar_select %p7894_p5, 1, 0 }
   0xf   : > { %s11925_s20 = scalar_select %p7898_p6, 1, 0 }
  0x10   : > { %p11668_p9 = scmp.eq.s32.totalorder %s7877_s13, 0  ;;  %p7905_p10 = pnand %p7104_p7, %p98_p8 }
  0x11   : > { %s7830_s22 = smov [#allocation2]   ;;  %s7702_s27 = scalar_lea.hbm %s11665_s0, 16 }
  0x12   : > { %s11926_s21 = scalar_select %p7905_p10, 1, 0 }
  0x13   : > { %s111_s23 = sshll.u32 %s7830_s22, 4  ;;  %p7514_p11 = pneg %p7905_p10  ;;  %s112_s23 = int_to_ptr.vmem [resolvable:$true] %s111_s23 }
  0x14   : > { %p7703_p13 = scmp.ne.s32.totalorder %s11665_s0, %s7702_s27  ;;  %p7709_p3 = scmp.lt.u32.totalorder %s7702_s27, %s11665_s0 }
  0x15   : > { %p7913_p12 = pnand %p11668_p9, %p7514_p11 }
  0x17   : > { %p7704_p0 = pneg %p7913_p12 }
  0x19   : > { %p7705_p1 = pnand %p7704_p0, %p7703_p13 }
  0x1b   : > { %p7706_p2 = pneg %p7705_p1 }
  0x1d   : > { %p7711_p4 = pnand %p7709_p3, %p7706_p2 }
  0x1f   : > { %7714 = shalt.err (!%p7711_p4)
}
  0x20   : > { %s7715_s4 = scalar_lea.vmem %s112_s23, 16  ;;  %s7722_s5 = scalar_lea.vmem %s112_s23, 32 }
  0x21   : > { %p7716_p7 = scmp.ne.s32.totalorder %s112_s23, %s7715_s4  ;;  %p7723_p9 = scmp.lt.s32.totalorder %s112_s23, %s112_s23 }
  0x22   : > { %p7724_p6 = scmp.lt.s32.totalorder %s7722_s5, %s7715_s4 }
  0x23   : > { %p7718_p8 = pnand %p7716_p7, %p7704_p0 }
  0x24   : > { %p7725_p5 = por %p7724_p6, %p7723_p9 }
  0x25   : > { %p7719_p11 = pneg %p7718_p8 }
  0x27   : > { %p7726_p10 = pnand %p7725_p5, %p7719_p11 }
  0x29   : > { %7729 = shalt.err (!%p7726_p10)
}
  0x2a   : > { %7517 = dma.hbm_to_vmem [thread:$0]  (!%p7913_p12), %s11665_s0, 16, %s112_s23, [#allocation3]  }
  0x2b   : > { %p11928_p13 = scmp.ne.s32.totalorder %s11926_s21, 0 }
  0x2d   : > { %124 = sbr.rel (%p11928_p13) target bundleno = 1003 (0x3eb), region = 24 }
  0x34   : > { %p11929_p1 = scmp.eq.s32.totalorder %s7877_s13, 0 }
  0x36   : > { %7803 = dma.done.wait (%p11929_p1), [#allocation3], 16   ;;  %p11930_p0 = pmov %p11929_p1 }
  0x37   : > { %s7110_s8 = sshll.u32 %s7877_s13, 8  ;;  %v149_v0 = vlaneseq  ;;  %v7950_v9 = vld [vmem:[#allocation2] ss:$0 sm:$0xff]  ;;  %v11692_v45 = vmov 683565275   ;;  %s8213_s14 = sand.u32 1, %s7820_s10  }
  0x38   : > { %7805 = vsyncadd (%p11930_p0), [#allocation3], 4294967280  ;;  %v7940_v1 = vstv %s7110_s8  ;;  %v11697_v47 = vmov 2475754826   ;;  %v11695_v49 = vmov 2131351028  }
  0x39   : > { %v7942_v2 = vshrl.u32 %v149_v0, 7  ;;  %v11688_v51 = vmov 2102212464   ;;  %v11686_v53 = vmov 920167782   ;;  %s7108_s16 = sshll.u32 %s8213_s14, 8 }
  0x3a   : > { %v11684_v60 = vmov 1326507024   ;;  %s8286_s17 = scalar_lea.vmem [#allocation5], %s7108_s16  ;;  %s11076_s21 = scalar_lea.vmem [#allocation6], %s7108_s16 }
  0x3b   : > { %v183_v3 = vadd.s32 %v7940_v1, %v7942_v2  ;;  %v151_v4 = vadd.s32 8, %v7942_v2  ;;  %v152_v5 = vadd.s32 16, %v7942_v2  ;;  %v153_v22 = vadd.s32 24, %v7942_v2  ;;  %s7376_s22 = sshll.u32 %s7877_s13, 12  ;;  %s6993_s23 = sshll.u32 %s8286_s17, 4  ;;  %s11457_s23 = int_to_ptr.vmem [resolvable:$true] %s6993_s23 }
  0x3c   : > { %v154_v26 = vadd.s32 32, %v7942_v2  ;;  %v155_v28 = vadd.s32 40, %v7942_v2  ;;  %s11455_s26 = scalar_lea.hbm %s11666_s1, %s7376_s22  ;;  %s6975_s27 = scalar_lea.sflag [#allocation4], %s8213_s14 }
  0x3d   : > { %v215_v6 = vcvt.s32.f32 %v183_v3  ;;  %v184_v7 = vadd.s32 %v7940_v1, %v151_v4  ;;  %v185_v8 = vadd.s32 %v7940_v1, %v152_v5  ;;  %v7974_v35 = vadd.s32 %v7940_v1, %v153_v22  ;;  %s7730_s28 = scalar_lea.vmem %s11457_s23, 4096  ;;  %p12256_p6 = scmp.ne.s32.totalorder %s11924_s19, 0 }
  0x3e   : > { %v7977_v36 = vadd.s32 %v7940_v1, %v154_v26  ;;  %v7981_v40 = vadd.s32 %v7940_v1, %v155_v28  ;;  %p7731_p5 = scmp.ne.s32.totalorder %s11457_s23, %s7730_s28  ;;  %s7837_s29 = smov [#allocation5]  }
  0x3f   : > { %v7953_v10 = vmul.f32 %v7950_v9, %v215_v6  ;;  %v216_v11 = vcvt.s32.f32 %v184_v7  ;;  %v217_v12 = vcvt.s32.f32 %v185_v8  ;;  %s7734_s30 = sshll.u32 %s7837_s29, 4  ;;  %s7735_s30 = int_to_ptr.vmem [resolvable:$false] %s7734_s30 }
  0x40   : > { %p7732_p9 = pnand %p7731_p5, %p12256_p6  ;;  %s7736_s3 = scalar_lea.vmem %s7735_s30, 8192 }
  0x41   : > { %v286_v13 = vand.u32 2147483647, %v7953_v10  ;;  %v289_v14 = vand.u32 2139095040, %v7953_v10  ;;  %v7958_v15 = vmul.f32 %v7950_v9, %v216_v11  ;;  %v7961_v16 = vmul.f32 %v7950_v9, %v217_v12  ;;  %p7737_p12 = scmp.lt.s32.totalorder %s11457_s23, %s7735_s30  ;;  %p7738_p2 = scmp.lt.s32.totalorder %s7736_s3, %s7730_s28 }
  0x42   : > { %vm288_vm13 = vcmp.lt.s32.totalorder %v7953_v10, 0  ;;  %p7733_p10 = pneg %p7732_p9 }
  0x43   : > { %v290_v17 = vshrl.u32 %v289_v14, 23  ;;  %v293_v18 = vand.u32 8388607, %v286_v13  ;;  %v390_v19 = vand.u32 2147483647, %v7958_v15  ;;  %v393_v20 = vand.u32 2139095040, %v7958_v15  ;;  %p7739_p3 = por %p7738_p2, %p7737_p12 }
  0x44   : > { %v497_v25 = vand.u32 2139095040, %v7961_v16  ;;  %v494_v39 = vand.u32 2147483647, %v7961_v16  ;;  %vm8096_vm14 = vcmp.le.f32.partialorder %v286_v13, 0.7853982 }
  0x45   : > { %v7112_v21 = vadd.s32 4294967169, %v290_v17  ;;  %v394_v23 = vshrl.u32 %v393_v20, 23  ;;  %v397_v24 = vand.u32 8388607, %v390_v19  ;;  %v294_v29 = vor.u32 8388608, %v293_v18  ;;  %p7740_p4 = pnand %p7739_p3, %p7733_p10 }
  0x46   : > { %v498_v32 = vshrl.u32 %v497_v25, 23 }
  0x47   : > { %v296_v27 = vadd.s32 1, %v7112_v21  ;;  %v7116_v30 = vadd.s32 4294967169, %v394_v23  ;;  %v398_v31 = vor.u32 8388608, %v397_v24  ;;  %v7983_v41 = vshll.u32 %v294_v29, 8 }
  0x48   : > { %v7987_v43 = vadd.s32 4294967169, %v498_v32 }
  0x49   : > { %vm297_vm0 = vcmp.gt.s32.totalorder %v296_v27, 0  ;;  %v400_v34 = vadd.s32 1, %v7116_v30  ;;  %v7985_v42 = vshll.u32 %v398_v31, 8 }
  0x4a   : > { %v298_v33 = vsel %vm297_vm0, %v296_v27, 0 }
  0x4b   : > { %v299_v37 = vshrl.u32 %v298_v33, 5  ;;  %v300_v38 = vand.u32 31, %v298_v33  ;;  %vm401_vm1 = vcmp.gt.s32.totalorder %v400_v34, 0 }
  0x4c   : > { %v402_v3 = vsel %vm401_vm1, %v400_v34, 0 }
  0x4d   : > { %v301_v44 = vsub.s32 32, %v300_v38  ;;  %v303_v46 = vshll.u32 %v11692_v45, %v300_v38  ;;  %v306_v48 = vshll.u32 %v11697_v47, %v300_v38  ;;  %v309_v50 = vshll.u32 %v11695_v49, %v300_v38 }
  0x4e   : > { %v312_v52 = vshll.u32 %v11688_v51, %v300_v38  ;;  %v315_v54 = vshll.u32 %v11686_v53, %v300_v38  ;;  %vm318_vm2 = vcmp.lt.s32.totalorder %v299_v37, 1  ;;  %vm319_vm3 = vcmp.lt.s32.totalorder %v299_v37, 2 }
  0x4f   : > { %v302_v55 = vshrl.u32 %v11692_v45, %v301_v44  ;;  %v304_v56 = vshrl.u32 %v11697_v47, %v301_v44  ;;  %v307_v57 = vshrl.u32 %v11695_v49, %v301_v44  ;;  %v310_v58 = vshrl.u32 %v11688_v51, %v301_v44 }
  0x50   : > { %v313_v59 = vshrl.u32 %v11686_v53, %v301_v44  ;;  %v316_v61 = vshrl.u32 %v11684_v60, %v301_v44  ;;  %vm320_vm4 = vcmp.lt.s32.totalorder %v299_v37, 3  ;;  %vm321_vm5 = vcmp.lt.s32.totalorder %v299_v37, 4 }
  0x51   : > { %v305_v62 = vor.u32 %v304_v56, %v303_v46  ;;  %v308_v63 = vor.u32 %v307_v57, %v306_v48  ;;  %v311_v0 = vor.u32 %v310_v58, %v309_v50  ;;  %v403_v6 = vshrl.u32 %v402_v3, 5 }
  0x52   : > { %v314_v4 = vor.u32 %v313_v59, %v312_v52  ;;  %v317_v5 = vor.u32 %v316_v61, %v315_v54  ;;  %v404_v7 = vand.u32 31, %v402_v3  ;;  %v504_v58 = vadd.s32 1, %v7987_v43 }
  0x53   : > { %v322_v8 = vsel %vm318_vm2, %v302_v55, %v305_v62  ;;  %v323_v11 = vsel %vm321_vm5, %v311_v0, 2102212464  ;;  %v326_v12 = vsel %vm318_vm2, %v305_v62, %v308_v63  ;;  %v330_v14 = vsel %vm318_vm2, %v308_v63, %v311_v0 }
  0x54   : > { %v324_v17 = vsel %vm320_vm4, %v308_v63, %v323_v11  ;;  %v327_v18 = vsel %vm321_vm5, %v314_v4, 920167782  ;;  %v331_v20 = vsel %vm321_vm5, %v317_v5, 1326507024  ;;  %v405_v21 = vsub.s32 32, %v404_v7 }
  0x55   : > { %v325_v22 = vsel %vm319_vm3, %v322_v8, %v324_v17  ;;  %v328_v23 = vsel %vm320_vm4, %v311_v0, %v327_v18  ;;  %v332_v24 = vsel %vm320_vm4, %v314_v4, %v331_v20  ;;  %v407_v25 = vshll.u32 %v11692_v45, %v404_v7 }
  0x56   : > { %v329_v26 = vsel %vm319_vm3, %v326_v12, %v328_v23  ;;  %v333_v27 = vsel %vm319_vm3, %v330_v14, %v332_v24  ;;  %v341_v28 = vmul.u32 %v7983_v41, %v325_v22  ;;  %v406_v29 = vshrl.u32 %v11692_v45, %v405_v21 }
  0x57   : > { %v8014_v30 = vmul.u32.u64.low %v7983_v41, %v333_v27  ;;  %v8015_v31 = vmul.u32.u64.high %v7983_v41, %v333_v27, %v8014_v30  ;;  %v8018_v32 = vmul.u32.u64.low %v7983_v41, %v329_v26  ;;  %v8019_v33 = vmul.u32.u64.high %v7983_v41, %v329_v26, %v8018_v32 }
  0x58   : > { %v408_v34 = vshrl.u32 %v11697_v47, %v405_v21  ;;  %v410_v38 = vshll.u32 %v11697_v47, %v404_v7  ;;  %v411_v37 = vshrl.u32 %v11695_v49, %v405_v21  ;;  %v413_v44 = vshll.u32 %v11695_v49, %v404_v7 }
  0x59   : > { %v414_v46 = vshrl.u32 %v11688_v51, %v405_v21  ;;  %v416_v48 = vshll.u32 %v11688_v51, %v404_v7  ;;  %v417_v50 = vshrl.u32 %v11686_v53, %v405_v21  ;;  %v419_v52 = vshll.u32 %v11686_v53, %v404_v7 }
  0x5a   : > { %v409_v54 = vor.u32 %v408_v34, %v407_v25  ;;  %v412_v41 = vor.u32 %v411_v37, %v410_v38  ;;  %v420_v55 = vshrl.u32 %v11684_v60, %v405_v21  ;;  %vm422_vm6 = vcmp.lt.s32.totalorder %v403_v6, 1 }
  0x5b   : > { %vm343_vm7 = vc.u32 %v8015_v31, %v8018_v32  ;;  %v344_v56 = vadd.s32 1, %v8019_v33  ;;  %v415_v57 = vor.u32 %v414_v46, %v413_v44  ;;  %v418_v59 = vor.u32 %v417_v50, %v416_v48 }
  0x5c   : > { %v421_v61 = vor.u32 %v420_v55, %v419_v52  ;;  %vm423_vm8 = vcmp.lt.s32.totalorder %v403_v6, 2  ;;  %vm424_vm9 = vcmp.lt.s32.totalorder %v403_v6, 3  ;;  %vm425_vm10 = vcmp.lt.s32.totalorder %v403_v6, 4 }
  0x5d   : > { %v345_v62 = vsel %vm343_vm7, %v344_v56, %v8019_v33  ;;  %v426_v63 = vsel %vm422_vm6, %v406_v29, %v409_v54  ;;  %v430_v0 = vsel %vm422_vm6, %v409_v54, %v412_v41  ;;  %v427_v4 = vsel %vm425_vm10, %v415_v57, 2102212464 }
  0x5e   : > { %v346_v3 = vadd.s32 %v345_v62, %v341_v28  ;;  %v431_v5 = vsel %vm425_vm10, %v418_v59, 920167782  ;;  %v434_v7 = vsel %vm422_vm6, %v412_v41, %v415_v57  ;;  %v428_v8 = vsel %vm424_vm9, %v412_v41, %v427_v4 }
  0x5f   : > { %v432_v11 = vsel %vm424_vm9, %v415_v57, %v431_v5  ;;  %v435_v12 = vsel %vm425_vm10, %v421_v61, 1326507024  ;;  %vm505_vm11 = vcmp.gt.s32.totalorder %v504_v58, 0  ;;  %v218_v18 = vcvt.s32.f32 %v7974_v35 }
  0x60   : > { %v347_v43 = vadd.s32 536870912, %v346_v3  ;;  %v433_v14 = vsel %vm423_vm8, %v430_v0, %v432_v11  ;;  %v436_v17 = vsel %vm424_vm9, %v418_v59, %v435_v12  ;;  %v429_v20 = vsel %vm423_vm8, %v426_v63, %v428_v8 }
  0x61   : > { %v437_v21 = vsel %vm423_vm8, %v434_v7, %v436_v17  ;;  %v8044_v22 = vmul.u32.u64.low %v7985_v42, %v433_v14  ;;  %v8045_v23 = vmul.u32.u64.high %v7985_v42, %v433_v14, %v8044_v22  ;;  %v506_v27 = vsel %vm505_vm11, %v504_v58, 0 }
  0x62   : > { %v348_v24 = vshrl.u32 %v347_v43, 30  ;;  %v8049_v25 = vmul.u32.u64.low %v7985_v42, %v437_v21  ;;  %v8050_v26 = vmul.u32.u64.high %v7985_v42, %v437_v21, %v8049_v25  ;;  %v501_v28 = vand.u32 8388607, %v494_v39 }
  0x63   : > { %v508_v29 = vand.u32 31, %v506_v27  ;;  %v219_v35 = vcvt.s32.f32 %v7977_v36  ;;  %v445_v6 = vmul.u32 %v7985_v42, %v429_v20  ;;  %v8057_v33 = vmul.f32 %v7950_v9, %v218_v18 }
  0x64   : > { %v349_v30 = vshll.u32 %v348_v24, 30  ;;  %v448_v34 = vadd.s32 1, %v8045_v23  ;;  %v8061_v38 = vadd.s32 48, %v7942_v2  ;;  %vm447_vm12 = vc.u32 %v8050_v26, %v8044_v22 }
  0x65   : > { %11931 = vst [vmem:[#allocation11_spill] sm:$0xff] %v8057_v33  ;;  %v509_v44 = vsub.s32 32, %v508_v29  ;;  %v220_v46 = vcvt.s32.f32 %v7981_v40  ;;  %v502_v42 = vor.u32 8388608, %v501_v28  ;;  %v8071_v48 = vmul.f32 %v7950_v9, %v219_v35 }
  0x66   : > { %v8063_v37 = vsub.s32 %v346_v3, %v349_v30  ;;  %v449_v36 = vsel %vm447_vm12, %v448_v34, %v8045_v23  ;;  %v8074_v54 = vshrl.u32 %v506_v27, 5  ;;  %v601_v41 = vand.u32 2139095040, %v8057_v33 }
  0x67   : > { %11932 = vst [vmem:[#allocation12_spill] sm:$0xff] %v8071_v48  ;;  %v450_v52 = vadd.s32 %v449_v36, %v445_v6  ;;  %v372_v55 = vsub.s32 4, %v348_v24  ;;  %v511_v56 = vshll.u32 %v11692_v45, %v508_v29  ;;  %v514_v57 = vshll.u32 %v11697_v47, %v508_v29 }
  0x68   : > { %v352_v50 = vsub.s32 0, %v8063_v37  ;;  %v520_v58 = vshll.u32 %v11688_v51, %v508_v29  ;;  %v512_v62 = vshrl.u32 %v11697_v47, %v509_v44  ;;  %v515_v63 = vshrl.u32 %v11695_v49, %v509_v44 }
  0x69   : > { %v451_v61 = vadd.s32 536870912, %v450_v52  ;;  %v517_v0 = vshll.u32 %v11695_v49, %v508_v29  ;;  %v518_v3 = vshrl.u32 %v11688_v51, %v509_v44  ;;  %v521_v4 = vshrl.u32 %v11686_v53, %v509_v44 }
  0x6a   : > { %v7113_v59 = vmin.u32 %v352_v50, %v8063_v37  ;;  %v8086_v5 = vshll.u32 %v502_v42, 8  ;;  %v342_v7 = vadd.s32 %v8018_v32, %v8015_v31  ;;  %v523_v11 = vshll.u32 %v11686_v53, %v508_v29 }
  0x6b   : > { %v524_v12 = vshrl.u32 %v11684_v60, %v509_v44  ;;  %v373_v43 = vsel %vm288_vm13, %v372_v55, %v348_v24  ;;  %v452_v14 = vshrl.u32 %v451_v61, 30  ;;  %v522_v17 = vor.u32 %v521_v4, %v520_v58 }
  0x6c   : > { %v354_v8 = vclz %v7113_v59  ;;  %v602_v18 = vshrl.u32 %v601_v41, 23  ;;  %v513_v23 = vor.u32 %v512_v62, %v511_v56  ;;  %v516_v31 = vor.u32 %v515_v63, %v514_v57 }
  0x6d   : > { %vm529_vm15 = vcmp.lt.s32.totalorder %v8074_v54, 4  ;;  %v453_v32 = vshll.u32 %v452_v14, 30  ;;  %v510_v25 = vshrl.u32 %v11692_v45, %v509_v44  ;;  %v519_v27 = vor.u32 %v518_v3, %v517_v0 }
  0x6e   : > { %v7114_v21 = vadd.s32 4294967294, %v354_v8  ;;  %vm526_vm0 = vcmp.lt.s32.totalorder %v8074_v54, 1  ;;  %v525_v24 = vor.u32 %v524_v12, %v523_v11  ;;  %vm528_vm2 = vcmp.lt.s32.totalorder %v8074_v54, 3 }
  0x6f   : > { %v535_v13 = vsel %vm529_vm15, %v522_v17, 920167782  ;;  %v8106_v29 = vsub.s32 %v450_v52, %v453_v32  ;;  %vm527_vm3 = vcmp.lt.s32.totalorder %v8074_v54, 2  ;;  %v531_v35 = vsel %vm529_vm15, %v519_v27, 2102212464 }
  0x70   : > { %vm7115_vm1 = vcmp.lt.s32.totalorder %v7114_v21, 0  ;;  %v534_v44 = vsel %vm526_vm0, %v513_v23, %v516_v31  ;;  %v530_v42 = vsel %vm526_vm0, %v510_v25, %v513_v23  ;;  %v536_v50 = vsel %vm528_vm2, %v519_v27, %v535_v13 }
  0x71   : > { %v357_v28 = vsel %vm7115_vm1, 0, %v7114_v21  ;;  %v456_v36 = vsub.s32 0, %v8106_v29  ;;  %v538_v52 = vsel %vm526_vm0, %v516_v31, %v519_v27  ;;  %v539_v56 = vsel %vm529_vm15, %v525_v24, 1326507024 }
  0x72   : > { %v358_v30 = vsub.s32 32, %v357_v28  ;;  %v359_v6 = vshll.u32 %v8063_v37, %v357_v28  ;;  %v362_v34 = vsub.s32 4294967266, %v357_v28  ;;  %v532_v37 = vsel %vm528_vm2, %v516_v31, %v531_v35 }
  0x73   : > { %v7117_v57 = vmin.u32 %v456_v36, %v8106_v29  ;;  %v537_v58 = vsel %vm527_vm3, %v534_v44, %v536_v50  ;;  %v540_v59 = vsel %vm528_vm2, %v522_v17, %v539_v56  ;;  %v598_v61 = vand.u32 2147483647, %v8057_v33 }
  0x74   : > { %v360_v41 = vshrl.u32 %v342_v7, %v358_v30  ;;  %v363_v55 = vadd.s32 127, %v362_v34  ;;  %v541_v0 = vsel %vm527_vm3, %v538_v52, %v540_v59  ;;  %v7124_v3 = vadd.s32 4294967169, %v602_v18 }
  0x75   : > { %v8135_v4 = vsel %vm8096_vm14, 0, %v373_v43  ;;  %v458_v7 = vclz %v7117_v57  ;;  %v476_v8 = vsub.s32 4, %v452_v14  ;;  %v533_v11 = vsel %vm527_vm3, %v530_v42, %v532_v37 }
  0x76   : > { %v361_v62 = vor.u32 %v360_v41, %v359_v6  ;;  %v364_v63 = vshll.u32 %v363_v55, 23  ;;  %v8140_v17 = vmul.u32.u64.low %v8086_v5, %v541_v0  ;;  %v8141_v23 = vmul.u32.u64.high %v8086_v5, %v541_v0, %v8140_v17 }
  0x77   : > { %v7118_v31 = vadd.s32 4294967294, %v458_v7  ;;  %v8144_v32 = vmul.u32.u64.low %v8086_v5, %v537_v58  ;;  %v8145_v25 = vmul.u32.u64.high %v8086_v5, %v537_v58, %v8144_v32  ;;  %v608_v18 = vadd.s32 1, %v7124_v3 }
  0x78   : > { %v365_v12 = vor.u32 4788187, %v364_v63  ;;  %v368_v21 = vcvt.s32.f32 %v361_v62  ;;  %vm392_vm4 = vcmp.lt.s32.totalorder %v7958_v15, 0  ;;  %v446_v54 = vadd.s32 %v8044_v22, %v8050_v26 }
  0x79   : > { %v605_v27 = vand.u32 8388607, %v598_v61  ;;  %v379_v24 = vadd.s32 3, %v8135_v4  ;;  %vm7119_vm5 = vcmp.lt.s32.totalorder %v7118_v31, 0  ;;  %v477_v13 = vsel %vm392_vm4, %v476_v8, %v452_v14 }
  0x7a   : > { %v366_v43 = vand.u32 2147483647, %v365_v12  ;;  %vm609_vm6 = vcmp.gt.s32.totalorder %v608_v18, 0  ;;  %v461_v35 = vsel %vm7119_vm5, 0, %v7118_v31  ;;  %v549_v30 = vmul.u32 %v8086_v5, %v533_v11 }
  0x7b   : > { %vm551_vm7 = vc.u32 %v8141_v23, %v8144_v32  ;;  %v462_v6 = vsub.s32 32, %v461_v35  ;;  %v463_v22 = vshll.u32 %v8106_v29, %v461_v35  ;;  %v466_v26 = vsub.s32 4294967266, %v461_v35 }
  0x7c   : > { %v369_v28 = vmul.f32 %v368_v21, %v366_v43  ;;  %v552_v34 = vadd.s32 1, %v8145_v25  ;;  %vm8163_vm8 = vcmp.le.f32.partialorder %v390_v19, 0.7853982  ;;  %v610_v14 = vsel %vm609_vm6, %v608_v18, 0 }
  0x7d   : > { %v8170_v5 = vmul.f32 %v7950_v9, %v220_v46  ;;  %v8172_v42 = vand.u32 3, %v379_v24  ;;  %v464_v50 = vshrl.u32 %v446_v54, %v462_v6  ;;  %v467_v29 = vadd.s32 127, %v466_v26 }
  0x7e   : > { %v370_v44 = vxor.u32 2147483648, %v369_v28  ;;  %v553_v52 = vsel %vm551_vm7, %v552_v34, %v8145_v25  ;;  %v8179_v19 = vsel %vm8163_vm8, 0, %v477_v13  ;;  %v612_v37 = vand.u32 31, %v610_v14 }
  0x7f   : > { %11937 = vst [vmem:[#allocation13_spill] sm:$0xff] %v8170_v5  ;;  %v554_v55 = vadd.s32 %v553_v52, %v549_v30  ;;  %v465_v46 = vor.u32 %v464_v50, %v463_v22  ;;  %v468_v56 = vshll.u32 %v467_v29, 23  ;;  %v606_v57 = vor.u32 8388608, %v605_v27 }
  0x80   : > { %v371_v41 = vsel %vm288_vm13, %v370_v44, %v369_v28  ;;  %v613_v59 = vsub.s32 32, %v612_v37  ;;  %v702_v62 = vand.u32 2147483647, %v8071_v48  ;;  %v483_v3 = vadd.s32 3, %v8179_v19 }
  0x81   : > { %v374_v40 = vsel %vm8096_vm14, %v7953_v10, %v371_v41  ;;  %v555_v58 = vadd.s32 536870912, %v554_v55  ;;  %v469_v63 = vor.u32 4788187, %v468_v56  ;;  %v472_v0 = vcvt.s32.f32 %v465_v46 }
  0x82   : > { %7569 = vcosq.f32 %v374_v40  ;;  %vm385_vm9 = vcmp.eq.s32.totalorder %v8172_v42, 2  ;;  %v615_v20 = vshll.u32 %v11692_v45, %v612_v37  ;;  %v618_v8 = vshll.u32 %v11697_v47, %v612_v37 }
  0x83   : > { %7571 = vsinq.f32 %v374_v40  ;;  %v8187_v7 = vshrl.u32 %v555_v58, 30  ;;  %v705_v11 = vand.u32 2139095040, %v8071_v48  ;;  %vm382_vm10 = vcmp.eq.s32.totalorder %v8172_v42, 0 }
  0x84   : > { %v470_v12 = vand.u32 2147483647, %v469_v63  ;;  %v616_v21 = vshrl.u32 %v11697_v47, %v613_v59  ;;  %v619_v17 = vshrl.u32 %v11695_v49, %v613_v59  ;;  %v624_v31 = vshll.u32 %v11688_v51, %v612_v37 }
  0x85   : > { %vm381_vm11 = vcmp.lt.s32.totalorder %v8172_v42, 2  ;;  %v557_v25 = vshll.u32 %v8187_v7, 30  ;;  %v8198_v18 = vshrl.u32 %v610_v14, 5  ;;  %v621_v43 = vshll.u32 %v11695_v49, %v612_v37 }
  0x86   : > { %v622_v54 = vshrl.u32 %v11688_v51, %v613_v59  ;;  %vm378_vm12 = vweird.f32 %v7953_v10  ;;  %v473_v27 = vmul.f32 %v472_v0, %v470_v12  ;;  %v8203_v24 = vand.u32 3, %v483_v3 }
  0x87   : > { %v625_v13 = vshrl.u32 %v11686_v53, %v613_v59  ;;  %v8206_v28 = vshll.u32 %v606_v57, 8  ;;  %v8208_v35 = vsub.s32 %v554_v55, %v557_v25  ;;  %v627_v30 = vshll.u32 %v11686_v53, %v612_v37 }
  0x88   : > { %v628_v6 = vshrl.u32 %v11684_v60, %v613_v59  ;;  %v706_v22 = vshrl.u32 %v705_v11, 23  ;;  %v474_v26 = vxor.u32 2147483648, %v473_v27  ;;  %v617_v34 = vor.u32 %v616_v21, %v615_v20 }
  0x89   : > { %v620_v44 = vor.u32 %v619_v17, %v618_v8  ;;  %v626_v14 = vor.u32 %v625_v13, %v624_v31  ;;  %v560_v50 = vsub.s32 0, %v8208_v35  ;;  %v623_v29 = vor.u32 %v622_v54, %v621_v43 }
  0x8a   : > { %vm630_vm13 = vcmp.lt.s32.totalorder %v8198_v18, 1  ;;  %vm633_vm14 = vcmp.lt.s32.totalorder %v8198_v18, 4  ;;  %v475_v52 = vsel %vm392_vm4, %v474_v26, %v473_v27  ;;  %v614_v41 = vshrl.u32 %v11692_v45, %v613_v59 }
  0x8b   : > { %vm631_vm15 = vcmp.lt.s32.totalorder %v8198_v18, 2  ;;  %vm632_vm0 = vcmp.lt.s32.totalorder %v8198_v18, 3  ;;  %v478_v37 = vsel %vm8163_vm8, %v7958_v15, %v475_v52  ;;  %v7121_v40 = vmin.u32 %v560_v50, %v8208_v35 }
  0x8c   : > { %v8223_v55 = vpop.eup %7569  ;;  %v629_v46 = vor.u32 %v628_v6, %v627_v30  ;;  %v635_v56 = vsel %vm633_vm14, %v623_v29, 2102212464  ;;  %7573 = vcosq.f32 %v478_v37  ;;  %v638_v59 = vsel %vm630_vm13, %v617_v34, %v620_v44 }
  0x8d   : > { %v8231_v57 = vpop.eup %7571  ;;  %v11677_v58 = vxor.u32 2147483648, %v8223_v55  ;;  %v639_v63 = vsel %vm633_vm14, %v626_v14, 920167782  ;;  %7575 = vsinq.f32 %v478_v37  ;;  %v562_v0 = vclz %v7121_v40 }
  0x8e   : > { %v11678_v36 = vxor.u32 2147483648, %v8231_v57  ;;  %v7128_v3 = vadd.s32 4294967169, %v706_v22  ;;  %vm496_vm1 = vcmp.lt.s32.totalorder %v7961_v16, 0  ;;  %v634_v8 = vsel %vm630_vm13, %v614_v41, %v617_v34 }
  0x8f   : > { %v387_v20 = vsel %vm385_vm9, %v11677_v58, %v8231_v57  ;;  %v636_v11 = vsel %vm632_vm0, %v620_v44, %v635_v56  ;;  %v640_v12 = vsel %vm632_vm0, %v623_v29, %v639_v63  ;;  %v7122_v17 = vadd.s32 4294967294, %v562_v0 }
  0x90   : > { %v384_v21 = vsel %vm382_vm10, %v8223_v55, %v11678_v36  ;;  %v641_v31 = vsel %vm631_vm15, %v638_v59, %v640_v12  ;;  %v642_v25 = vsel %vm630_vm13, %v620_v44, %v623_v29  ;;  %vm485_vm2 = vcmp.lt.s32.totalorder %v8203_v24, 2 }
  0x91   : > { %v388_v43 = vsel %vm381_vm11, %v384_v21, %v387_v20  ;;  %v643_v54 = vsel %vm633_vm14, %v629_v46, 1326507024  ;;  %v8267_v27 = vmul.u32.u64.low %v8206_v28, %v641_v31  ;;  %v8268_v13 = vmul.u32.u64.high %v8206_v28, %v641_v31, %v8267_v27 }
  0x92   : > { %v389_v30 = vsel %vm378_vm12, nan, %v388_v43  ;;  %vm482_vm3 = vweird.f32 %v7958_v15  ;;  %vm8276_vm4 = vcmp.le.f32.partialorder %v494_v39, 0.7853982  ;;  %v550_v6 = vadd.s32 %v8144_v32, %v8141_v23 }
  0x93   : > { %vm7123_vm5 = vcmp.lt.s32.totalorder %v7122_v17, 0  ;;  %v644_v22 = vsel %vm632_vm0, %v626_v14, %v643_v54  ;;  %3614 = vst [vmem:[%s8286_s17] sm:$0xff] %v389_v30  ;;  %v580_v34 = vsub.s32 4, %v8187_v7  ;;  %v712_v44 = vadd.s32 1, %v7128_v3 }
  0x94   : > { %v565_v26 = vsel %vm7123_vm5, 0, %v7122_v17  ;;  %v645_v39 = vsel %vm631_vm15, %v642_v25, %v644_v22  ;;  %v637_v32 = vsel %vm631_vm15, %v634_v8, %v636_v11  ;;  %v709_v41 = vand.u32 8388607, %v702_v62 }
  0x95   : > { %v566_v50 = vsub.s32 32, %v565_v26  ;;  %v567_v29 = vshll.u32 %v8208_v35, %v565_v26  ;;  %v570_v23 = vsub.s32 4294967266, %v565_v26  ;;  %vm713_vm6 = vcmp.gt.s32.totalorder %v712_v44, 0 }
  0x96   : > { %v8296_v14 = vmul.u32.u64.low %v8206_v28, %v645_v39  ;;  %v8297_v52 = vmul.u32.u64.high %v8206_v28, %v645_v39, %v8296_v14  ;;  %v656_v46 = vadd.s32 1, %v8268_v13  ;;  %v714_v56 = vsel %vm713_vm6, %v712_v44, 0  ;;  %v8302_v59 = vpop.eup %7573 }
  0x97   : > { %v568_v37 = vshrl.u32 %v550_v6, %v566_v50  ;;  %v571_v40 = vadd.s32 127, %v570_v23  ;;  %vm486_vm7 = vcmp.eq.s32.totalorder %v8203_v24, 0  ;;  %vm489_vm8 = vcmp.eq.s32.totalorder %v8203_v24, 2  ;;  %v8307_v63 = vpop.eup %7575 }
  0x98   : > { %v653_v18 = vmul.u32 %v8206_v28, %v637_v32  ;;  %v716_v35 = vand.u32 31, %v714_v56  ;;  %v11675_v0 = vxor.u32 2147483648, %v8302_v59  ;;  %v581_v8 = vsel %vm496_vm1, %v580_v34, %v8187_v7 }
  0x99   : > { %v569_v3 = vor.u32 %v568_v37, %v567_v29  ;;  %v572_v20 = vshll.u32 %v571_v40, 23  ;;  %v11676_v11 = vxor.u32 2147483648, %v8307_v63  ;;  %vm655_vm9 = vc.u32 %v8297_v52, %v8267_v27 }
  0x9a   : > { %v710_v12 = vor.u32 8388608, %v709_v41  ;;  %v717_v21 = vsub.s32 32, %v716_v35  ;;  %v491_v28 = vsel %vm489_vm8, %v11675_v0, %v8307_v63  ;;  %v657_v25 = vsel %vm655_vm9, %v656_v46, %v8268_v13 }
  0x9b   : > { %v573_v17 = vor.u32 4788187, %v572_v20  ;;  %v576_v31 = vcvt.s32.f32 %v569_v3  ;;  %v488_v7 = vsel %vm486_vm7, %v8302_v59, %v11676_v11  ;;  %v8327_v43 = vsel %vm8276_vm4, 0, %v581_v8 }
  0x9c   : > { %v658_v54 = vadd.s32 %v657_v25, %v653_v18  ;;  %v719_v30 = vshll.u32 %v11692_v45, %v716_v35  ;;  %v492_v6 = vsel %vm485_vm2, %v488_v7, %v491_v28  ;;  %v720_v26 = vshrl.u32 %v11697_v47, %v717_v21 }
  0x9d   : > { %v574_v22 = vand.u32 2147483647, %v573_v17  ;;  %v722_v13 = vshll.u32 %v11697_v47, %v716_v35  ;;  %v493_v34 = vsel %vm482_vm3, nan, %v492_v6  ;;  %v723_v44 = vshrl.u32 %v11695_v49, %v717_v21 }
  0x9e   : > { %v659_v39 = vadd.s32 536870912, %v658_v54  ;;  %v725_v50 = vshll.u32 %v11695_v49, %v716_v35  ;;  %3615 = vst [vmem:[%s8286_s17 + $0x8] sm:$0xff] %v493_v34  ;;  %v715_v23 = vshrl.u32 %v714_v56, 5  ;;  %v726_v32 = vshrl.u32 %v11688_v51, %v717_v21 }
  0x9f   : > { %v577_v29 = vmul.f32 %v576_v31, %v574_v22  ;;  %v728_v24 = vshll.u32 %v11688_v51, %v716_v35  ;;  %v587_v14 = vadd.s32 3, %v8327_v43  ;;  %v729_v37 = vshrl.u32 %v11686_v53, %v717_v21 }
  0xa0   : > { %v660_v41 = vshrl.u32 %v659_v39, 30  ;;  %v731_v40 = vshll.u32 %v11686_v53, %v716_v35  ;;  %v718_v18 = vshrl.u32 %v11692_v45, %v717_v21  ;;  %v732_v3 = vshrl.u32 %v11684_v60, %v717_v21 }
  0xa1   : > { %v578_v46 = vxor.u32 2147483648, %v577_v29  ;;  %v8346_v20 = vshll.u32 %v710_v12, 8  ;;  %v721_v56 = vor.u32 %v720_v26, %v719_v30  ;;  %v724_v28 = vor.u32 %v723_v44, %v722_v13 }
  0xa2   : > { %v661_v8 = vshll.u32 %v660_v41, 30  ;;  %v727_v17 = vor.u32 %v726_v32, %v725_v50  ;;  %v730_v25 = vor.u32 %v729_v37, %v728_v24  ;;  %v733_v7 = vor.u32 %v732_v3, %v731_v40 }
  0xa3   : > { %v579_v31 = vsel %vm496_vm1, %v578_v46, %v577_v29  ;;  %vm734_vm10 = vcmp.lt.s32.totalorder %v715_v23, 1  ;;  %vm737_vm11 = vcmp.lt.s32.totalorder %v715_v23, 4  ;;  %v809_v12 = vand.u32 2139095040, %v8170_v5 }
  0xa4   : > { %v582_v35 = vsel %vm8276_vm4, %v7961_v16, %v579_v31  ;;  %v8353_v6 = vsub.s32 %v658_v54, %v661_v8  ;;  %vm735_vm13 = vcmp.lt.s32.totalorder %v715_v23, 2  ;;  %vm736_vm14 = vcmp.lt.s32.totalorder %v715_v23, 3 }
  0xa5   : > { %7577 = vcosq.f32 %v582_v35  ;;  %v739_v21 = vsel %vm737_vm11, %v727_v17, 2102212464  ;;  %v738_v22 = vsel %vm734_vm10, %v718_v18, %v721_v56  ;;  %v742_v26 = vsel %vm734_vm10, %v721_v56, %v724_v28 }
  0xa6   : > { %7579 = vsinq.f32 %v582_v35  ;;  %v664_v30 = vsub.s32 0, %v8353_v6  ;;  %v740_v13 = vsel %vm736_vm14, %v724_v28, %v739_v21  ;;  %v743_v34 = vsel %vm737_vm11, %v730_v25, 920167782 }
  0xa7   : > { %v746_v39 = vsel %vm734_vm10, %v724_v28, %v727_v17  ;;  %v747_v44 = vsel %vm737_vm11, %v733_v7, 1326507024  ;;  %v744_v54 = vsel %vm736_vm14, %v727_v17, %v743_v34  ;;  %v588_v29 = vand.u32 3, %v587_v14 }
  0xa8   : > { %v7125_v42 = vmin.u32 %v664_v30, %v8353_v6  ;;  %v748_v50 = vsel %vm736_vm14, %v730_v25, %v747_v44  ;;  %v745_v32 = vsel %vm735_vm13, %v742_v26, %v744_v54  ;;  %v810_v37 = vshrl.u32 %v809_v12, 23 }
  0xa9   : > { %v749_v24 = vsel %vm735_vm13, %v746_v39, %v748_v50  ;;  %v684_v46 = vsub.s32 4, %v660_v41  ;;  %v741_v3 = vsel %vm735_vm13, %v738_v22, %v740_v13  ;;  %v8363_v18 = vadd.s32 %v7940_v1, %v8061_v38 }
  0xaa   : > { %v666_v40 = vclz %v7125_v42  ;;  %v8366_v8 = vmul.u32.u64.low %v8346_v20, %v749_v24  ;;  %v8367_v56 = vmul.u32.u64.high %v8346_v20, %v749_v24, %v8366_v8  ;;  %vm586_vm15 = vweird.f32 %v7961_v16 }
  0xab   : > { %v8370_v28 = vmul.u32.u64.low %v8346_v20, %v745_v32  ;;  %v8371_v14 = vmul.u32.u64.high %v8346_v20, %v745_v32, %v8370_v28  ;;  %vm600_vm0 = vcmp.lt.s32.totalorder %v8057_v33, 0  ;;  %v7132_v23 = vadd.s32 4294967169, %v810_v37 }
  0xac   : > { %v7126_v17 = vadd.s32 4294967294, %v666_v40  ;;  %vm590_vm1 = vcmp.eq.s32.totalorder %v588_v29, 0  ;;  %vm593_vm2 = vcmp.eq.s32.totalorder %v588_v29, 2  ;;  %vm8378_vm4 = vcmp.le.f32.partialorder %v598_v61, 0.7853982 }
  0xad   : > { %v806_v31 = vand.u32 2147483647, %v8170_v5  ;;  %v654_v25 = vadd.s32 %v8267_v27, %v8297_v52  ;;  %v757_v7 = vmul.u32 %v8346_v20, %v741_v3  ;;  %v816_v35 = vadd.s32 1, %v7132_v23 }
  0xae   : > { %vm7127_vm5 = vcmp.lt.s32.totalorder %v7126_v17, 0  ;;  %v685_v30 = vsel %vm600_vm0, %v684_v46, %v660_v41  ;;  %vm759_vm6 = vc.u32 %v8367_v56, %v8370_v28  ;;  %v760_v61 = vadd.s32 1, %v8371_v14 }
  0xaf   : > { %v8386_v12 = vpop.eup %7577  ;;  %v669_v21 = vsel %vm7127_vm5, 0, %v7126_v17  ;;  %vm589_vm7 = vcmp.lt.s32.totalorder %v588_v29, 2  ;;  %vm817_vm8 = vcmp.gt.s32.totalorder %v816_v35, 0  ;;  %v8409_v54 = vsel %vm8378_vm4, 0, %v685_v30 }
  0xb0   : > { %v8393_v22 = vpop.eup %7579  ;;  %v11673_v26 = vxor.u32 2147483648, %v8386_v12  ;;  %v670_v27 = vsub.s32 32, %v669_v21  ;;  %v671_v52 = vshll.u32 %v8353_v6, %v669_v21  ;;  %v674_v20 = vsub.s32 4294967266, %v669_v21 }
  0xb1   : > { %v11674_v13 = vxor.u32 2147483648, %v8393_v22  ;;  %v761_v34 = vsel %vm759_vm6, %v760_v61, %v8371_v14  ;;  %v813_v50 = vand.u32 8388607, %v806_v31  ;;  %v818_v32 = vsel %vm817_vm8, %v816_v35, 0 }
  0xb2   : > { %v595_v41 = vsel %vm593_vm2, %v11673_v26, %v8393_v22  ;;  %v672_v39 = vshrl.u32 %v654_v25, %v670_v27  ;;  %v675_v44 = vadd.s32 127, %v674_v20  ;;  %v762_v42 = vadd.s32 %v761_v34, %v757_v7 }
  0xb3   : > { %v592_v6 = vsel %vm590_vm1, %v8386_v12, %v11674_v13  ;;  %v820_v8 = vand.u32 31, %v818_v32  ;;  %v221_v23 = vcvt.s32.f32 %v8363_v18  ;;  %v691_v25 = vadd.s32 3, %v8409_v54 }
  0xb4   : > { %v596_v24 = vsel %vm589_vm7, %v592_v6, %v595_v41  ;;  %v673_v37 = vor.u32 %v672_v39, %v671_v52  ;;  %v676_v40 = vshll.u32 %v675_v44, 23  ;;  %v763_v46 = vadd.s32 536870912, %v762_v42 }
  0xb5   : > { %v597_v3 = vsel %vm586_vm15, nan, %v596_v24  ;;  %v814_v7 = vor.u32 8388608, %v813_v50  ;;  %v819_v21 = vshrl.u32 %v818_v32, 5  ;;  %v821_v35 = vsub.s32 32, %v820_v8 }
  0xb6   : > { %3616 = vst [vmem:[%s8286_s17 + $0x10] sm:$0xff] %v597_v3  ;;  %v677_v14 = vor.u32 4788187, %v676_v40  ;;  %v680_v29 = vcvt.s32.f32 %v673_v37  ;;  %v8416_v17 = vshrl.u32 %v763_v46, 30  ;;  %v823_v27 = vshll.u32 %v11692_v45, %v820_v8 }
  0xb7   : > { %v826_v52 = vshll.u32 %v11697_v47, %v820_v8  ;;  %v824_v20 = vshrl.u32 %v11697_v47, %v821_v35  ;;  %v827_v34 = vshrl.u32 %v11695_v49, %v821_v35  ;;  %v829_v41 = vshll.u32 %v11695_v49, %v820_v8 }
  0xb8   : > { %v678_v30 = vand.u32 2147483647, %v677_v14  ;;  %v765_v61 = vshll.u32 %v8416_v17, 30  ;;  %v830_v18 = vshrl.u32 %v11688_v51, %v821_v35  ;;  %v832_v6 = vshll.u32 %v11688_v51, %v820_v8 }
  0xb9   : > { %v833_v50 = vshrl.u32 %v11686_v53, %v821_v35  ;;  %v8431_v32 = vand.u32 3, %v691_v25  ;;  %v758_v24 = vadd.s32 %v8370_v28, %v8367_v56  ;;  %v8435_v37 = vshll.u32 %v814_v7, 8 }
  0xba   : > { %v681_v39 = vmul.f32 %v680_v29, %v678_v30  ;;  %v8427_v44 = vsub.s32 %v762_v42, %v765_v61  ;;  %v8438_v40 = vmul.f32 %v7950_v9, %v221_v23  ;;  %v822_v42 = vshrl.u32 %v11692_v45, %v821_v35 }
  0xbb   : > { %v825_v14 = vor.u32 %v824_v20, %v823_v27  ;;  %v828_v29 = vor.u32 %v827_v34, %v826_v52  ;;  %v831_v30 = vor.u32 %v830_v18, %v829_v41  ;;  %v835_v61 = vshll.u32 %v11686_v53, %v820_v8 }
  0xbc   : > { %11942 = vst [vmem:[#allocation14_spill] sm:$0xff] %v8438_v40  ;;  %v682_v46 = vxor.u32 2147483648, %v681_v39  ;;  %v768_v3 = vsub.s32 0, %v8427_v44  ;;  %v836_v25 = vshrl.u32 %v11684_v60, %v821_v35  ;;  %vm704_vm9 = vcmp.lt.s32.totalorder %v8071_v48, 0 }
  0xbd   : > { %v834_v28 = vor.u32 %v833_v50, %v832_v6  ;;  %vm838_vm10 = vcmp.lt.s32.totalorder %v819_v21, 1  ;;  %vm841_vm11 = vcmp.lt.s32.totalorder %v819_v21, 4  ;;  %v913_v27 = vand.u32 2139095040, %v8438_v40 }
  0xbe   : > { %v683_v56 = vsel %vm600_vm0, %v682_v46, %v681_v39  ;;  %v7129_v9 = vmin.u32 %v768_v3, %v8427_v44  ;;  %v837_v7 = vor.u32 %v836_v25, %v835_v61  ;;  %vm839_vm13 = vcmp.lt.s32.totalorder %v819_v21, 2 }
  0xbf   : > { %v686_v23 = vsel %vm8378_vm4, %v8057_v33, %v683_v56  ;;  %vm840_vm14 = vcmp.lt.s32.totalorder %v819_v21, 3  ;;  %vm8454_vm0 = vcmp.le.f32.partialorder %v702_v62, 0.7853982  ;;  %v842_v52 = vsel %vm838_vm10, %v822_v42, %v825_v14 }
  0xc0   : > { %7581 = vcosq.f32 %v686_v23  ;;  %v770_v8 = vclz %v7129_v9  ;;  %v843_v38 = vsel %vm841_vm11, %v831_v30, 2102212464  ;;  %v846_v20 = vsel %vm838_vm10, %v825_v14, %v828_v29 }
  0xc1   : > { %7583 = vsinq.f32 %v686_v23  ;;  %v844_v41 = vsel %vm840_vm14, %v828_v29, %v843_v38  ;;  %v847_v18 = vsel %vm841_vm11, %v834_v28, 920167782  ;;  %v850_v39 = vsel %vm838_vm10, %v828_v29, %v831_v30 }
  0xc2   : > { %v7130_v34 = vadd.s32 4294967294, %v770_v8  ;;  %vm694_vm1 = vcmp.eq.s32.totalorder %v8431_v32, 0  ;;  %v788_v62 = vsub.s32 4, %v8416_v17  ;;  %v848_v6 = vsel %vm840_vm14, %v831_v30, %v847_v18 }
  0xc3   : > { %v851_v50 = vsel %vm841_vm11, %v837_v7, 1326507024  ;;  %v914_v46 = vshrl.u32 %v913_v27, 23  ;;  %vm693_vm2 = vcmp.lt.s32.totalorder %v8431_v32, 2  ;;  %v845_v3 = vsel %vm839_vm13, %v842_v52, %v844_v41 }
  0xc4   : > { %vm7131_vm4 = vcmp.lt.s32.totalorder %v7130_v34, 0  ;;  %v849_v42 = vsel %vm839_vm13, %v846_v20, %v848_v6  ;;  %v852_v14 = vsel %vm840_vm14, %v834_v28, %v851_v50  ;;  %vm690_vm5 = vweird.f32 %v8057_v33 }
  0xc5   : > { %v773_v29 = vsel %vm7131_vm4, 0, %v7130_v34  ;;  %v853_v61 = vsel %vm839_vm13, %v850_v39, %v852_v14  ;;  %v8475_v25 = vmul.u32.u64.low %v8435_v37, %v849_v42  ;;  %v8476_v30 = vmul.u32.u64.high %v8435_v37, %v849_v42, %v8475_v25 }
  0xc6   : > { %v774_v56 = vsub.s32 32, %v773_v29  ;;  %v775_v9 = vshll.u32 %v8427_v44, %v773_v29  ;;  %v778_v23 = vsub.s32 4294967266, %v773_v29  ;;  %v7136_v7 = vadd.s32 4294967169, %v914_v46 }
  0xc7   : > { %vm697_vm6 = vcmp.eq.s32.totalorder %v8431_v32, 2  ;;  %v789_v28 = vsel %vm704_vm9, %v788_v62, %v8416_v17  ;;  %v8485_v27 = vmul.u32.u64.low %v8435_v37, %v853_v61  ;;  %v8486_v21 = vmul.u32.u64.high %v8435_v37, %v853_v61, %v8485_v27 }
  0xc8   : > { %v776_v8 = vshrl.u32 %v758_v24, %v774_v56  ;;  %v779_v52 = vadd.s32 127, %v778_v23  ;;  %v920_v38 = vadd.s32 1, %v7136_v7  ;;  %v157_v20 = vadd.s32 56, %v7942_v2 }
  0xc9   : > { %v861_v34 = vmul.u32 %v8435_v37, %v845_v3  ;;  %v864_v44 = vadd.s32 1, %v8476_v30  ;;  %v11679_v41 = vand.u32 2147483647, %v8438_v40  ;;  %v8493_v18 = vadd.s32 64, %v7942_v2 }
  0xca   : > { %v8495_v39 = vpop.eup %7581  ;;  %v777_v17 = vor.u32 %v776_v8, %v775_v9  ;;  %v780_v62 = vshll.u32 %v779_v52, 23  ;;  %v8499_v24 = vsel %vm8454_vm0, 0, %v789_v28  ;;  %vm921_vm7 = vcmp.gt.s32.totalorder %v920_v38, 0 }
  0xcb   : > { %11945 = vst [vmem:[#allocation15_spill] sm:$0xff] %v8499_v24  ;;  %v8501_v6 = vpop.eup %7583  ;;  %v11671_v37 = vxor.u32 2147483648, %v8495_v39  ;;  %vm863_vm8 = vc.u32 %v8486_v21, %v8475_v25  ;;  %v922_v50 = vsel %vm921_vm7, %v920_v38, 0  ;;  %v8507_v46 = vadd.s32 72, %v7942_v2 }
  0xcc   : > { %v11672_v3 = vxor.u32 2147483648, %v8501_v6  ;;  %v781_v42 = vor.u32 4788187, %v780_v62  ;;  %v784_v14 = vcvt.s32.f32 %v777_v17  ;;  %v865_v29 = vsel %vm863_vm8, %v864_v44, %v8476_v30 }
  0xcd   : > { %v699_v61 = vsel %vm697_vm6, %v11671_v37, %v8501_v6  ;;  %v795_v56 = vadd.s32 3, %v8499_v24  ;;  %v866_v9 = vadd.s32 %v865_v29, %v861_v34  ;;  %v924_v23 = vand.u32 31, %v922_v50 }
  0xce   : > { %v696_v7 = vsel %vm694_vm1, %v8495_v39, %v11672_v3  ;;  %v782_v28 = vand.u32 2147483647, %v781_v42  ;;  %v917_v30 = vand.u32 8388607, %v11679_v41  ;;  %v190_v27 = vadd.s32 %v7940_v1, %v157_v20 }
  0xcf   : > { %v700_v8 = vsel %vm693_vm2, %v696_v7, %v699_v61  ;;  %v867_v52 = vadd.s32 536870912, %v866_v9  ;;  %v923_v38 = vshrl.u32 %v922_v50, 5  ;;  %v925_v44 = vsub.s32 32, %v924_v23 }
  0xd0   : > { %v701_v34 = vsel %vm690_vm5, nan, %v700_v8  ;;  %v785_v17 = vmul.f32 %v784_v14, %v782_v28  ;;  %v927_v62 = vshll.u32 %v11692_v45, %v924_v23  ;;  %v930_v29 = vshll.u32 %v11697_v47, %v924_v23 }
  0xd1   : > { %3617 = vst [vmem:[%s8286_s17 + $0x18] sm:$0xff] %v701_v34  ;;  %v868_v42 = vshrl.u32 %v867_v52, 30  ;;  %v928_v37 = vshrl.u32 %v11697_v47, %v925_v44  ;;  %v931_v20 = vshrl.u32 %v11695_v49, %v925_v44  ;;  %v933_v32 = vshll.u32 %v11695_v49, %v924_v23 }
  0xd2   : > { %v786_v61 = vxor.u32 2147483648, %v785_v17  ;;  %v934_v50 = vshrl.u32 %v11688_v51, %v925_v44  ;;  %v936_v7 = vshll.u32 %v11688_v51, %v924_v23  ;;  %v937_v8 = vshrl.u32 %v11686_v53, %v925_v44 }
  0xd3   : > { %v8538_v14 = vand.u32 3, %v795_v56  ;;  %v869_v28 = vshll.u32 %v868_v42, 30  ;;  %v918_v3 = vor.u32 8388608, %v917_v30  ;;  %v926_v34 = vshrl.u32 %v11692_v45, %v925_v44 }
  0xd4   : > { %v787_v52 = vsel %vm704_vm9, %v786_v61, %v785_v17  ;;  %v929_v26 = vor.u32 %v928_v37, %v927_v62  ;;  %v932_v13 = vor.u32 %v931_v20, %v930_v29  ;;  %v939_v0 = vshll.u32 %v11686_v53, %v924_v23  ;;  %v8566_v61 = vld [vmem:[#allocation2] ss:$0 sm:$0xff] }
  0xd5   : > { %v790_v11 = vsel %vm8454_vm0, %v8071_v48, %v787_v52  ;;  %v8547_v58 = vsub.s32 %v866_v9, %v869_v28  ;;  %v938_v36 = vor.u32 %v937_v8, %v936_v7  ;;  %v940_v56 = vshrl.u32 %v11684_v60, %v925_v44 }
  0xd6   : > { %7585 = vcosq.f32 %v790_v11  ;;  %vm808_vm10 = vcmp.lt.s32.totalorder %v8170_v5, 0  ;;  %v935_v30 = vor.u32 %v934_v50, %v933_v32  ;;  %vm942_vm11 = vcmp.lt.s32.totalorder %v923_v38, 1 }
  0xd7   : > { %v222_v41 = vcvt.s32.f32 %v190_v27  ;;  %7587 = vsinq.f32 %v790_v11  ;;  %v872_v37 = vsub.s32 0, %v8547_v58  ;;  %v941_v17 = vor.u32 %v940_v56, %v939_v0 }
  0xd8   : > { %v958_v23 = vshll.u32 %v918_v3, 8  ;;  %vm943_vm9 = vcmp.lt.s32.totalorder %v923_v38, 2  ;;  %vm944_vm13 = vcmp.lt.s32.totalorder %v923_v38, 3  ;;  %vm945_vm14 = vcmp.lt.s32.totalorder %v923_v38, 4 }
  0xd9   : > { %v946_v35 = vsel %vm942_vm11, %v926_v34, %v929_v26  ;;  %vm8555_vm0 = vcmp.le.f32.partialorder %v806_v31, 0.7853982  ;;  %v7133_v44 = vmin.u32 %v872_v37, %v8547_v58  ;;  %v947_v62 = vsel %vm945_vm14, %v935_v30, 2102212464 }
  0xda   : > { %v950_v11 = vsel %vm942_vm11, %v929_v26, %v932_v13  ;;  %v951_v27 = vsel %vm945_vm14, %v938_v36, 920167782  ;;  %v948_v0 = vsel %vm944_vm13, %v932_v13, %v947_v62  ;;  %v954_v29 = vsel %vm942_vm11, %v932_v13, %v935_v30 }
  0xdb   : > { %v952_v3 = vsel %vm944_vm13, %v935_v30, %v951_v27  ;;  %v955_v20 = vsel %vm945_vm14, %v941_v17, 1326507024  ;;  %vm11922_vm1 = vweird.f32 %v8071_v48  ;;  %vm797_vm2 = vcmp.lt.s32.totalorder %v8538_v14, 2 }
  0xdc   : > { %v874_v31 = vclz %v7133_v44  ;;  %v892_v32 = vsub.s32 4, %v868_v42  ;;  %v8569_v50 = vmul.f32 %v8566_v61, %v222_v41  ;;  %v949_v26 = vsel %vm943_vm9, %v946_v35, %v948_v0 }
  0xdd   : > { %v953_v7 = vsel %vm943_vm9, %v950_v11, %v952_v3  ;;  %v956_v8 = vsel %vm944_vm13, %v938_v36, %v955_v20  ;;  %v191_v13 = vadd.s32 %v7940_v1, %v8493_v18  ;;  %vm798_vm4 = vcmp.eq.s32.totalorder %v8538_v14, 0 }
  0xde   : > { %11948 = vst [vmem:[#allocation16_spill] sm:$0xff] %v8569_v50  ;;  %v7134_v28 = vadd.s32 4294967294, %v874_v31  ;;  %v957_v34 = vsel %vm943_vm9, %v954_v29, %v956_v8  ;;  %v8577_v52 = vmul.u32.u64.low %v958_v23, %v953_v7  ;;  %v8578_v56 = vmul.u32.u64.high %v958_v23, %v953_v7, %v8577_v52 }
  0xdf   : > { %vm801_vm6 = vcmp.eq.s32.totalorder %v8538_v14, 2  ;;  %v8582_v41 = vmul.u32.u64.low %v958_v23, %v957_v34  ;;  %v8583_v30 = vmul.u32.u64.high %v958_v23, %v957_v34, %v8582_v41  ;;  %v862_v37 = vadd.s32 %v8475_v25, %v8486_v21 }
  0xe0   : > { %vm7135_vm7 = vcmp.lt.s32.totalorder %v7134_v28, 0  ;;  %v893_v36 = vsel %vm808_vm10, %v892_v32, %v868_v42  ;;  %v1017_v18 = vand.u32 2139095040, %v8569_v50  ;;  %v8590_v38 = vpop.eup %7585  ;;  %v965_v35 = vmul.u32 %v958_v23, %v949_v26 }
  0xe1   : > { %11949 = vst [vmem:[#allocation17_spill] sm:$0xff] %v8590_v38  ;;  %v877_v17 = vsel %vm7135_vm7, 0, %v7134_v28  ;;  %v11683_v44 = vand.u32 2147483647, %v8569_v50  ;;  %v223_v62 = vcvt.s32.f32 %v191_v13  ;;  %v8593_v11 = vpop.eup %7587  ;;  %v11680_v27 = vxor.u32 2147483648, %v8590_v38 }
  0xe2   : > { %11950 = vst [vmem:[#allocation18_spill] sm:$0xff] %v8593_v11  ;;  %v878_v0 = vsub.s32 32, %v877_v17  ;;  %v879_v25 = vshll.u32 %v8547_v58, %v877_v17  ;;  %v882_v21 = vsub.s32 4294967266, %v877_v17  ;;  %v11681_v3 = vxor.u32 2147483648, %v8593_v11 }
  0xe3   : > { %v8600_v42 = vsel %vm8555_vm0, 0, %v893_v36  ;;  %vm967_vm8 = vc.u32 %v8583_v30, %v8577_v52  ;;  %v968_v23 = vadd.s32 1, %v8578_v56  ;;  %v803_v29 = vsel %vm801_vm6, %v11680_v27, %v8593_v11 }
  0xe4   : > { %11951 = vst [vmem:[#allocation19_spill] sm:$0xff] %v8600_v42  ;;  %v880_v20 = vshrl.u32 %v862_v37, %v878_v0  ;;  %v883_v58 = vadd.s32 127, %v882_v21  ;;  %v1018_v31 = vshrl.u32 %v1017_v18, 23  ;;  %v800_v32 = vsel %vm798_vm4, %v8590_v38, %v11681_v3 }
  0xe5   : > { %v969_v26 = vsel %vm967_vm8, %v968_v23, %v8578_v56  ;;  %v1021_v7 = vand.u32 8388607, %v11683_v44  ;;  %v8618_v8 = vmul.f32 %v8566_v61, %v223_v62  ;;  %v804_v13 = vsel %vm797_vm2, %v800_v32, %v803_v29 }
  0xe6   : > { %v881_v28 = vor.u32 %v880_v20, %v879_v25  ;;  %v884_v34 = vshll.u32 %v883_v58, 23  ;;  %v970_v41 = vadd.s32 %v969_v26, %v965_v35  ;;  %v805_v37 = vsel %vm11922_vm1, nan, %v804_v13 }
  0xe7   : > { %11952 = vst [vmem:[#allocation20_spill] sm:$0xff] %v8618_v8  ;;  %v7140_v36 = vadd.s32 4294967169, %v1018_v31  ;;  %v11682_v18 = vand.u32 2147483647, %v8618_v8  ;;  %v192_v56 = vadd.s32 %v7940_v1, %v8507_v46  ;;  %3618 = vst [vmem:[%s8286_s17 + $0x20] sm:$0xff] %v805_v37  ;;  %v899_v21 = vadd.s32 3, %v8600_v42 }
  0xe8   : > { %v885_v17 = vor.u32 4788187, %v884_v34  ;;  %v888_v0 = vcvt.s32.f32 %v881_v28  ;;  %v971_v62 = vadd.s32 536870912, %v970_v41  ;;  %v1022_v35 = vor.u32 8388608, %v1021_v7 }
  0xe9   : > { %v1024_v14 = vadd.s32 1, %v7140_v36  ;;  %v1121_v29 = vand.u32 2139095040, %v8618_v8  ;;  %v8634_v20 = vand.u32 8388607, %v11682_v18  ;;  %v224_v58 = vcvt.s32.f32 %v192_v56  ;;  %v12132_v16 = vld [vmem:[#allocation18_spill] sm:$0xff] }
  0xea   : > { %v886_v23 = vand.u32 2147483647, %v885_v17  ;;  %v8629_v25 = vshrl.u32 %v971_v62, 30  ;;  %v8637_v26 = vand.u32 3, %v899_v21  ;;  %v966_v34 = vadd.s32 %v8577_v52, %v8583_v30 }
  0xeb   : > { %vm1025_vm11 = vcmp.gt.s32.totalorder %v1024_v14, 0  ;;  %v8642_v7 = vshll.u32 %v1022_v35, 8  ;;  %v1122_v17 = vshrl.u32 %v1121_v29, 23  ;;  %v1126_v62 = vor.u32 8388608, %v8634_v20 }
  0xec   : > { %v889_v46 = vmul.f32 %v888_v0, %v886_v23  ;;  %v973_v31 = vshll.u32 %v8629_v25, 30  ;;  %v1026_v32 = vsel %vm1025_vm11, %v1024_v14, 0  ;;  %v8646_v56 = vmul.f32 %v8566_v61, %v224_v58 }
  0xed   : > { %v1028_v13 = vand.u32 31, %v1026_v32  ;;  %v1027_v20 = vshrl.u32 %v1026_v32, 5  ;;  %v7144_v3 = vadd.s32 4294967169, %v1122_v17  ;;  %vm902_vm9 = vcmp.eq.s32.totalorder %v8637_v26, 0 }
  0xee   : > { %v890_v28 = vxor.u32 2147483648, %v889_v46  ;;  %v8640_v37 = vsub.s32 %v970_v41, %v973_v31  ;;  %11953 = vst [vmem:[#allocation21_spill] sm:$0xff] %v8646_v56  ;;  %vm901_vm13 = vcmp.lt.s32.totalorder %v8637_v26, 2  ;;  %vm912_vm14 = vcmp.lt.s32.totalorder %v8438_v40, 0 }
  0xef   : > { %v1029_v36 = vsub.s32 32, %v1028_v13  ;;  %v1031_v14 = vshll.u32 %v11692_v45, %v1028_v13  ;;  %v1034_v52 = vshll.u32 %v11697_v47, %v1028_v13  ;;  %v1037_v35 = vshll.u32 %v11695_v49, %v1028_v13 }
  0xf0   : > { %v891_v0 = vsel %vm808_vm10, %v890_v28, %v889_v46  ;;  %v976_v21 = vsub.s32 0, %v8640_v37  ;;  %v996_v46 = vsub.s32 4, %v8629_v25  ;;  %v1040_v9 = vshll.u32 %v11688_v51, %v1028_v13 }
  0xf1   : > { %v894_v30 = vsel %vm8555_vm0, %v8170_v5, %v891_v0  ;;  %v1032_v41 = vshrl.u32 %v11697_v47, %v1029_v36  ;;  %v1035_v23 = vshrl.u32 %v11695_v49, %v1029_v36  ;;  %v1038_v58 = vshrl.u32 %v11688_v51, %v1029_v36 }
  0xf2   : > { %7589 = vcosq.f32 %v894_v30  ;;  %v7137_v29 = vmin.u32 %v976_v21, %v8640_v37  ;;  %v1030_v31 = vshrl.u32 %v11692_v45, %v1029_v36  ;;  %vm905_vm10 = vcmp.eq.s32.totalorder %v8637_v26, 2 }
  0xf3   : > { %7591 = vsinq.f32 %v894_v30  ;;  %v1033_v0 = vor.u32 %v1032_v41, %v1031_v14  ;;  %v1036_v27 = vor.u32 %v1035_v23, %v1034_v52  ;;  %v1039_v18 = vor.u32 %v1038_v58, %v1037_v35 }
  0xf4   : > { %v978_v28 = vclz %v7137_v29  ;;  %v1041_v32 = vshrl.u32 %v11686_v53, %v1029_v36  ;;  %v1043_v21 = vshll.u32 %v11686_v53, %v1028_v13  ;;  %v1044_v30 = vshrl.u32 %v11684_v60, %v1029_v36 }
  0xf5   : > { %vm1046_vm0 = vcmp.lt.s32.totalorder %v1027_v20, 1  ;;  %vm1047_vm2 = vcmp.lt.s32.totalorder %v1027_v20, 2  ;;  %vm1048_vm4 = vcmp.lt.s32.totalorder %v1027_v20, 3  ;;  %vm11721_vm6 = vweird.f32 %v8170_v5 }
  0xf6   : > { %v7138_v44 = vadd.s32 4294967294, %v978_v28  ;;  %v1042_v17 = vor.u32 %v1041_v32, %v1040_v9  ;;  %v1045_v14 = vor.u32 %v1044_v30, %v1043_v21  ;;  %vm1049_vm7 = vcmp.lt.s32.totalorder %v1027_v20, 4 }
  0xf7   : > { %v1050_v52 = vsel %vm1046_vm0, %v1030_v31, %v1033_v0  ;;  %v1051_v41 = vsel %vm1049_vm7, %v1039_v18, 2102212464  ;;  %v1054_v23 = vsel %vm1046_vm0, %v1033_v0, %v1036_v27  ;;  %v1058_v13 = vsel %vm1046_vm0, %v1036_v27, %v1039_v18 }
  0xf8   : > { %vm7139_vm8 = vcmp.lt.s32.totalorder %v7138_v44, 0  ;;  %v1052_v36 = vsel %vm1048_vm4, %v1036_v27, %v1051_v41  ;;  %v1055_v29 = vsel %vm1049_vm7, %v1042_v17, 920167782  ;;  %v1059_v58 = vsel %vm1049_vm7, %v1045_v14, 1326507024 }
  0xf9   : > { %v981_v35 = vsel %vm7139_vm8, 0, %v7138_v44  ;;  %v8674_v51 = vshll.u32 %v1126_v62, 8  ;;  %v11954_v9 = vand.u32 2147483647, %v8438_v40  ;;  %v1053_v31 = vsel %vm1047_vm2, %v1050_v52, %v1052_v36 }
  0xfa   : > { %v982_v60 = vsub.s32 32, %v981_v35  ;;  %v983_v28 = vshll.u32 %v8640_v37, %v981_v35  ;;  %v986_v53 = vsub.s32 4294967266, %v981_v35  ;;  %v1056_v44 = vsel %vm1048_vm4, %v1039_v18, %v1055_v29 }
  0xfb   : > { %vm8678_vm11 = vcmp.le.f32.partialorder %v11954_v9, 0.7853982  ;;  %v1060_v27 = vsel %vm1048_vm4, %v1042_v17, %v1059_v58  ;;  %v1128_v0 = vadd.s32 1, %v7144_v3  ;;  %v1057_v62 = vsel %vm1047_vm2, %v1054_v23, %v1056_v44 }
  0xfc   : > { %v8685_v21 = vpop.eup %7589  ;;  %v984_v30 = vshrl.u32 %v966_v34, %v982_v60  ;;  %v987_v37 = vadd.s32 127, %v986_v53  ;;  %v1061_v14 = vsel %vm1047_vm2, %v1058_v13, %v1060_v27  ;;  %v997_v60 = vsel %vm912_vm14, %v996_v46, %v8629_v25 }
  0xfd   : > { %11957 = vst [vmem:[#allocation22_spill] sm:$0xff] %v8685_v21  ;;  %v8689_v41 = vpop.eup %7591  ;;  %v11690_v35 = vxor.u32 2147483648, %v8685_v21  ;;  %v8693_v9 = vmul.u32.u64.low %v8642_v7, %v1061_v14  ;;  %v8694_v52 = vmul.u32.u64.high %v8642_v7, %v1061_v14, %v8693_v9  ;;  %vm1129_vm0 = vcmp.gt.s32.totalorder %v1128_v0, 0 }
  0xfe   : > { %11958 = vst [vmem:[#allocation23_spill] sm:$0xff] %v8689_v41  ;;  %v11691_v18 = vxor.u32 2147483648, %v8689_v41  ;;  %v985_v3 = vor.u32 %v984_v30, %v983_v28  ;;  %v988_v17 = vshll.u32 %v987_v37, 23  ;;  %v1130_v36 = vsel %vm1129_vm0, %v1128_v0, 0 }
  0xff   : > { %v907_v53 = vsel %vm905_vm10, %v11690_v35, %v8689_v41  ;;  %v8706_v34 = vmul.u32.u64.low %v8642_v7, %v1057_v62  ;;  %v8707_v20 = vmul.u32.u64.high %v8642_v7, %v1057_v62, %v8706_v34  ;;  %v1132_v58 = vand.u32 31, %v1130_v36 }
 0x100   : > { %v904_v23 = vsel %vm902_vm9, %v8685_v21, %v11691_v18  ;;  %v989_v13 = vor.u32 4788187, %v988_v17  ;;  %v992_v29 = vcvt.s32.f32 %v985_v3  ;;  %v1069_v44 = vmul.u32 %v8642_v7, %v1053_v31 }
 0x101   : > { %v908_v28 = vsel %vm901_vm13, %v904_v23, %v907_v53  ;;  %vm1071_vm10 = vc.u32 %v8694_v52, %v8706_v34  ;;  %v1131_v25 = vshrl.u32 %v1130_v36, 5  ;;  %v1133_v0 = vsub.s32 32, %v1132_v58 }
 0x102   : > { %v909_v46 = vsel %vm11721_vm6, nan, %v908_v28  ;;  %v990_v27 = vand.u32 2147483647, %v989_v13  ;;  %v1135_v30 = vshll.u32 %v11692_v45, %v1132_v58  ;;  %v1072_v37 = vadd.s32 1, %v8707_v20 }
 0x103   : > { %3619 = vst [vmem:[%s8286_s17 + $0x28] sm:$0xff] %v909_v46  ;;  %v1138_v62 = vshll.u32 %v11697_v47, %v1132_v58  ;;  %v1141_v26 = vshll.u32 %v11695_v49, %v1132_v58  ;;  %v11959_v14 = vmov 2102212464   ;;  %v8730_v9 = vsel %vm8678_vm11, 0, %v997_v60 }
 0x104   : > { %v1144_v7 = vshll.u32 %v11959_v14, %v1132_v58  ;;  %v993_v31 = vmul.f32 %v992_v29, %v990_v27  ;;  %11960 = vst [vmem:[#allocation24_spill] sm:$0xff] %v8730_v9  ;;  %v1136_v3 = vshrl.u32 %v11697_v47, %v1133_v0  ;;  %v1139_v17 = vshrl.u32 %v11695_v49, %v1133_v0 }
 0x105   : > { %v1073_v36 = vsel %vm1071_vm10, %v1072_v37, %v8707_v20  ;;  %v1142_v53 = vshrl.u32 %v11959_v14, %v1133_v0  ;;  %v11961_v23 = vmov 920167782   ;;  %v11962_v60 = vmov 1326507024  }
 0x106   : > { %v1145_v13 = vshrl.u32 %v11961_v23, %v1133_v0  ;;  %v1147_v28 = vshll.u32 %v11961_v23, %v1132_v58  ;;  %v994_v46 = vxor.u32 2147483648, %v993_v31  ;;  %v1074_v35 = vadd.s32 %v1073_v36, %v1069_v44 }
 0x107   : > { %v1137_v18 = vor.u32 %v1136_v3, %v1135_v30  ;;  %v1140_v29 = vor.u32 %v1139_v17, %v1138_v62  ;;  %v1143_v27 = vor.u32 %v1142_v53, %v1141_v26  ;;  %v1148_v5 = vshrl.u32 %v11962_v60, %v1133_v0 }
 0x108   : > { %v1146_v45 = vor.u32 %v1145_v13, %v1144_v7  ;;  %vm1150_vm9 = vcmp.lt.s32.totalorder %v1131_v25, 1  ;;  %v995_v49 = vsel %vm912_vm14, %v994_v46, %v993_v31  ;;  %v1003_v20 = vadd.s32 3, %v8730_v9 }
 0x109   : > { %v1075_v37 = vadd.s32 536870912, %v1074_v35  ;;  %vm1153_vm13 = vcmp.lt.s32.totalorder %v1131_v25, 4  ;;  %v998_v58 = vsel %vm8678_vm11, %v8438_v40, %v995_v49  ;;  %v11963_v47 = vmov 683565275  }
 0x10a   : > { %v1134_v44 = vshrl.u32 %v11963_v47, %v1133_v0  ;;  %v1149_v30 = vor.u32 %v1148_v5, %v1147_v28  ;;  %vm1152_vm2 = vcmp.lt.s32.totalorder %v1131_v25, 3  ;;  %7593 = vcosq.f32 %v998_v58 }
 0x10b   : > { %v1076_v62 = vshrl.u32 %v1075_v37, 30  ;;  %vm1151_vm4 = vcmp.lt.s32.totalorder %v1131_v25, 2  ;;  %v1158_v26 = vsel %vm1150_vm9, %v1137_v18, %v1140_v29  ;;  %7595 = vsinq.f32 %v998_v58 }
 0x10c   : > { %v1155_v7 = vsel %vm1153_vm13, %v1143_v27, 2102212464  ;;  %v1159_v31 = vsel %vm1153_vm13, %v1146_v45, 920167782  ;;  %v1162_v3 = vsel %vm1150_vm9, %v1140_v29, %v1143_v27  ;;  %v1163_v53 = vsel %vm1153_vm13, %v1149_v30, 1326507024 }
 0x10d   : > { %v1077_v17 = vshll.u32 %v1076_v62, 30  ;;  %v1160_v36 = vsel %vm1152_vm2, %v1143_v27, %v1159_v31  ;;  %v1164_v32 = vsel %vm1152_vm2, %v1146_v45, %v1163_v53  ;;  %v1154_v0 = vsel %vm1150_vm9, %v1134_v44, %v1137_v18 }
 0x10e   : > { %v1161_v49 = vsel %vm1151_vm4, %v1158_v26, %v1160_v36  ;;  %v1156_v13 = vsel %vm1152_vm2, %v1140_v29, %v1155_v7  ;;  %v1165_v28 = vsel %vm1151_vm4, %v1162_v3, %v1164_v32  ;;  %v1004_v46 = vand.u32 3, %v1003_v20 }
 0x10f   : > { %v8751_v5 = vsub.s32 %v1074_v35, %v1077_v17  ;;  %v8757_v37 = vmul.u32.u64.low %v8674_v51, %v1165_v28  ;;  %v8758_v58 = vmul.u32.u64.high %v8674_v51, %v1165_v28, %v8757_v37  ;;  %v1225_v27 = vand.u32 2139095040, %v8646_v56 }
 0x110   : > { %v1100_v26 = vsub.s32 4, %v1076_v62  ;;  %v8763_v45 = vmul.u32.u64.low %v8674_v51, %v1161_v49  ;;  %v8764_v35 = vmul.u32.u64.high %v8674_v51, %v1161_v49, %v8763_v45  ;;  %v1157_v18 = vsel %vm1151_vm4, %v1154_v0, %v1156_v13 }
 0x111   : > { %v1080_v30 = vsub.s32 0, %v8751_v5  ;;  %v1226_v29 = vshrl.u32 %v1225_v27, 23  ;;  %vm11720_vm14 = vweird.f32 %v8438_v40  ;;  %v11964_v20 = vand.u32 2147483647, %v8569_v50 }
 0x112   : > { %v160_v31 = vadd.s32 80, %v7942_v2  ;;  %vm1009_vm8 = vcmp.eq.s32.totalorder %v1004_v46, 2  ;;  %vm1016_vm11 = vcmp.lt.s32.totalorder %v8569_v50, 0  ;;  %v11701_v3 = vand.u32 2147483647, %v8646_v56 }
 0x113   : > { %vm8771_vm7 = vcmp.le.f32.partialorder %v11964_v20, 0.7853982  ;;  %v7141_v7 = vmin.u32 %v1080_v30, %v8751_v5  ;;  %v7148_v25 = vadd.s32 4294967169, %v1226_v29  ;;  %v1101_v53 = vsel %vm1016_vm11, %v1100_v26, %v1076_v62 }
 0x114   : > { %v8779_v17 = vpop.eup %7593  ;;  %v1173_v49 = vmul.u32 %v8674_v51, %v1157_v18  ;;  %vm1175_vm0 = vc.u32 %v8758_v58, %v8763_v45  ;;  %vm1006_vm10 = vcmp.eq.s32.totalorder %v1004_v46, 0  ;;  %v1176_v13 = vadd.s32 1, %v8764_v35 }
 0x115   : > { %11967 = vst [vmem:[#allocation25_spill] sm:$0xff] %v8779_v17  ;;  %v1082_v36 = vclz %v7141_v7  ;;  %v8786_v32 = vpop.eup %7595  ;;  %v11699_v0 = vxor.u32 2147483648, %v8779_v17  ;;  %v1232_v28 = vadd.s32 1, %v7148_v25  ;;  %vm1005_vm9 = vcmp.lt.s32.totalorder %v1004_v46, 2 }
 0x116   : > { %11968 = vst [vmem:[#allocation26_spill] sm:$0xff] %v8786_v32  ;;  %v11700_v37 = vxor.u32 2147483648, %v8786_v32  ;;  %v1070_v27 = vadd.s32 %v8706_v34, %v8694_v52  ;;  %v8799_v30 = vsel %vm8771_vm7, 0, %v1101_v53  ;;  %v1177_v26 = vsel %vm1175_vm0, %v1176_v13, %v8764_v35 }
 0x117   : > { %v7142_v62 = vadd.s32 4294967294, %v1082_v36  ;;  %v1011_v51 = vsel %vm1009_vm8, %v11699_v0, %v8786_v32  ;;  %11969 = vst [vmem:[#allocation27_spill] sm:$0xff] %v8799_v30  ;;  %vm1233_vm13 = vcmp.gt.s32.totalorder %v1232_v28, 0  ;;  %v1178_v52 = vadd.s32 %v1177_v26, %v1173_v49 }
 0x118   : > { %v1008_v18 = vsel %vm1006_vm10, %v8779_v17, %v11700_v37  ;;  %v1234_v34 = vsel %vm1233_vm13, %v1232_v28, 0  ;;  %v1229_v46 = vand.u32 8388607, %v11701_v3  ;;  %vm11719_vm13 = vweird.f32 %v8569_v50 }
 0x119   : > { %vm7143_vm2 = vcmp.lt.s32.totalorder %v7142_v62, 0  ;;  %v1012_v29 = vsel %vm1005_vm9, %v1008_v18, %v1011_v51  ;;  %v1236_v7 = vand.u32 31, %v1234_v34  ;;  %v1179_v13 = vadd.s32 536870912, %v1178_v52 }
 0x11a   : > { %v1085_v20 = vsel %vm7143_vm2, 0, %v7142_v62  ;;  %v1013_v25 = vsel %vm11720_vm14, nan, %v1012_v29  ;;  %v1235_v0 = vshrl.u32 %v1234_v34, 5  ;;  %v11970_v62 = vmov 2475754826  }
 0x11b   : > { %v1086_v36 = vsub.s32 32, %v1085_v20  ;;  %v1087_v35 = vshll.u32 %v8751_v5, %v1085_v20  ;;  %v1090_v53 = vsub.s32 4294967266, %v1085_v20  ;;  %3620 = vst [vmem:[%s8286_s17 + $0x30] sm:$0xff] %v1013_v25  ;;  %v1237_v37 = vsub.s32 32, %v1236_v7 }
 0x11c   : > { %v1239_v49 = vshll.u32 %v11963_v47, %v1236_v7  ;;  %v1242_v26 = vshll.u32 %v11970_v62, %v1236_v7  ;;  %v11971_v18 = vmov 2131351028   ;;  %v8814_v17 = vshrl.u32 %v1179_v13, 30 }
 0x11d   : > { %v1088_v28 = vshrl.u32 %v1070_v27, %v1086_v36  ;;  %v1091_v51 = vadd.s32 127, %v1090_v53  ;;  %v1245_v3 = vshll.u32 %v11971_v18, %v1236_v7  ;;  %v1240_v29 = vshrl.u32 %v11970_v62, %v1237_v37 }
 0x11e   : > { %v1243_v40 = vshrl.u32 %v11971_v18, %v1237_v37  ;;  %v1248_v5 = vshll.u32 %v11959_v14, %v1236_v7  ;;  %v1246_v34 = vshrl.u32 %v11959_v14, %v1237_v37  ;;  %v1249_v32 = vshrl.u32 %v11961_v23, %v1237_v37 }
 0x11f   : > { %v1089_v20 = vor.u32 %v1088_v28, %v1087_v35  ;;  %v1092_v25 = vshll.u32 %v1091_v51, 23  ;;  %v1107_v27 = vadd.s32 3, %v8799_v30  ;;  %v1181_v36 = vshll.u32 %v8814_v17, 30 }
 0x120   : > { %v1230_v53 = vor.u32 8388608, %v1229_v46  ;;  %v193_v13 = vadd.s32 %v7940_v1, %v160_v31  ;;  %v1241_v41 = vor.u32 %v1240_v29, %v1239_v49  ;;  %v1244_v38 = vor.u32 %v1243_v40, %v1242_v26 }
 0x121   : > { %v1093_v48 = vor.u32 4788187, %v1092_v25  ;;  %v1096_v21 = vcvt.s32.f32 %v1089_v20  ;;  %v8824_v11 = vsub.s32 %v1178_v52, %v1181_v36  ;;  %v1250_v9 = vor.u32 %v1249_v32, %v1248_v5 }
 0x122   : > { %v1251_v35 = vshll.u32 %v11961_v23, %v1236_v7  ;;  %v1252_v28 = vshrl.u32 %v11962_v60, %v1237_v37  ;;  %v1238_v42 = vshrl.u32 %v11963_v47, %v1237_v37  ;;  %v1247_v30 = vor.u32 %v1246_v34, %v1245_v3 }
 0x123   : > { %v1094_v51 = vand.u32 2147483647, %v1093_v48  ;;  %vm1254_vm4 = vcmp.lt.s32.totalorder %v1235_v0, 1  ;;  %v1184_v46 = vsub.s32 0, %v8824_v11  ;;  %vm1256_vm8 = vcmp.lt.s32.totalorder %v1235_v0, 3 }
 0x124   : > { %v1270_v31 = vshll.u32 %v1230_v53, 8  ;;  %v225_v25 = vcvt.s32.f32 %v193_v13  ;;  %v1253_v49 = vor.u32 %v1252_v28, %v1251_v35  ;;  %vm1255_vm0 = vcmp.lt.s32.totalorder %v1235_v0, 2 }
 0x125   : > { %v1097_v20 = vmul.f32 %v1096_v21, %v1094_v51  ;;  %vm1257_vm10 = vcmp.lt.s32.totalorder %v1235_v0, 4  ;;  %v7145_v40 = vmin.u32 %v1184_v46, %v8824_v11  ;;  %v1262_v52 = vsel %vm1254_vm4, %v1241_v41, %v1244_v38 }
 0x126   : > { %v1259_v32 = vsel %vm1257_vm10, %v1247_v30, 2102212464  ;;  %v1263_v48 = vsel %vm1257_vm10, %v1250_v9, 920167782  ;;  %v1258_v3 = vsel %vm1254_vm4, %v1238_v42, %v1241_v41  ;;  %v1174_v21 = vadd.s32 %v8763_v45, %v8758_v58 }
 0x127   : > { %v1098_v37 = vxor.u32 2147483648, %v1097_v20  ;;  %v1260_v7 = vsel %vm1256_vm8, %v1244_v38, %v1259_v32  ;;  %v1264_v26 = vsel %vm1256_vm8, %v1247_v30, %v1263_v48  ;;  %v1186_v29 = vclz %v7145_v40 }
 0x128   : > { %v1266_v5 = vsel %vm1254_vm4, %v1244_v38, %v1247_v30  ;;  %v8841_v34 = vmul.f32 %v8566_v61, %v225_v25  ;;  %v1204_v53 = vsub.s32 4, %v8814_v17  ;;  %v1265_v42 = vsel %vm1255_vm0, %v1262_v52, %v1264_v26 }
 0x129   : > { %v1099_v36 = vsel %vm1016_vm11, %v1098_v37, %v1097_v20  ;;  %v1267_v41 = vsel %vm1257_vm10, %v1253_v49, 1326507024  ;;  %v7146_v58 = vadd.s32 4294967294, %v1186_v29  ;;  %v1261_v45 = vsel %vm1255_vm0, %v1258_v3, %v1260_v7 }
 0x12a   : > { %11972 = vst [vmem:[#allocation28_spill] sm:$0xff] %v8841_v34  ;;  %v1102_v13 = vsel %vm8771_vm7, %v8569_v50, %v1099_v36  ;;  %v1268_v38 = vsel %vm1256_vm8, %v1250_v9, %v1267_v41  ;;  %v8854_v35 = vmul.u32.u64.low %v1270_v31, %v1265_v42  ;;  %v8855_v28 = vmul.u32.u64.high %v1270_v31, %v1265_v42, %v8854_v35 }
 0x12b   : > { %7597 = vcosq.f32 %v1102_v13  ;;  %v1269_v30 = vsel %vm1255_vm0, %v1266_v5, %v1268_v38  ;;  %vm7147_vm11 = vcmp.lt.s32.totalorder %v7146_v58, 0  ;;  %v1108_v25 = vand.u32 3, %v1107_v27 }
 0x12c   : > { %7599 = vsinq.f32 %v1102_v13  ;;  %v8857_v51 = vmul.u32.u64.low %v1270_v31, %v1269_v30  ;;  %v8858_v46 = vmul.u32.u64.high %v1270_v31, %v1269_v30, %v8857_v51  ;;  %vm1120_vm9 = vcmp.lt.s32.totalorder %v8618_v8, 0 }
 0x12d   : > { %v1189_v44 = vsel %vm7147_vm11, 0, %v7146_v58  ;;  %v1329_v20 = vand.u32 2139095040, %v8841_v34  ;;  %v1277_v0 = vmul.u32 %v1270_v31, %v1261_v45  ;;  %v1205_v32 = vsel %vm1120_vm9, %v1204_v53, %v8814_v17 }
 0x12e   : > { %v1190_v49 = vsub.s32 32, %v1189_v44  ;;  %v1191_v9 = vshll.u32 %v8824_v11, %v1189_v44  ;;  %v1194_v40 = vsub.s32 4294967266, %v1189_v44  ;;  %v1280_v52 = vadd.s32 1, %v8855_v28 }
 0x12f   : > { %v11724_v48 = vand.u32 2147483647, %v8841_v34  ;;  %v1330_v37 = vshrl.u32 %v1329_v20, 23  ;;  %vm1279_vm7 = vc.u32 %v8858_v46, %v8854_v35  ;;  %v161_v7 = vadd.s32 88, %v7942_v2 }
 0x130   : > { %v1192_v27 = vshrl.u32 %v1174_v21, %v1190_v49  ;;  %v1195_v3 = vadd.s32 127, %v1194_v40  ;;  %v11973_v11 = vand.u32 2147483647, %v8618_v8  ;;  %v1281_v17 = vsel %vm1279_vm7, %v1280_v52, %v8855_v28 }
 0x131   : > { %v7152_v26 = vadd.s32 4294967169, %v1330_v37  ;;  %v1282_v36 = vadd.s32 %v1281_v17, %v1277_v0  ;;  %vm1109_vm4 = vcmp.lt.s32.totalorder %v1108_v25, 2  ;;  %v1333_v53 = vand.u32 8388607, %v11724_v48 }
 0x132   : > { %vm8873_vm2 = vcmp.le.f32.partialorder %v11973_v11, 0.7853982  ;;  %v1193_v29 = vor.u32 %v1192_v27, %v1191_v9  ;;  %v1196_v5 = vshll.u32 %v1195_v3, 23  ;;  %v162_v41 = vadd.s32 96, %v7942_v2 }
 0x133   : > { %v8880_v21 = vsel %vm8873_vm2, 0, %v1205_v32  ;;  %v1336_v42 = vadd.s32 1, %v7152_v26  ;;  %v1283_v45 = vadd.s32 536870912, %v1282_v36  ;;  %v194_v38 = vadd.s32 %v7940_v1, %v161_v7 }
 0x134   : > { %11976 = vst [vmem:[#allocation29_spill] sm:$0xff] %v8880_v21  ;;  %v1197_v13 = vor.u32 4788187, %v1196_v5  ;;  %v1200_v58 = vcvt.s32.f32 %v1193_v29  ;;  %vm1110_vm8 = vcmp.eq.s32.totalorder %v1108_v25, 0  ;;  %vm1113_vm0 = vcmp.eq.s32.totalorder %v1108_v25, 2 }
 0x135   : > { %v8886_v30 = vpop.eup %7597  ;;  %v1211_v28 = vadd.s32 3, %v8880_v21  ;;  %vm1337_vm10 = vcmp.gt.s32.totalorder %v1336_v42, 0  ;;  %v1284_v49 = vshrl.u32 %v1283_v45, 30  ;;  %v1334_v0 = vor.u32 8388608, %v1333_v53 }
 0x136   : > { %11977 = vst [vmem:[#allocation30_spill] sm:$0xff] %v8886_v30  ;;  %v8889_v51 = vpop.eup %7599  ;;  %v11722_v44 = vxor.u32 2147483648, %v8886_v30  ;;  %v1198_v20 = vand.u32 2147483647, %v1197_v13  ;;  %v1338_v9 = vsel %vm1337_vm10, %v1336_v42, 0  ;;  %v8894_v52 = vadd.s32 %v7940_v1, %v162_v41 }
 0x137   : > { %11978 = vst [vmem:[#allocation31_spill] sm:$0xff] %v8889_v51  ;;  %v11723_v40 = vxor.u32 2147483648, %v8889_v51  ;;  %v1340_v32 = vand.u32 31, %v1338_v9  ;;  %v1285_v3 = vshll.u32 %v1284_v49, 30  ;;  %v226_v7 = vcvt.s32.f32 %v194_v38 }
 0x138   : > { %v1115_v37 = vsel %vm1113_vm0, %v11722_v44, %v8889_v51  ;;  %v1201_v27 = vmul.f32 %v1200_v58, %v1198_v20  ;;  %v8903_v17 = vand.u32 3, %v1211_v28  ;;  %vm1224_vm11 = vcmp.lt.s32.totalorder %v8646_v56, 0 }
 0x139   : > { %v1112_v11 = vsel %vm1110_vm8, %v8886_v30, %v11723_v40  ;;  %v8907_v26 = vadd.s32 %v8854_v35, %v8858_v46  ;;  %v1341_v29 = vsub.s32 32, %v1340_v32  ;;  %v8910_v42 = vsub.s32 %v1282_v36, %v1285_v3 }
 0x13a   : > { %v1116_v5 = vsel %vm1109_vm4, %v1112_v11, %v1115_v37  ;;  %v1202_v53 = vxor.u32 2147483648, %v1201_v27  ;;  %v1343_v41 = vshll.u32 %v11963_v47, %v1340_v32  ;;  %v1346_v45 = vshll.u32 %v11970_v62, %v1340_v32 }
 0x13b   : > { %v1117_v13 = vsel %vm11719_vm13, nan, %v1116_v5  ;;  %v1344_v58 = vshrl.u32 %v11970_v62, %v1341_v29  ;;  %v8917_v38 = vshll.u32 %v1334_v0, 8  ;;  %v1288_v46 = vsub.s32 0, %v8910_v42 }
 0x13c   : > { %3621 = vst [vmem:[%s8286_s17 + $0x38] sm:$0xff] %v1117_v13  ;;  %v1203_v35 = vsel %vm1120_vm9, %v1202_v53, %v1201_v27  ;;  %v1347_v25 = vshrl.u32 %v11971_v18, %v1341_v29  ;;  %v8925_v36 = vmul.f32 %v8566_v61, %v226_v7  ;;  %v1339_v20 = vshrl.u32 %v1338_v9, 5 }
 0x13d   : > { %v1206_v28 = vsel %vm8873_vm2, %v8618_v8, %v1203_v35  ;;  %v1349_v37 = vshll.u32 %v11971_v18, %v1340_v32  ;;  %v1350_v0 = vshrl.u32 %v11959_v14, %v1341_v29  ;;  %v7149_v3 = vmin.u32 %v1288_v46, %v8910_v42 }
 0x13e   : > { %11979 = vst [vmem:[#allocation32_spill] sm:$0xff] %v8925_v36  ;;  %7601 = vcosq.f32 %v1206_v28  ;;  %v1308_v27 = vsub.s32 4, %v1284_v49  ;;  %v1345_v11 = vor.u32 %v1344_v58, %v1343_v41  ;;  %v1348_v5 = vor.u32 %v1347_v25, %v1346_v45 }
 0x13f   : > { %7603 = vsinq.f32 %v1206_v28  ;;  %v1352_v53 = vshll.u32 %v11959_v14, %v1340_v32  ;;  %v1353_v7 = vshrl.u32 %v11961_v23, %v1341_v29  ;;  %vm1217_vm9 = vcmp.eq.s32.totalorder %v8903_v17, 2 }
 0x140   : > { %v11980_v31 = vand.u32 2147483647, %v8646_v56  ;;  %v1290_v13 = vclz %v7149_v3  ;;  %v1342_v35 = vshrl.u32 %v11963_v47, %v1341_v29  ;;  %v1351_v46 = vor.u32 %v1350_v0, %v1349_v37 }
 0x141   : > { %v1433_v41 = vand.u32 2139095040, %v8925_v36  ;;  %vm1214_vm2 = vcmp.eq.s32.totalorder %v8903_v17, 0  ;;  %v1354_v58 = vor.u32 %v1353_v7, %v1352_v53  ;;  %v1355_v45 = vshll.u32 %v11961_v23, %v1340_v32 }
 0x142   : > { %vm8938_vm7 = vcmp.le.f32.partialorder %v11980_v31, 0.7853982  ;;  %v1356_v25 = vshrl.u32 %v11962_v60, %v1341_v29  ;;  %vm1358_vm4 = vcmp.lt.s32.totalorder %v1339_v20, 1  ;;  %vm1213_vm8 = vcmp.lt.s32.totalorder %v8903_v17, 2 }
 0x143   : > { %v7150_v28 = vadd.s32 4294967294, %v1290_v13  ;;  %v1309_v31 = vsel %vm1224_vm11, %v1308_v27, %v1284_v49  ;;  %vm1360_vm0 = vcmp.lt.s32.totalorder %v1339_v20, 3  ;;  %vm1361_vm10 = vcmp.lt.s32.totalorder %v1339_v20, 4 }
 0x144   : > { %vm11773_vm13 = vweird.f32 %v8618_v8  ;;  %v1357_v37 = vor.u32 %v1356_v25, %v1355_v45  ;;  %vm1359_vm14 = vcmp.lt.s32.totalorder %v1339_v20, 2  ;;  %v1363_v0 = vsel %vm1361_vm10, %v1351_v46, 2102212464 }
 0x145   : > { %v1366_v3 = vsel %vm1358_vm4, %v1345_v11, %v1348_v5  ;;  %vm7151_vm6 = vcmp.lt.s32.totalorder %v7150_v28, 0  ;;  %v1362_v32 = vsel %vm1358_vm4, %v1342_v35, %v1345_v11  ;;  %v1364_v29 = vsel %vm1360_vm0, %v1348_v5, %v1363_v0 }
 0x146   : > { %v1367_v53 = vsel %vm1361_vm10, %v1354_v58, 920167782  ;;  %v1293_v7 = vsel %vm7151_vm6, 0, %v7150_v28  ;;  %v1370_v49 = vsel %vm1358_vm4, %v1348_v5, %v1351_v46  ;;  %v1371_v27 = vsel %vm1361_vm10, %v1357_v37, 1326507024 }
 0x147   : > { %v1368_v13 = vsel %vm1360_vm0, %v1351_v46, %v1367_v53  ;;  %v1294_v44 = vsub.s32 32, %v1293_v7  ;;  %v1295_v40 = vshll.u32 %v8910_v42, %v1293_v7  ;;  %v1298_v45 = vsub.s32 4294967266, %v1293_v7 }
 0x148   : > { %v1369_v25 = vsel %vm1359_vm14, %v1366_v3, %v1368_v13  ;;  %v1365_v48 = vsel %vm1359_vm14, %v1362_v32, %v1364_v29  ;;  %v1372_v50 = vsel %vm1360_vm0, %v1354_v58, %v1371_v27  ;;  %v8965_v28 = vpop.eup %7601  ;;  %v1434_v42 = vshrl.u32 %v1433_v41, 23 }
 0x149   : > { %v8961_v11 = vmul.u32.u64.low %v8917_v38, %v1369_v25  ;;  %v8962_v35 = vmul.u32.u64.high %v8917_v38, %v1369_v25, %v8961_v11  ;;  %11983 = vst [vmem:[#allocation33_spill] sm:$0xff] %v8965_v28  ;;  %v1296_v5 = vshrl.u32 %v8907_v26, %v1294_v44  ;;  %v1299_v46 = vadd.s32 127, %v1298_v45  ;;  %v8969_v0 = vpop.eup %7603 }
 0x14a   : > { %v1373_v37 = vsel %vm1359_vm14, %v1370_v49, %v1372_v50  ;;  %11984 = vst [vmem:[#allocation34_spill] sm:$0xff] %v8969_v0  ;;  %v11726_v3 = vxor.u32 2147483648, %v8965_v28  ;;  %v8974_v58 = vsel %vm8938_vm7, 0, %v1309_v31  ;;  %v11727_v53 = vxor.u32 2147483648, %v8969_v0 }
 0x14b   : > { %11985 = vst [vmem:[#allocation35_spill] sm:$0xff] %v8974_v58  ;;  %v8977_v32 = vmul.u32.u64.low %v8917_v38, %v1373_v37  ;;  %v8978_v29 = vmul.u32.u64.high %v8917_v38, %v1373_v37, %v8977_v32  ;;  %v1297_v7 = vor.u32 %v1296_v5, %v1295_v40  ;;  %v1300_v44 = vshll.u32 %v1299_v46, 23 }
 0x14c   : > { %v7156_v26 = vadd.s32 4294967169, %v1434_v42  ;;  %v1219_v50 = vsel %vm1217_vm9, %v11726_v3, %v8969_v0  ;;  %v1381_v20 = vmul.u32 %v8917_v38, %v1365_v48  ;;  %v1384_v41 = vadd.s32 1, %v8962_v35 }
 0x14d   : > { %v227_v31 = vcvt.s32.f32 %v8894_v52  ;;  %v1216_v40 = vsel %vm1214_vm2, %v8965_v28, %v11727_v53  ;;  %v1301_v13 = vor.u32 4788187, %v1300_v44  ;;  %v1304_v49 = vcvt.s32.f32 %v1297_v7 }
 0x14e   : > { %v1440_v27 = vadd.s32 1, %v7156_v26  ;;  %v1220_v45 = vsel %vm1213_vm8, %v1216_v40, %v1219_v50  ;;  %v1315_v25 = vadd.s32 3, %v8974_v58  ;;  %vm1383_vm6 = vc.u32 %v8978_v29, %v8961_v11 }
 0x14f   : > { %v11728_v48 = vand.u32 2147483647, %v8925_v36  ;;  %v1221_v52 = vsel %vm11773_vm13, nan, %v1220_v45  ;;  %v1302_v38 = vand.u32 2147483647, %v1301_v13  ;;  %v1385_v5 = vsel %vm1383_vm6, %v1384_v41, %v8962_v35 }
 0x150   : > { %vm1441_vm14 = vcmp.gt.s32.totalorder %v1440_v27, 0  ;;  %3622 = vst [vmem:[%s8286_s17 + $0x40] sm:$0xff] %v1221_v52  ;;  %v1386_v46 = vadd.s32 %v1385_v5, %v1381_v20  ;;  %v9007_v44 = vmul.f32 %v8566_v61, %v227_v31  ;;  %v9009_v50 = vand.u32 3, %v1315_v25 }
 0x151   : > { %v1442_v37 = vsel %vm1441_vm14, %v1440_v27, 0  ;;  %v1305_v42 = vmul.f32 %v1304_v49, %v1302_v38  ;;  %v1437_v7 = vand.u32 8388607, %v11728_v48  ;;  %vm11753_vm4 = vweird.f32 %v8646_v56 }
 0x152   : > { %v1444_v17 = vand.u32 31, %v1442_v37  ;;  %v1387_v32 = vadd.s32 536870912, %v1386_v46  ;;  %11986 = vst [vmem:[#allocation36_spill] sm:$0xff] %v9007_v44  ;;  %v1443_v40 = vshrl.u32 %v1442_v37, 5  ;;  %v1537_v28 = vand.u32 2139095040, %v9007_v44 }
 0x153   : > { %v1306_v26 = vxor.u32 2147483648, %v1305_v42  ;;  %v1438_v38 = vor.u32 8388608, %v1437_v7  ;;  %vm1328_vm8 = vcmp.lt.s32.totalorder %v8841_v34, 0  ;;  %vm1317_vm0 = vcmp.lt.s32.totalorder %v9009_v50, 2 }
 0x154   : > { %v1445_v13 = vsub.s32 32, %v1444_v17  ;;  %v9011_v45 = vshrl.u32 %v1387_v32, 30  ;;  %v1447_v35 = vshll.u32 %v11963_v47, %v1444_v17  ;;  %v1450_v20 = vshll.u32 %v11970_v62, %v1444_v17 }
 0x155   : > { %v1453_v41 = vshll.u32 %v11971_v18, %v1444_v17  ;;  %v1307_v49 = vsel %vm1224_vm11, %v1306_v26, %v1305_v42  ;;  %v1456_v31 = vshll.u32 %v11959_v14, %v1444_v17  ;;  %v1459_v32 = vshll.u32 %v11961_v23, %v1444_v17 }
 0x156   : > { %v1448_v27 = vshrl.u32 %v11970_v62, %v1445_v13  ;;  %v1451_v61 = vshrl.u32 %v11971_v18, %v1445_v13  ;;  %v1310_v25 = vsel %vm8938_vm7, %v8646_v56, %v1307_v49  ;;  %v1389_v52 = vshll.u32 %v9011_v45, 30 }
 0x157   : > { %v1454_v5 = vshrl.u32 %v11959_v14, %v1445_v13  ;;  %7605 = vcosq.f32 %v1310_v25  ;;  %v1446_v37 = vshrl.u32 %v11963_v47, %v1445_v13  ;;  %v1457_v42 = vshrl.u32 %v11961_v23, %v1445_v13 }
 0x158   : > { %7607 = vsinq.f32 %v1310_v25  ;;  %v9029_v26 = vsub.s32 %v1386_v46, %v1389_v52  ;;  %v1449_v3 = vor.u32 %v1448_v27, %v1447_v35  ;;  %v1452_v53 = vor.u32 %v1451_v61, %v1450_v20 }
 0x159   : > { %v1455_v48 = vor.u32 %v1454_v5, %v1453_v41  ;;  %v1458_v9 = vor.u32 %v1457_v42, %v1456_v31  ;;  %v1460_v49 = vshrl.u32 %v11962_v60, %v1445_v13  ;;  %vm1462_vm11 = vcmp.lt.s32.totalorder %v1443_v40, 1 }
 0x15a   : > { %v1392_v7 = vsub.s32 0, %v9029_v26  ;;  %vm1464_vm9 = vcmp.lt.s32.totalorder %v1443_v40, 3  ;;  %v9033_v8 = vshll.u32 %v1438_v38, 8  ;;  %vm1463_vm7 = vcmp.lt.s32.totalorder %v1443_v40, 2 }
 0x15b   : > { %v1461_v0 = vor.u32 %v1460_v49, %v1459_v32  ;;  %vm1465_vm2 = vcmp.lt.s32.totalorder %v1443_v40, 4  ;;  %v1466_v46 = vsel %vm1462_vm11, %v1446_v37, %v1449_v3  ;;  %v1470_v35 = vsel %vm1462_vm11, %v1449_v3, %v1452_v53 }
 0x15c   : > { %v7153_v17 = vmin.u32 %v1392_v7, %v9029_v26  ;;  %v1467_v13 = vsel %vm1465_vm2, %v1455_v48, 2102212464  ;;  %v1471_v20 = vsel %vm1465_vm2, %v1458_v9, 920167782  ;;  %v1474_v61 = vsel %vm1462_vm11, %v1452_v53, %v1455_v48 }
 0x15d   : > { %v1468_v41 = vsel %vm1464_vm9, %v1452_v53, %v1467_v13  ;;  %v1472_v27 = vsel %vm1464_vm9, %v1455_v48, %v1471_v20  ;;  %v1475_v31 = vsel %vm1465_vm2, %v1461_v0, 1326507024  ;;  %vm1318_vm10 = vcmp.eq.s32.totalorder %v9009_v50, 0 }
 0x15e   : > { %vm1321_vm6 = vcmp.eq.s32.totalorder %v9009_v50, 2  ;;  %v1394_v25 = vclz %v7153_v17  ;;  %v1469_v52 = vsel %vm1463_vm7, %v1466_v46, %v1468_v41  ;;  %v1473_v38 = vsel %vm1463_vm7, %v1470_v35, %v1472_v27 }
 0x15f   : > { %v1476_v3 = vsel %vm1464_vm9, %v1458_v9, %v1475_v31  ;;  %v1538_v5 = vshrl.u32 %v1537_v28, 23  ;;  %v9052_v53 = vmul.u32.u64.low %v9033_v8, %v1473_v38  ;;  %v9053_v0 = vmul.u32.u64.high %v9033_v8, %v1473_v38, %v9052_v53 }
 0x160   : > { %v7154_v37 = vadd.s32 4294967294, %v1394_v25  ;;  %v1477_v42 = vsel %vm1463_vm7, %v1474_v61, %v1476_v3  ;;  %v1412_v32 = vsub.s32 4, %v9011_v45  ;;  %v1382_v40 = vadd.s32 %v8961_v11, %v8978_v29 }
 0x161   : > { %v9056_v48 = vpop.eup %7605  ;;  %v9060_v49 = vmul.u32.u64.low %v9033_v8, %v1477_v42  ;;  %v9061_v7 = vmul.u32.u64.high %v9033_v8, %v1477_v42, %v9060_v49  ;;  %v7160_v46 = vadd.s32 4294967169, %v1538_v5  ;;  %v11736_v9 = vand.u32 2147483647, %v9007_v44 }
 0x162   : > { %11987 = vst [vmem:[#allocation37_spill] sm:$0xff] %v9056_v48  ;;  %v9063_v17 = vpop.eup %7607  ;;  %v11734_v28 = vxor.u32 2147483648, %v9056_v48  ;;  %vm7155_vm14 = vcmp.lt.s32.totalorder %v7154_v37, 0  ;;  %v1485_v20 = vmul.u32 %v9033_v8, %v1469_v52  ;;  %v1413_v8 = vsel %vm1328_vm8, %v1412_v32, %v9011_v45 }
 0x163   : > { %11988 = vst [vmem:[#allocation38_spill] sm:$0xff] %v9063_v17  ;;  %v11735_v13 = vxor.u32 2147483648, %v9063_v17  ;;  %v1397_v35 = vsel %vm7155_vm14, 0, %v7154_v37  ;;  %v1544_v41 = vadd.s32 1, %v7160_v46  ;;  %vm1487_vm11 = vc.u32 %v9061_v7, %v9052_v53 }
 0x164   : > { %v1323_v27 = vsel %vm1321_vm6, %v11734_v28, %v9063_v17  ;;  %v1398_v61 = vsub.s32 32, %v1397_v35  ;;  %v1399_v31 = vshll.u32 %v9029_v26, %v1397_v35  ;;  %v1402_v11 = vsub.s32 4294967266, %v1397_v35 }
 0x165   : > { %v1320_v29 = vsel %vm1318_vm10, %v9056_v48, %v11735_v13  ;;  %v1488_v25 = vadd.s32 1, %v9053_v0  ;;  %vm1545_vm9 = vcmp.gt.s32.totalorder %v1544_v41, 0  ;;  %v11989_v5 = vand.u32 2147483647, %v8841_v34 }
 0x166   : > { %v1324_v52 = vsel %vm1317_vm0, %v1320_v29, %v1323_v27  ;;  %v1400_v26 = vshrl.u32 %v1382_v40, %v1398_v61  ;;  %v1403_v38 = vadd.s32 127, %v1402_v11  ;;  %v1546_v42 = vsel %vm1545_vm9, %v1544_v41, 0 }
 0x167   : > { %v1325_v3 = vsel %vm11753_vm4, nan, %v1324_v52  ;;  %vm9094_vm7 = vcmp.le.f32.partialorder %v11989_v5, 0.7853982  ;;  %v1489_v45 = vsel %vm1487_vm11, %v1488_v25, %v9053_v0  ;;  %v1548_v40 = vand.u32 31, %v1546_v42 }
 0x168   : > { %3623 = vst [vmem:[%s8286_s17 + $0x48] sm:$0xff] %v1325_v3  ;;  %v1401_v32 = vor.u32 %v1400_v26, %v1399_v31  ;;  %v1404_v49 = vshll.u32 %v1403_v38, 23  ;;  %v9102_v50 = vsel %vm9094_vm7, 0, %v1413_v8  ;;  %v1490_v46 = vadd.s32 %v1489_v45, %v1485_v20 }
 0x169   : > { %11992 = vst [vmem:[#allocation39_spill] sm:$0xff] %v9102_v50  ;;  %v163_v35 = vadd.s32 104, %v7942_v2  ;;  %v1541_v29 = vand.u32 8388607, %v11736_v9  ;;  %v1419_v0 = vadd.s32 3, %v9102_v50  ;;  %v9108_v41 = vshrl.u32 %v1546_v42, 5 }
 0x16a   : > { %v1405_v27 = vor.u32 4788187, %v1404_v49  ;;  %v1408_v61 = vcvt.s32.f32 %v1401_v32  ;;  %v1491_v11 = vadd.s32 536870912, %v1490_v46  ;;  %v1549_v31 = vsub.s32 32, %v1548_v40 }
 0x16b   : > { %v1551_v25 = vshll.u32 %v11963_v47, %v1548_v40  ;;  %v1554_v20 = vshll.u32 %v11970_v62, %v1548_v40  ;;  %v1557_v26 = vshll.u32 %v11971_v18, %v1548_v40  ;;  %v1560_v45 = vshll.u32 %v11959_v14, %v1548_v40 }
 0x16c   : > { %v1406_v52 = vand.u32 2147483647, %v1405_v27  ;;  %v9111_v8 = vshrl.u32 %v1491_v11, 30  ;;  %v1552_v38 = vshrl.u32 %v11970_v62, %v1549_v31  ;;  %v1555_v3 = vshrl.u32 %v11971_v18, %v1549_v31 }
 0x16d   : > { %v1558_v5 = vshrl.u32 %v11959_v14, %v1549_v31  ;;  %v1561_v49 = vshrl.u32 %v11961_v23, %v1549_v31  ;;  %v9121_v27 = vand.u32 3, %v1419_v0  ;;  %v1563_v11 = vshll.u32 %v11961_v23, %v1548_v40 }
 0x16e   : > { %v1409_v42 = vmul.f32 %v1408_v61, %v1406_v52  ;;  %v1493_v32 = vshll.u32 %v9111_v8, 30  ;;  %v1564_v28 = vshrl.u32 %v11962_v60, %v1549_v31  ;;  %v196_v13 = vadd.s32 %v7940_v1, %v163_v35 }
 0x16f   : > { %v1542_v48 = vor.u32 8388608, %v1541_v29  ;;  %vm1566_vm2 = vcmp.lt.s32.totalorder %v9108_v41, 1  ;;  %v1553_v17 = vor.u32 %v1552_v38, %v1551_v25  ;;  %v1556_v61 = vor.u32 %v1555_v3, %v1554_v20 }
 0x170   : > { %v1410_v9 = vxor.u32 2147483648, %v1409_v42  ;;  %v9126_v56 = vsub.s32 %v1490_v46, %v1493_v32  ;;  %v1559_v52 = vor.u32 %v1558_v5, %v1557_v26  ;;  %v1562_v50 = vor.u32 %v1561_v49, %v1560_v45  ;;  %v9165_v32 = vld [vmem:[#allocation2] ss:$0 sm:$0xff] }
 0x171   : > { %vm1432_vm0 = vcmp.lt.s32.totalorder %v8925_v36, 0  ;;  %v1550_v58 = vshrl.u32 %v11963_v47, %v1549_v31  ;;  %vm1569_vm10 = vcmp.lt.s32.totalorder %v9108_v41, 4  ;;  %v1565_v35 = vor.u32 %v1564_v28, %v1563_v11 }
 0x172   : > { %v1411_v0 = vsel %vm1328_vm8, %v1410_v9, %v1409_v42  ;;  %v1496_v40 = vsub.s32 0, %v9126_v56  ;;  %v1571_v29 = vsel %vm1569_vm10, %v1559_v52, 2102212464  ;;  %v228_v25 = vcvt.s32.f32 %v196_v13 }
 0x173   : > { %v1414_v46 = vsel %vm9094_vm7, %v8841_v34, %v1411_v0  ;;  %vm1568_vm8 = vcmp.lt.s32.totalorder %v9108_v41, 3  ;;  %v1582_v20 = vshll.u32 %v1542_v48, 8  ;;  %v11993_v31 = vand.u32 2147483647, %v8925_v36 }
 0x174   : > { %7609 = vcosq.f32 %v1414_v46  ;;  %v7157_v9 = vmin.u32 %v1496_v40, %v9126_v56  ;;  %vm1567_vm14 = vcmp.lt.s32.totalorder %v9108_v41, 2  ;;  %v1574_v28 = vsel %vm1566_vm2, %v1553_v17, %v1556_v61 }
 0x175   : > { %7611 = vsinq.f32 %v1414_v46  ;;  %vm9144_vm6 = vcmp.le.f32.partialorder %v11993_v31, 0.7853982  ;;  %v1575_v13 = vsel %vm1569_vm10, %v1562_v50, 920167782  ;;  %v1570_v38 = vsel %vm1566_vm2, %v1550_v58, %v1553_v17 }
 0x176   : > { %v1498_v37 = vclz %v7157_v9  ;;  %v1572_v48 = vsel %vm1568_vm8, %v1556_v61, %v1571_v29  ;;  %v1578_v3 = vsel %vm1566_vm2, %v1556_v61, %v1559_v52  ;;  %vm1422_vm11 = vcmp.eq.s32.totalorder %v9121_v27, 0 }
 0x177   : > { %v1516_v5 = vsub.s32 4, %v9111_v8  ;;  %v1576_v45 = vsel %vm1568_vm8, %v1559_v52, %v1575_v13  ;;  %v1579_v42 = vsel %vm1569_vm10, %v1565_v35, 1326507024  ;;  %v9168_v58 = vmul.f32 %v9165_v32, %v228_v25 }
 0x178   : > { %vm1421_vm9 = vcmp.lt.s32.totalorder %v9121_v27, 2  ;;  %v7158_v17 = vadd.s32 4294967294, %v1498_v37  ;;  %v1577_v49 = vsel %vm1567_vm14, %v1574_v28, %v1576_v45  ;;  %v1580_v11 = vsel %vm1568_vm8, %v1562_v50, %v1579_v42 }
 0x179   : > { %11996 = vst [vmem:[#allocation40_spill] sm:$0xff] %v9168_v58  ;;  %v164_v61 = vadd.s32 112, %v7942_v2  ;;  %vm11752_vm7 = vweird.f32 %v8841_v34  ;;  %v1573_v52 = vsel %vm1567_vm14, %v1570_v38, %v1572_v48  ;;  %v1581_v0 = vsel %vm1567_vm14, %v1578_v3, %v1580_v11 }
 0x17a   : > { %v9181_v40 = vmul.u32.u64.low %v1582_v20, %v1577_v49  ;;  %v9182_v46 = vmul.u32.u64.high %v1582_v20, %v1577_v49, %v9181_v40  ;;  %v1486_v35 = vadd.s32 %v9052_v53, %v9061_v7  ;;  %vm7159_vm2 = vcmp.lt.s32.totalorder %v7158_v17, 0 }
 0x17b   : > { %v9186_v29 = vmul.u32.u64.low %v1582_v20, %v1581_v0  ;;  %v9187_v25 = vmul.u32.u64.high %v1582_v20, %v1581_v0, %v9186_v29  ;;  %v1501_v50 = vsel %vm7159_vm2, 0, %v7158_v17  ;;  %v1517_v9 = vsel %vm1432_vm0, %v1516_v5, %v9111_v8 }
 0x17c   : > { %v11746_v31 = vand.u32 2147483647, %v9168_v58  ;;  %v1641_v41 = vand.u32 2139095040, %v9168_v58  ;;  %v1502_v28 = vsub.s32 32, %v1501_v50  ;;  %v1503_v13 = vshll.u32 %v9126_v56, %v1501_v50 }
 0x17d   : > { %v1506_v37 = vsub.s32 4294967266, %v1501_v50  ;;  %v1589_v38 = vmul.u32 %v1582_v20, %v1573_v52  ;;  %vm1425_vm10 = vcmp.eq.s32.totalorder %v9121_v27, 2  ;;  %v1592_v53 = vadd.s32 1, %v9182_v46 }
 0x17e   : > { %v1642_v7 = vshrl.u32 %v1641_v41, 23  ;;  %v197_v48 = vadd.s32 %v7940_v1, %v164_v61  ;;  %v9198_v3 = vpop.eup %7609  ;;  %v1504_v45 = vshrl.u32 %v1486_v35, %v1502_v28  ;;  %v9202_v5 = vsel %vm9144_vm6, 0, %v1517_v9 }
 0x17f   : > { %11997 = vst [vmem:[#allocation41_spill] sm:$0xff] %v9198_v3  ;;  %v1507_v8 = vadd.s32 127, %v1506_v37  ;;  %11998 = vst [vmem:[#allocation42_spill] sm:$0xff] %v9202_v5  ;;  %vm1591_vm8 = vc.u32 %v9187_v25, %v9181_v40  ;;  %v9205_v56 = vpop.eup %7611  ;;  %v11744_v20 = vxor.u32 2147483648, %v9198_v3  ;;  %v1645_v49 = vand.u32 8388607, %v11746_v31 }
 0x180   : > { %11999 = vst [vmem:[#allocation43_spill] sm:$0xff] %v9205_v56  ;;  %v1593_v42 = vsel %vm1591_vm8, %v1592_v53, %v9182_v46  ;;  %v7164_v17 = vadd.s32 4294967169, %v1642_v7  ;;  %v11745_v11 = vxor.u32 2147483648, %v9205_v56  ;;  %v1505_v61 = vor.u32 %v1504_v45, %v1503_v13 }
 0x181   : > { %v1508_v52 = vshll.u32 %v1507_v8, 23  ;;  %v1594_v0 = vadd.s32 %v1593_v42, %v1589_v38  ;;  %v1427_v35 = vsel %vm1425_vm10, %v11744_v20, %v9205_v56  ;;  %v1523_v29 = vadd.s32 3, %v9202_v5 }
 0x182   : > { %v1648_v50 = vadd.s32 1, %v7164_v17  ;;  %v229_v46 = vcvt.s32.f32 %v197_v48  ;;  %v1424_v9 = vsel %vm1422_vm11, %v9198_v3, %v11745_v11  ;;  %v1512_v28 = vcvt.s32.f32 %v1505_v61 }
 0x183   : > { %v1509_v41 = vor.u32 4788187, %v1508_v52  ;;  %v1595_v13 = vadd.s32 536870912, %v1594_v0  ;;  %v1428_v37 = vsel %vm1421_vm9, %v1424_v9, %v1427_v35  ;;  %v1646_v38 = vor.u32 8388608, %v1645_v49 }
 0x184   : > { %vm1649_vm14 = vcmp.gt.s32.totalorder %v1648_v50, 0  ;;  %v1429_v53 = vsel %vm11752_vm7, nan, %v1428_v37  ;;  %v9231_v42 = vmul.f32 %v9165_v32, %v229_v46  ;;  %v9233_v61 = vand.u32 3, %v1523_v29 }
 0x185   : > { %v1510_v7 = vand.u32 2147483647, %v1509_v41  ;;  %v9227_v45 = vshrl.u32 %v1595_v13, 30  ;;  %v1650_v48 = vsel %vm1649_vm14, %v1648_v50, 0  ;;  %3624 = vst [vmem:[%s8286_s17 + $0x50] sm:$0xff] %v1429_v53  ;;  %v9237_v49 = vadd.s32 120, %v7942_v2 }
 0x186   : > { %v1652_v8 = vand.u32 31, %v1650_v48  ;;  %12000 = vst [vmem:[#allocation44_spill] sm:$0xff] %v9231_v42  ;;  %v9240_v52 = vadd.s32 %v9181_v40, %v9187_v25  ;;  %v9243_v50 = vshll.u32 %v1646_v38, 8  ;;  %v1745_v40 = vand.u32 2139095040, %v9231_v42 }
 0x187   : > { %v1513_v17 = vmul.f32 %v1512_v28, %v1510_v7  ;;  %v1597_v27 = vshll.u32 %v9227_v45, 30  ;;  %vm1536_vm11 = vcmp.lt.s32.totalorder %v9007_v44, 0  ;;  %v1651_v38 = vshrl.u32 %v1650_v48, 5 }
 0x188   : > { %v1653_v35 = vsub.s32 32, %v1652_v8  ;;  %v1655_v9 = vshll.u32 %v11963_v47, %v1652_v8  ;;  %v1658_v46 = vshll.u32 %v11970_v62, %v1652_v8  ;;  %v1661_v29 = vshll.u32 %v11971_v18, %v1652_v8 }
 0x189   : > { %v1514_v41 = vxor.u32 2147483648, %v1513_v17  ;;  %v9245_v13 = vsub.s32 %v1594_v0, %v1597_v27  ;;  %v1664_v53 = vshll.u32 %v11959_v14, %v1652_v8  ;;  %v12001_v3 = vand.u32 2147483647, %v9007_v44 }
 0x18a   : > { %v1656_v28 = vshrl.u32 %v11970_v62, %v1653_v35  ;;  %v1659_v37 = vshrl.u32 %v11971_v18, %v1653_v35  ;;  %v1662_v7 = vshrl.u32 %v11959_v14, %v1653_v35  ;;  %v1654_v20 = vshrl.u32 %v11963_v47, %v1653_v35 }
 0x18b   : > { %v1515_v25 = vsel %vm1432_vm0, %v1514_v41, %v1513_v17  ;;  %v1600_v0 = vsub.s32 0, %v9245_v13  ;;  %v1665_v31 = vshrl.u32 %v11961_v23, %v1653_v35  ;;  %vm9266_vm0 = vcmp.le.f32.partialorder %v12001_v3, 0.7853982 }
 0x18c   : > { %v1518_v27 = vsel %vm9144_vm6, %v8925_v36, %v1515_v25  ;;  %v1657_v11 = vor.u32 %v1656_v28, %v1655_v9  ;;  %v1660_v17 = vor.u32 %v1659_v37, %v1658_v46  ;;  %v1663_v41 = vor.u32 %v1662_v7, %v1661_v29 }
 0x18d   : > { %7613 = vcosq.f32 %v1518_v27  ;;  %v7161_v34 = vmin.u32 %v1600_v0, %v9245_v13  ;;  %v1666_v56 = vor.u32 %v1665_v31, %v1664_v53  ;;  %v1667_v26 = vshll.u32 %v11961_v23, %v1652_v8 }
 0x18e   : > { %7615 = vsinq.f32 %v1518_v27  ;;  %v1668_v25 = vshrl.u32 %v11962_v60, %v1653_v35  ;;  %vm1529_vm6 = vcmp.eq.s32.totalorder %v9233_v61, 2  ;;  %v1620_v28 = vsub.s32 4, %v9227_v45 }
 0x18f   : > { %v1602_v9 = vclz %v7161_v34  ;;  %v1746_v29 = vshrl.u32 %v1745_v40, 23  ;;  %vm1670_vm9 = vcmp.lt.s32.totalorder %v1651_v38, 1  ;;  %vm1671_vm2 = vcmp.lt.s32.totalorder %v1651_v38, 2 }
 0x190   : > { %v1669_v37 = vor.u32 %v1668_v25, %v1667_v26  ;;  %vm1672_vm10 = vcmp.lt.s32.totalorder %v1651_v38, 3  ;;  %vm1525_vm8 = vcmp.lt.s32.totalorder %v9233_v61, 2  ;;  %vm1673_vm14 = vcmp.lt.s32.totalorder %v1651_v38, 4 }
 0x191   : > { %v7162_v3 = vadd.s32 4294967294, %v1602_v9  ;;  %v1674_v31 = vsel %vm1670_vm9, %v1654_v20, %v1657_v11  ;;  %v1678_v8 = vsel %vm1670_vm9, %v1657_v11, %v1660_v17  ;;  %vm11760_vm7 = vweird.f32 %v8925_v36 }
 0x192   : > { %v1675_v35 = vsel %vm1673_vm14, %v1663_v41, 2102212464  ;;  %v1679_v53 = vsel %vm1673_vm14, %v1666_v56, 920167782  ;;  %v1682_v34 = vsel %vm1670_vm9, %v1660_v17, %v1663_v41  ;;  %v1683_v0 = vsel %vm1673_vm14, %v1669_v37, 1326507024 }
 0x193   : > { %vm7163_vm4 = vcmp.lt.s32.totalorder %v7162_v3, 0  ;;  %v1676_v7 = vsel %vm1672_vm10, %v1660_v17, %v1675_v35  ;;  %v1680_v27 = vsel %vm1672_vm10, %v1663_v41, %v1679_v53  ;;  %v1684_v40 = vsel %vm1672_vm10, %v1666_v56, %v1683_v0 }
 0x194   : > { %v1605_v26 = vsel %vm7163_vm4, 0, %v7162_v3  ;;  %v1621_v25 = vsel %vm1536_vm11, %v1620_v28, %v9227_v45  ;;  %v1681_v9 = vsel %vm1671_vm2, %v1678_v8, %v1680_v27  ;;  %v1685_v20 = vsel %vm1671_vm2, %v1682_v34, %v1684_v40 }
 0x195   : > { %v1606_v11 = vsub.s32 32, %v1605_v26  ;;  %v1607_v46 = vshll.u32 %v9245_v13, %v1605_v26  ;;  %v1610_v5 = vsub.s32 4294967266, %v1605_v26  ;;  %v1677_v21 = vsel %vm1671_vm2, %v1674_v31, %v1676_v7 }
 0x196   : > { %v9285_v37 = vmul.u32.u64.low %v9243_v50, %v1685_v20  ;;  %v9286_v17 = vmul.u32.u64.high %v9243_v50, %v1685_v20, %v9285_v37  ;;  %v9289_v56 = vmul.u32.u64.low %v9243_v50, %v1681_v9  ;;  %v9290_v41 = vmul.u32.u64.high %v9243_v50, %v1681_v9, %v9289_v56 }
 0x197   : > { %v9293_v45 = vpop.eup %7613  ;;  %v1608_v28 = vshrl.u32 %v9240_v52, %v1606_v11  ;;  %v1611_v3 = vadd.s32 127, %v1610_v5  ;;  %v9298_v13 = vsel %vm9266_vm0, 0, %v1621_v25  ;;  %v7168_v38 = vadd.s32 4294967169, %v1746_v29 }
 0x198   : > { %12004 = vst [vmem:[#allocation45_spill] sm:$0xff] %v9293_v45  ;;  %12005 = vst [vmem:[#allocation46_spill] sm:$0xff] %v9298_v13  ;;  %v9300_v31 = vpop.eup %7615  ;;  %vm1526_vm4 = vcmp.eq.s32.totalorder %v9233_v61, 0  ;;  %v11756_v8 = vxor.u32 2147483648, %v9293_v45  ;;  %v1693_v35 = vmul.u32 %v9243_v50, %v1677_v21  ;;  %v12007_v53 = vand.u32 2147483647, %v9231_v42 }
 0x199   : > { %12006 = vst [vmem:[#allocation47_spill] sm:$0xff] %v9300_v31  ;;  %v11757_v0 = vxor.u32 2147483648, %v9300_v31  ;;  %v1609_v52 = vor.u32 %v1608_v28, %v1607_v46  ;;  %v1612_v5 = vshll.u32 %v1611_v3, 23  ;;  %v1752_v7 = vadd.s32 1, %v7168_v38 }
 0x19a   : > { %v1749_v34 = vand.u32 8388607, %v12007_v53  ;;  %v1531_v29 = vsel %vm1529_vm6, %v11756_v8, %v9300_v31  ;;  %v1627_v27 = vadd.s32 3, %v9298_v13  ;;  %vm1695_vm9 = vc.u32 %v9286_v17, %v9289_v56 }
 0x19b   : > { %v1696_v21 = vadd.s32 1, %v9290_v41  ;;  %v1528_v50 = vsel %vm1526_vm4, %v9293_v45, %v11757_v0  ;;  %v1613_v46 = vor.u32 4788187, %v1612_v5  ;;  %v1616_v40 = vcvt.s32.f32 %v1609_v52 }
 0x19c   : > { %vm1753_vm2 = vcmp.gt.s32.totalorder %v1752_v7, 0  ;;  %v1532_v26 = vsel %vm1525_vm8, %v1528_v50, %v1531_v29  ;;  %v9326_v28 = vand.u32 3, %v1627_v27  ;;  %v1750_v5 = vor.u32 8388608, %v1749_v34 }
 0x19d   : > { %v1697_v25 = vsel %vm1695_vm9, %v1696_v21, %v9290_v41  ;;  %v1754_v9 = vsel %vm1753_vm2, %v1752_v7, 0  ;;  %v1533_v20 = vsel %vm11760_vm7, nan, %v1532_v26  ;;  %v1614_v11 = vand.u32 2147483647, %v1613_v46 }
 0x19e   : > { %v1698_v37 = vadd.s32 %v1697_v25, %v1693_v35  ;;  %3625 = vst [vmem:[%s8286_s17 + $0x58] sm:$0xff] %v1533_v20  ;;  %v9328_v3 = vshrl.u32 %v1754_v9, 5  ;;  %v1756_v38 = vand.u32 31, %v1754_v9  ;;  %v198_v61 = vadd.s32 %v7940_v1, %v9237_v49 }
 0x19f   : > { %v1617_v53 = vmul.f32 %v1616_v40, %v1614_v11  ;;  %v166_v21 = vadd.s32 128, %v7942_v2  ;;  %vm1640_vm10 = vcmp.lt.s32.totalorder %v9168_v58, 0  ;;  %vm1629_vm14 = vcmp.lt.s32.totalorder %v9326_v28, 2 }
 0x1a0   : > { %v1699_v52 = vadd.s32 536870912, %v1698_v37  ;;  %v1757_v29 = vsub.s32 32, %v1756_v38  ;;  %v1759_v41 = vshll.u32 %v11963_v47, %v1756_v38  ;;  %v1762_v7 = vshll.u32 %v11970_v62, %v1756_v38 }
 0x1a1   : > { %v1618_v35 = vxor.u32 2147483648, %v1617_v53  ;;  %v1765_v27 = vshll.u32 %v11971_v18, %v1756_v38  ;;  %v1768_v46 = vshll.u32 %v11959_v14, %v1756_v38  ;;  %vm1774_vm6 = vcmp.lt.s32.totalorder %v9328_v3, 1 }
 0x1a2   : > { %v1700_v50 = vshrl.u32 %v1699_v52, 30  ;;  %v1760_v40 = vshrl.u32 %v11970_v62, %v1757_v29  ;;  %v1763_v34 = vshrl.u32 %v11971_v18, %v1757_v29  ;;  %v1766_v26 = vshrl.u32 %v11959_v14, %v1757_v29 }
 0x1a3   : > { %v1619_v49 = vsel %vm1536_vm11, %v1618_v35, %v1617_v53  ;;  %v1769_v9 = vshrl.u32 %v11961_v23, %v1757_v29  ;;  %v1771_v20 = vshll.u32 %v11961_v23, %v1756_v38  ;;  %v1758_v52 = vshrl.u32 %v11963_v47, %v1757_v29 }
 0x1a4   : > { %v1701_v25 = vshll.u32 %v1700_v50, 30  ;;  %v1622_v11 = vsel %vm9266_vm0, %v9007_v44, %v1619_v49  ;;  %v1761_v8 = vor.u32 %v1760_v40, %v1759_v41  ;;  %v1764_v0 = vor.u32 %v1763_v34, %v1762_v7 }
 0x1a5   : > { %7617 = vcosq.f32 %v1622_v11  ;;  %v1767_v13 = vor.u32 %v1766_v26, %v1765_v27  ;;  %v1770_v53 = vor.u32 %v1769_v9, %v1768_v46  ;;  %v1772_v35 = vshrl.u32 %v11962_v60, %v1757_v29 }
 0x1a6   : > { %v9350_v36 = vsub.s32 %v1698_v37, %v1701_v25  ;;  %7619 = vsinq.f32 %v1622_v11  ;;  %vm1776_vm11 = vcmp.lt.s32.totalorder %v9328_v3, 3  ;;  %v1790_v38 = vshll.u32 %v1750_v5, 8 }
 0x1a7   : > { %vm1775_vm0 = vcmp.lt.s32.totalorder %v9328_v3, 2  ;;  %vm1777_vm8 = vcmp.lt.s32.totalorder %v9328_v3, 4  ;;  %v230_v41 = vcvt.s32.f32 %v198_v61  ;;  %v1773_v7 = vor.u32 %v1772_v35, %v1771_v20 }
 0x1a8   : > { %v1704_v48 = vsub.s32 0, %v9350_v36  ;;  %v1779_v37 = vsel %vm1777_vm8, %v1767_v13, 2102212464  ;;  %v1782_v27 = vsel %vm1774_vm6, %v1761_v8, %v1764_v0  ;;  %v1783_v29 = vsel %vm1777_vm8, %v1770_v53, 920167782 }
 0x1a9   : > { %v12008_v5 = vand.u32 2147483647, %v9168_v58  ;;  %v1778_v40 = vsel %vm1774_vm6, %v1758_v52, %v1761_v8  ;;  %v1780_v34 = vsel %vm1776_vm11, %v1764_v0, %v1779_v37  ;;  %v1784_v26 = vsel %vm1776_vm11, %v1767_v13, %v1783_v29 }
 0x1aa   : > { %v7165_v61 = vmin.u32 %v1704_v48, %v9350_v36  ;;  %vm11772_vm9 = vweird.f32 %v9007_v44  ;;  %v1724_v49 = vsub.s32 4, %v1700_v50  ;;  %v1785_v25 = vsel %vm1775_vm0, %v1782_v27, %v1784_v26 }
 0x1ab   : > { %vm9366_vm4 = vcmp.le.f32.partialorder %v12008_v5, 0.7853982  ;;  %v1786_v9 = vsel %vm1774_vm6, %v1764_v0, %v1767_v13  ;;  %v1787_v20 = vsel %vm1777_vm8, %v1773_v7, 1326507024  ;;  %vm1630_vm2 = vcmp.eq.s32.totalorder %v9326_v28, 0 }
 0x1ac   : > { %vm1633_vm7 = vcmp.eq.s32.totalorder %v9326_v28, 2  ;;  %v1706_v8 = vclz %v7165_v61  ;;  %v199_v11 = vadd.s32 %v7940_v1, %v166_v21  ;;  %v1781_v52 = vsel %vm1775_vm0, %v1778_v40, %v1780_v34 }
 0x1ad   : > { %v1788_v35 = vsel %vm1776_vm11, %v1770_v53, %v1787_v20  ;;  %v9391_v48 = vmul.u32.u64.low %v1790_v38, %v1785_v25  ;;  %v9392_v37 = vmul.u32.u64.high %v1790_v38, %v1785_v25, %v9391_v48  ;;  %v9397_v7 = vmul.f32 %v9165_v32, %v230_v41 }
 0x1ae   : > { %v7166_v13 = vadd.s32 4294967294, %v1706_v8  ;;  %v1789_v0 = vsel %vm1775_vm0, %v1786_v9, %v1788_v35  ;;  %v167_v27 = vadd.s32 136, %v7942_v2  ;;  %v1694_v21 = vadd.s32 %v9289_v56, %v9286_v17 }
 0x1af   : > { %12011 = vst [vmem:[#allocation48_spill] sm:$0xff] %v9397_v7  ;;  %v1725_v29 = vsel %vm1640_vm10, %v1724_v49, %v1700_v50  ;;  %v9404_v5 = vmul.u32.u64.low %v1790_v38, %v1789_v0  ;;  %v9405_v53 = vmul.u32.u64.high %v1790_v38, %v1789_v0, %v9404_v5  ;;  %v9407_v61 = vpop.eup %7617  ;;  %v1797_v40 = vmul.u32 %v1790_v38, %v1781_v52 }
 0x1b0   : > { %12012 = vst [vmem:[#allocation49_spill] sm:$0xff] %v9407_v61  ;;  %vm7167_vm6 = vcmp.lt.s32.totalorder %v7166_v13, 0  ;;  %v11768_v3 = vand.u32 2147483647, %v9397_v7  ;;  %v231_v34 = vcvt.s32.f32 %v199_v11  ;;  %v9410_v41 = vpop.eup %7619  ;;  %v11761_v26 = vxor.u32 2147483648, %v9407_v61 }
 0x1b1   : > { %12013 = vst [vmem:[#allocation50_spill] sm:$0xff] %v9410_v41  ;;  %v1709_v25 = vsel %vm7167_vm6, 0, %v7166_v13  ;;  %v1800_v17 = vadd.s32 1, %v9392_v37  ;;  %v1849_v56 = vand.u32 2139095040, %v9397_v7  ;;  %v11766_v50 = vxor.u32 2147483648, %v9410_v41 }
 0x1b2   : > { %v1710_v49 = vsub.s32 32, %v1709_v25  ;;  %v1711_v9 = vshll.u32 %v9350_v36, %v1709_v25  ;;  %v1714_v20 = vsub.s32 4294967266, %v1709_v25  ;;  %v1635_v38 = vsel %vm1633_vm7, %v11761_v26, %v9410_v41 }
 0x1b3   : > { %v9424_v8 = vsel %vm9366_vm4, 0, %v1725_v29  ;;  %vm1799_vm11 = vc.u32 %v9405_v53, %v9391_v48  ;;  %v200_v11 = vadd.s32 %v7940_v1, %v167_v27  ;;  %v1632_v36 = vsel %vm1630_vm2, %v9407_v61, %v11766_v50 }
 0x1b4   : > { %12014 = vst [vmem:[#allocation51_spill] sm:$0xff] %v9424_v8  ;;  %v1712_v52 = vshrl.u32 %v1694_v21, %v1710_v49  ;;  %v1715_v35 = vadd.s32 127, %v1714_v20  ;;  %v1801_v13 = vsel %vm1799_vm11, %v1800_v17, %v9392_v37  ;;  %v1636_v0 = vsel %vm1629_vm14, %v1632_v36, %v1635_v38 }
 0x1b5   : > { %v1802_v5 = vadd.s32 %v1801_v13, %v1797_v40  ;;  %v1850_v29 = vshrl.u32 %v1849_v56, 23  ;;  %v1853_v25 = vand.u32 8388607, %v11768_v3  ;;  %v1637_v27 = vsel %vm11772_vm9, nan, %v1636_v0 }
 0x1b6   : > { %v1713_v26 = vor.u32 %v1712_v52, %v1711_v9  ;;  %v1716_v41 = vshll.u32 %v1715_v35, 23  ;;  %v9441_v45 = vmul.f32 %v9165_v32, %v231_v34  ;;  %3626 = vst [vmem:[%s8286_s17 + $0x60] sm:$0xff] %v1637_v27  ;;  %v1731_v28 = vadd.s32 3, %v9424_v8 }
 0x1b7   : > { %v1803_v21 = vadd.s32 536870912, %v1802_v5  ;;  %v7172_v49 = vadd.s32 4294967169, %v1850_v29  ;;  %vm1744_vm7 = vcmp.lt.s32.totalorder %v9231_v42, 0  ;;  %v1854_v9 = vor.u32 8388608, %v1853_v25 }
 0x1b8   : > { %12015 = vst [vmem:[#allocation52_spill] sm:$0xff] %v9441_v45  ;;  %v1717_v37 = vor.u32 4788187, %v1716_v41  ;;  %v1720_v17 = vcvt.s32.f32 %v1713_v26  ;;  %v11767_v40 = vand.u32 2147483647, %v9441_v45  ;;  %v1953_v38 = vand.u32 2139095040, %v9441_v45 }
 0x1b9   : > { %v1804_v56 = vshrl.u32 %v1803_v21, 30  ;;  %v1856_v20 = vadd.s32 1, %v7172_v49  ;;  %v232_v52 = vcvt.s32.f32 %v200_v11  ;;  %v9450_v13 = vand.u32 3, %v1731_v28 }
 0x1ba   : > { %v1718_v36 = vand.u32 2147483647, %v1717_v37  ;;  %v1957_v41 = vand.u32 8388607, %v11767_v40  ;;  %v12016_v0 = vand.u32 2147483647, %v9231_v42  ;;  %v1798_v21 = vadd.s32 %v9391_v48, %v9405_v53 }
 0x1bb   : > { %v1805_v34 = vshll.u32 %v1804_v56, 30  ;;  %v1828_v35 = vsub.s32 4, %v1804_v56  ;;  %vm1857_vm0 = vcmp.gt.s32.totalorder %v1856_v20, 0  ;;  %v1954_v49 = vshrl.u32 %v1953_v38, 23 }
 0x1bc   : > { %v1721_v26 = vmul.f32 %v1720_v17, %v1718_v36  ;;  %vm9454_vm8 = vcmp.le.f32.partialorder %v12016_v0, 0.7853982  ;;  %v1858_v27 = vsel %vm1857_vm0, %v1856_v20, 0  ;;  %v9463_v17 = vshll.u32 %v1854_v9, 8 }
 0x1bd   : > { %v9459_v25 = vsub.s32 %v1802_v5, %v1805_v34  ;;  %v1860_v11 = vand.u32 31, %v1858_v27  ;;  %v1829_v50 = vsel %vm1744_vm7, %v1828_v35, %v1804_v56  ;;  %v9466_v28 = vmul.f32 %v9165_v32, %v232_v52 }
 0x1be   : > { %v1722_v37 = vxor.u32 2147483648, %v1721_v26  ;;  %v1859_v0 = vshrl.u32 %v1858_v27, 5  ;;  %v1958_v20 = vor.u32 8388608, %v1957_v41  ;;  %v9480_v52 = vsel %vm9454_vm8, 0, %v1829_v50 }
 0x1bf   : > { %12019 = vst [vmem:[#allocation53_spill] sm:$0xff] %v9466_v28  ;;  %v1808_v36 = vsub.s32 0, %v9459_v25  ;;  %v1861_v40 = vsub.s32 32, %v1860_v11  ;;  %v1863_v53 = vshll.u32 %v11963_v47, %v1860_v11  ;;  %v1866_v5 = vshll.u32 %v11970_v62, %v1860_v11  ;;  %12020 = vst [vmem:[#allocation54_spill] sm:$0xff] %v9480_v52 }
 0x1c0   : > { %v1723_v48 = vsel %vm1640_vm10, %v1722_v37, %v1721_v26  ;;  %v1869_v38 = vshll.u32 %v11971_v18, %v1860_v11  ;;  %v7176_v34 = vadd.s32 4294967169, %v1954_v49  ;;  %v1872_v46 = vshll.u32 %v11959_v14, %v1860_v11 }
 0x1c1   : > { %v1726_v56 = vsel %vm9366_vm4, %v9168_v58, %v1723_v48  ;;  %v7169_v9 = vmin.u32 %v1808_v36, %v9459_v25  ;;  %v1864_v35 = vshrl.u32 %v11970_v62, %v1861_v40  ;;  %v1867_v41 = vshrl.u32 %v11971_v18, %v1861_v40 }
 0x1c2   : > { %7621 = vcosq.f32 %v1726_v56  ;;  %v1870_v26 = vshrl.u32 %v11959_v14, %v1861_v40  ;;  %v1862_v37 = vshrl.u32 %v11963_v47, %v1861_v40  ;;  %vm1737_vm10 = vcmp.eq.s32.totalorder %v9450_v13, 2 }
 0x1c3   : > { %7623 = vsinq.f32 %v1726_v56  ;;  %v1810_v27 = vclz %v7169_v9  ;;  %v1865_v36 = vor.u32 %v1864_v35, %v1863_v53  ;;  %v1868_v48 = vor.u32 %v1867_v41, %v1866_v5 }
 0x1c4   : > { %v1871_v50 = vor.u32 %v1870_v26, %v1869_v38  ;;  %v9488_v3 = vshll.u32 %v1958_v20, 8  ;;  %vm1734_vm14 = vcmp.eq.s32.totalorder %v9450_v13, 0  ;;  %v1873_v44 = vshrl.u32 %v11961_v23, %v1861_v40 }
 0x1c5   : > { %v7170_v49 = vadd.s32 4294967294, %v1810_v27  ;;  %v1875_v61 = vshll.u32 %v11961_v23, %v1860_v11  ;;  %v1876_v56 = vshrl.u32 %v11962_v60, %v1861_v40  ;;  %vm1733_vm4 = vcmp.lt.s32.totalorder %v9450_v13, 2 }
 0x1c6   : > { %vm1878_vm2 = vcmp.lt.s32.totalorder %v1859_v0, 1  ;;  %vm1879_vm6 = vcmp.lt.s32.totalorder %v1859_v0, 2  ;;  %vm1880_vm11 = vcmp.lt.s32.totalorder %v1859_v0, 3  ;;  %vm1881_vm0 = vcmp.lt.s32.totalorder %v1859_v0, 4 }
 0x1c7   : > { %vm11835_vm9 = vweird.f32 %v9168_v58  ;;  %vm7171_vm13 = vcmp.lt.s32.totalorder %v7170_v49, 0  ;;  %v1874_v20 = vor.u32 %v1873_v44, %v1872_v46  ;;  %v1877_v53 = vor.u32 %v1876_v56, %v1875_v61 }
 0x1c8   : > { %v1882_v5 = vsel %vm1878_vm2, %v1862_v37, %v1865_v36  ;;  %v1813_v38 = vsel %vm7171_vm13, 0, %v7170_v49  ;;  %v1883_v9 = vsel %vm1881_vm0, %v1871_v50, 2102212464  ;;  %v1886_v35 = vsel %vm1878_vm2, %v1865_v36, %v1868_v48 }
 0x1c9   : > { %v1890_v41 = vsel %vm1878_vm2, %v1868_v48, %v1871_v50  ;;  %v1814_v11 = vsub.s32 32, %v1813_v38  ;;  %v1815_v40 = vshll.u32 %v9459_v25, %v1813_v38  ;;  %v1818_v26 = vsub.s32 4294967266, %v1813_v38 }
 0x1ca   : > { %v1884_v27 = vsel %vm1880_vm11, %v1868_v48, %v1883_v9  ;;  %v9500_v8 = vadd.s32 3, %v9480_v52  ;;  %v1887_v31 = vsel %vm1881_vm0, %v1874_v20, 920167782  ;;  %v1891_v44 = vsel %vm1881_vm0, %v1877_v53, 1326507024 }
 0x1cb   : > { %v1960_v61 = vadd.s32 1, %v7176_v34  ;;  %v1816_v37 = vshrl.u32 %v1798_v21, %v1814_v11  ;;  %v1819_v46 = vadd.s32 127, %v1818_v26  ;;  %v1888_v49 = vsel %vm1880_vm11, %v1871_v50, %v1887_v31 }
 0x1cc   : > { %v1892_v36 = vsel %vm1880_vm11, %v1874_v20, %v1891_v44  ;;  %v9506_v56 = vpop.eup %7621  ;;  %v1885_v25 = vsel %vm1879_vm6, %v1882_v5, %v1884_v27  ;;  %v1889_v48 = vsel %vm1879_vm6, %v1886_v35, %v1888_v49 }
 0x1cd   : > { %12021 = vst [vmem:[#allocation55_spill] sm:$0xff] %v9506_v56  ;;  %v1893_v38 = vsel %vm1879_vm6, %v1890_v41, %v1892_v36  ;;  %vm1961_vm13 = vcmp.gt.s32.totalorder %v1960_v61, 0  ;;  %v9511_v9 = vpop.eup %7623  ;;  %v11777_v53 = vxor.u32 2147483648, %v9506_v56  ;;  %v1817_v34 = vor.u32 %v1816_v37, %v1815_v40 }
 0x1ce   : > { %12022 = vst [vmem:[#allocation56_spill] sm:$0xff] %v9511_v9  ;;  %v1820_v21 = vshll.u32 %v1819_v46, 23  ;;  %v1962_v11 = vsel %vm1961_vm13, %v1960_v61, 0  ;;  %v11778_v31 = vxor.u32 2147483648, %v9511_v9  ;;  %v1901_v61 = vmul.u32 %v9463_v17, %v1885_v25 }
 0x1cf   : > { %v9516_v50 = vmul.u32.u64.low %v9463_v17, %v1893_v38  ;;  %v9517_v20 = vmul.u32.u64.high %v9463_v17, %v1893_v38, %v9516_v50  ;;  %v1963_v26 = vshrl.u32 %v1962_v11, 5  ;;  %v1739_v0 = vsel %vm1737_vm10, %v11777_v53, %v9511_v9 }
 0x1d0   : > { %v1821_v5 = vor.u32 4788187, %v1820_v21  ;;  %v1824_v35 = vcvt.s32.f32 %v1817_v34  ;;  %v1964_v41 = vand.u32 31, %v1962_v11  ;;  %v1736_v40 = vsel %vm1734_vm14, %v9506_v56, %v11778_v31 }
 0x1d1   : > { %v9530_v27 = vmul.u32.u64.low %v9463_v17, %v1889_v48  ;;  %v9531_v44 = vmul.u32.u64.high %v9463_v17, %v1889_v48, %v9530_v27  ;;  %v1740_v37 = vsel %vm1733_vm4, %v1736_v40, %v1739_v0  ;;  %vm1982_vm14 = vcmp.lt.s32.totalorder %v1963_v26, 1 }
 0x1d2   : > { %v1822_v46 = vand.u32 2147483647, %v1821_v5  ;;  %v1965_v49 = vsub.s32 32, %v1964_v41  ;;  %v1967_v36 = vshll.u32 %v11963_v47, %v1964_v41  ;;  %v1741_v38 = vsel %vm11835_vm9, nan, %v1740_v37 }
 0x1d3   : > { %vm1903_vm10 = vc.u32 %v9517_v20, %v9530_v27  ;;  %v1970_v34 = vshll.u32 %v11970_v62, %v1964_v41  ;;  %3627 = vst [vmem:[%s8286_s17 + $0x68] sm:$0xff] %v1741_v38  ;;  %v1904_v21 = vadd.s32 1, %v9531_v44  ;;  %v1973_v11 = vshll.u32 %v11971_v18, %v1964_v41 }
 0x1d4   : > { %v1825_v48 = vmul.f32 %v1824_v35, %v1822_v46  ;;  %v1966_v17 = vshrl.u32 %v11963_v47, %v1965_v49  ;;  %v1968_v13 = vshrl.u32 %v11970_v62, %v1965_v49  ;;  %v1971_v25 = vshrl.u32 %v11971_v18, %v1965_v49 }
 0x1d5   : > { %v1974_v50 = vshrl.u32 %v11959_v14, %v1965_v49  ;;  %v1976_v0 = vshll.u32 %v11959_v14, %v1964_v41  ;;  %v1977_v38 = vshrl.u32 %v11961_v23, %v1965_v49  ;;  %v1905_v35 = vsel %vm1903_vm10, %v1904_v21, %v9531_v44 }
 0x1d6   : > { %v1826_v5 = vxor.u32 2147483648, %v1825_v48  ;;  %v1969_v40 = vor.u32 %v1968_v13, %v1967_v36  ;;  %v1972_v37 = vor.u32 %v1971_v25, %v1970_v34  ;;  %v1979_v53 = vshll.u32 %v11961_v23, %v1964_v41 }
 0x1d7   : > { %v1975_v46 = vor.u32 %v1974_v50, %v1973_v11  ;;  %v1980_v31 = vshrl.u32 %v11962_v60, %v1965_v49  ;;  %v1906_v56 = vadd.s32 %v1905_v35, %v1901_v61  ;;  %v1978_v9 = vor.u32 %v1977_v38, %v1976_v0 }
 0x1d8   : > { %v1827_v58 = vsel %vm1744_vm7, %v1826_v5, %v1825_v48  ;;  %vm1983_vm4 = vcmp.lt.s32.totalorder %v1963_v26, 2  ;;  %vm1984_vm2 = vcmp.lt.s32.totalorder %v1963_v26, 3  ;;  %vm1985_vm6 = vcmp.lt.s32.totalorder %v1963_v26, 4 }
 0x1d9   : > { %v1830_v36 = vsel %vm9454_vm8, %v9231_v42, %v1827_v58  ;;  %v1981_v34 = vor.u32 %v1980_v31, %v1979_v53  ;;  %v1907_v44 = vadd.s32 536870912, %v1906_v56  ;;  %v1986_v13 = vsel %vm1982_vm14, %v1966_v17, %v1969_v40 }
 0x1da   : > { %7625 = vcosq.f32 %v1830_v36  ;;  %v1987_v41 = vsel %vm1985_vm6, %v1975_v46, 2102212464  ;;  %v1990_v48 = vsel %vm1982_vm14, %v1969_v40, %v1972_v37  ;;  %v1991_v61 = vsel %vm1985_vm6, %v1978_v9, 920167782 }
 0x1db   : > { %7627 = vsinq.f32 %v1830_v36  ;;  %v1988_v49 = vsel %vm1984_vm2, %v1972_v37, %v1987_v41  ;;  %v1908_v25 = vshrl.u32 %v1907_v44, 30  ;;  %v1992_v21 = vsel %vm1984_vm2, %v1975_v46, %v1991_v61 }
 0x1dc   : > { %v1994_v29 = vsel %vm1982_vm14, %v1972_v37, %v1975_v46  ;;  %v1993_v58 = vsel %vm1983_vm4, %v1990_v48, %v1992_v21  ;;  %v1995_v53 = vsel %vm1985_vm6, %v1981_v34, 1326507024  ;;  %v1836_v31 = vand.u32 3, %v9500_v8 }
 0x1dd   : > { %v1909_v11 = vshll.u32 %v1908_v25, 30  ;;  %v1989_v17 = vsel %vm1983_vm4, %v1986_v13, %v1988_v49  ;;  %v1996_v50 = vsel %vm1984_vm2, %v1978_v9, %v1995_v53  ;;  %v2057_v38 = vand.u32 2139095040, %v9466_v28 }
 0x1de   : > { %v1997_v0 = vsel %vm1983_vm4, %v1994_v29, %v1996_v50  ;;  %v9574_v5 = vmul.u32.u64.low %v9488_v3, %v1993_v58  ;;  %v9575_v40 = vmul.u32.u64.high %v9488_v3, %v1993_v58, %v9574_v5  ;;  %v1932_v37 = vsub.s32 4, %v1908_v25 }
 0x1df   : > { %v9578_v35 = vsub.s32 %v1906_v56, %v1909_v11  ;;  %v9581_v46 = vmul.u32.u64.low %v9488_v3, %v1997_v0  ;;  %v9582_v36 = vmul.u32.u64.high %v9488_v3, %v1997_v0, %v9581_v46  ;;  %v11786_v8 = vand.u32 2147483647, %v9466_v28 }
 0x1e0   : > { %v2058_v34 = vshrl.u32 %v2057_v38, 23  ;;  %vm11834_vm7 = vweird.f32 %v9231_v42  ;;  %vm1848_vm8 = vcmp.lt.s32.totalorder %v9397_v7, 0  ;;  %vm1838_vm11 = vcmp.eq.s32.totalorder %v1836_v31, 0 }
 0x1e1   : > { %v1912_v9 = vsub.s32 0, %v9578_v35  ;;  %v2005_v26 = vmul.u32 %v9488_v3, %v1989_v17  ;;  %v2008_v56 = vadd.s32 1, %v9575_v40  ;;  %vm1841_vm0 = vcmp.eq.s32.totalorder %v1836_v31, 2 }
 0x1e2   : > { %v7180_v44 = vadd.s32 4294967169, %v2058_v34  ;;  %v1933_v49 = vsel %vm1848_vm8, %v1932_v37, %v1908_v25  ;;  %vm2007_vm13 = vc.u32 %v9582_v36, %v9574_v5  ;;  %v2061_v3 = vand.u32 8388607, %v11786_v8 }
 0x1e3   : > { %v7173_v41 = vmin.u32 %v1912_v9, %v9578_v35  ;;  %v2009_v21 = vsel %vm2007_vm13, %v2008_v56, %v9575_v40  ;;  %vm1837_vm10 = vcmp.lt.s32.totalorder %v1836_v31, 2  ;;  %v168_v11 = vadd.s32 144, %v7942_v2 }
 0x1e4   : > { %v9590_v13 = vpop.eup %7625  ;;  %v2064_v29 = vadd.s32 1, %v7180_v44  ;;  %v12025_v17 = vand.u32 2147483647, %v9397_v7  ;;  %v2010_v0 = vadd.s32 %v2009_v21, %v2005_v26  ;;  %v2062_v56 = vor.u32 8388608, %v2061_v3 }
 0x1e5   : > { %12023 = vst [vmem:[#allocation57_spill] sm:$0xff] %v9590_v13  ;;  %v9596_v48 = vpop.eup %7627  ;;  %v11784_v61 = vxor.u32 2147483648, %v9590_v13  ;;  %v1914_v53 = vclz %v7173_v41  ;;  %v1902_v26 = vadd.s32 %v9530_v27, %v9517_v20 }
 0x1e6   : > { %12024 = vst [vmem:[#allocation58_spill] sm:$0xff] %v9596_v48  ;;  %v11785_v58 = vxor.u32 2147483648, %v9596_v48  ;;  %vm9609_vm14 = vcmp.le.f32.partialorder %v12025_v17, 0.7853982  ;;  %vm2065_vm4 = vcmp.gt.s32.totalorder %v2064_v29, 0  ;;  %v2011_v9 = vadd.s32 536870912, %v2010_v0 }
 0x1e7   : > { %v1843_v25 = vsel %vm1841_vm0, %v11784_v61, %v9596_v48  ;;  %v7174_v38 = vadd.s32 4294967294, %v1914_v53  ;;  %v9619_v37 = vsel %vm9609_vm14, 0, %v1933_v49  ;;  %v2066_v46 = vsel %vm2065_vm4, %v2064_v29, 0 }
 0x1e8   : > { %v1840_v40 = vsel %vm1838_vm11, %v9590_v13, %v11785_v58  ;;  %12028 = vst [vmem:[#allocation59_spill] sm:$0xff] %v9619_v37  ;;  %v2068_v44 = vand.u32 31, %v2066_v46  ;;  %v9627_v21 = vadd.s32 3, %v9619_v37  ;;  %v9629_v53 = vshrl.u32 %v2011_v9, 30 }
 0x1e9   : > { %v1844_v34 = vsel %vm1837_vm10, %v1840_v40, %v1843_v25  ;;  %vm7175_vm2 = vcmp.lt.s32.totalorder %v7174_v38, 0  ;;  %v201_v17 = vadd.s32 %v7940_v1, %v168_v11  ;;  %v9634_v40 = vadd.s32 %v9574_v5, %v9582_v36 }
 0x1ea   : > { %v1845_v41 = vsel %vm11834_vm7, nan, %v1844_v34  ;;  %v1917_v31 = vsel %vm7175_vm2, 0, %v7174_v38  ;;  %v2069_v49 = vsub.s32 32, %v2068_v44  ;;  %v2013_v20 = vshll.u32 %v9629_v53, 30 }
 0x1eb   : > { %3628 = vst [vmem:[%s8286_s17 + $0x70] sm:$0xff] %v1845_v41  ;;  %v1918_v29 = vsub.s32 32, %v1917_v31  ;;  %v1919_v25 = vshll.u32 %v9578_v35, %v1917_v31  ;;  %v1922_v3 = vsub.s32 4294967266, %v1917_v31  ;;  %v9637_v27 = vshll.u32 %v2062_v56, 8 }
 0x1ec   : > { %v169_v38 = vadd.s32 152, %v7942_v2  ;;  %v9640_v9 = vshrl.u32 %v2066_v46, 5  ;;  %v2071_v61 = vshll.u32 %v11963_v47, %v2068_v44  ;;  %v9643_v58 = vsub.s32 %v2010_v0, %v2013_v20 }
 0x1ed   : > { %v1920_v34 = vshrl.u32 %v1902_v26, %v1918_v29  ;;  %v1923_v41 = vadd.s32 127, %v1922_v3  ;;  %v2072_v35 = vshrl.u32 %v11970_v62, %v2069_v49  ;;  %v2074_v11 = vshll.u32 %v11970_v62, %v2068_v44 }
 0x1ee   : > { %v2075_v5 = vshrl.u32 %v11971_v18, %v2069_v49  ;;  %v2077_v56 = vshll.u32 %v11971_v18, %v2068_v44  ;;  %v2078_v8 = vshrl.u32 %v11959_v14, %v2069_v49  ;;  %v2016_v26 = vsub.s32 0, %v9643_v58 }
 0x1ef   : > { %v1921_v36 = vor.u32 %v1920_v34, %v1919_v25  ;;  %v1924_v31 = vshll.u32 %v1923_v41, 23  ;;  %v2070_v46 = vshrl.u32 %v11963_v47, %v2069_v49  ;;  %v2080_v29 = vshll.u32 %v11959_v14, %v2068_v44 }
 0x1f0   : > { %v233_v0 = vcvt.s32.f32 %v201_v17  ;;  %v2081_v42 = vshrl.u32 %v11961_v23, %v2069_v49  ;;  %v2083_v37 = vshll.u32 %v11961_v23, %v2068_v44  ;;  %v7177_v25 = vmin.u32 %v2016_v26, %v9643_v58 }
 0x1f1   : > { %v1925_v3 = vor.u32 4788187, %v1924_v31  ;;  %v1928_v20 = vcvt.s32.f32 %v1921_v36  ;;  %v2073_v34 = vor.u32 %v2072_v35, %v2071_v61  ;;  %v2076_v41 = vor.u32 %v2075_v5, %v2074_v11 }
 0x1f2   : > { %v2084_v13 = vshrl.u32 %v11962_v60, %v2069_v49  ;;  %v2079_v52 = vor.u32 %v2078_v8, %v2077_v56  ;;  %v2082_v30 = vor.u32 %v2081_v42, %v2080_v29  ;;  %vm2086_vm6 = vcmp.lt.s32.totalorder %v9640_v9, 1 }
 0x1f3   : > { %v1926_v48 = vand.u32 2147483647, %v1925_v3  ;;  %vm1952_vm11 = vcmp.lt.s32.totalorder %v9441_v45, 0  ;;  %v2018_v17 = vclz %v7177_v25  ;;  %vm2088_vm0 = vcmp.lt.s32.totalorder %v9640_v9, 3 }
 0x1f4   : > { %v9661_v36 = vmul.f32 %v9165_v32, %v233_v0  ;;  %v9664_v44 = vadd.s32 %v7940_v1, %v169_v38  ;;  %v2085_v35 = vor.u32 %v2084_v13, %v2083_v37  ;;  %vm2087_vm13 = vcmp.lt.s32.totalorder %v9640_v9, 2 }
 0x1f5   : > { %v1929_v61 = vmul.f32 %v1928_v20, %v1926_v48  ;;  %vm2089_vm10 = vcmp.lt.s32.totalorder %v9640_v9, 4  ;;  %v7178_v42 = vadd.s32 4294967294, %v2018_v17  ;;  %v2094_v49 = vsel %vm2086_vm6, %v2073_v34, %v2076_v41 }
 0x1f6   : > { %12029 = vst [vmem:[#allocation60_spill] sm:$0xff] %v9661_v36  ;;  %v2091_v8 = vsel %vm2089_vm10, %v2079_v52, 2102212464  ;;  %v2095_v11 = vsel %vm2089_vm10, %v2082_v30, 920167782  ;;  %v2036_v31 = vsub.s32 4, %v9629_v53  ;;  %v2090_v32 = vsel %vm2086_vm6, %v2070_v46, %v2073_v34 }
 0x1f7   : > { %v1930_v5 = vxor.u32 2147483648, %v1929_v61  ;;  %v2096_v48 = vsel %vm2088_vm0, %v2079_v52, %v2095_v11  ;;  %vm7179_vm4 = vcmp.lt.s32.totalorder %v7178_v42, 0  ;;  %v2098_v37 = vsel %vm2086_vm6, %v2076_v41, %v2079_v52 }
 0x1f8   : > { %v2097_v13 = vsel %vm2087_vm13, %v2094_v49, %v2096_v48  ;;  %v2099_v38 = vsel %vm2089_vm10, %v2085_v35, 1326507024  ;;  %v2021_v26 = vsel %vm7179_vm4, 0, %v7178_v42  ;;  %v2092_v29 = vsel %vm2088_vm0, %v2076_v41, %v2091_v8 }
 0x1f9   : > { %v1931_v56 = vsel %vm1848_vm8, %v1930_v5, %v1929_v61  ;;  %v2100_v46 = vsel %vm2088_vm0, %v2082_v30, %v2099_v38  ;;  %v2022_v3 = vsub.s32 32, %v2021_v26  ;;  %v2023_v20 = vshll.u32 %v9643_v58, %v2021_v26 }
 0x1fa   : > { %v1934_v0 = vsel %vm9609_vm14, %v9397_v7, %v1931_v56  ;;  %v2026_v25 = vsub.s32 4294967266, %v2021_v26  ;;  %v2101_v52 = vsel %vm2087_vm13, %v2098_v37, %v2100_v46  ;;  %v2093_v50 = vsel %vm2087_vm13, %v2090_v32, %v2092_v29 }
 0x1fb   : > { %7629 = vcosq.f32 %v1934_v0  ;;  %v9692_v34 = vmul.u32.u64.low %v9637_v27, %v2097_v13  ;;  %v9693_v17 = vmul.u32.u64.high %v9637_v27, %v2097_v13, %v9692_v34  ;;  %v2024_v41 = vshrl.u32 %v9634_v40, %v2022_v3 }
 0x1fc   : > { %7631 = vsinq.f32 %v1934_v0  ;;  %v2027_v30 = vadd.s32 127, %v2026_v25  ;;  %v2037_v58 = vsel %vm1952_vm11, %v2036_v31, %v9629_v53  ;;  %v2161_v42 = vand.u32 2139095040, %v9661_v36 }
 0x1fd   : > { %v9702_v61 = vmul.u32.u64.low %v9637_v27, %v2101_v52  ;;  %v9703_v35 = vmul.u32.u64.high %v9637_v27, %v2101_v52, %v9702_v61  ;;  %v12030_v8 = vand.u32 2147483647, %v9441_v45  ;;  %v2025_v40 = vor.u32 %v2024_v41, %v2023_v20  ;;  %v9730_v52 = vld [vmem:[#allocation2] ss:$0 sm:$0xff] }
 0x1fe   : > { %v2028_v11 = vshll.u32 %v2027_v30, 23  ;;  %v1940_v9 = vand.u32 3, %v9627_v21  ;;  %v2109_v5 = vmul.u32 %v9637_v27, %v2093_v50  ;;  %v2112_v53 = vadd.s32 1, %v9693_v17 }
 0x1ff   : > { %vm9708_vm8 = vcmp.le.f32.partialorder %v12030_v8, 0.7853982  ;;  %v2162_v31 = vshrl.u32 %v2161_v42, 23  ;;  %v2032_v48 = vcvt.s32.f32 %v2025_v40  ;;  %v11798_v37 = vand.u32 2147483647, %v9661_v36 }
 0x200   : > { %v2029_v32 = vor.u32 4788187, %v2028_v11  ;;  %v9717_v13 = vsel %vm9708_vm8, 0, %v2037_v58  ;;  %vm2111_vm14 = vc.u32 %v9703_v35, %v9692_v34  ;;  %v234_v56 = vcvt.s32.f32 %v9664_v44 }
 0x201   : > { %12033 = vst [vmem:[#allocation61_spill] sm:$0xff] %v9717_v13  ;;  %v7184_v38 = vadd.s32 4294967169, %v2162_v31  ;;  %v2113_v21 = vsel %vm2111_vm14, %v2112_v53, %v9693_v17  ;;  %vm11804_vm2 = vweird.f32 %v9397_v7  ;;  %v2043_v27 = vadd.s32 3, %v9717_v13 }
 0x202   : > { %v2030_v26 = vand.u32 2147483647, %v2029_v32  ;;  %v2114_v29 = vadd.s32 %v2113_v21, %v2109_v5  ;;  %vm1941_vm6 = vcmp.lt.s32.totalorder %v1940_v9, 2  ;;  %v2165_v3 = vand.u32 8388607, %v11798_v37 }
 0x203   : > { %v2168_v46 = vadd.s32 1, %v7184_v38  ;;  %v170_v20 = vadd.s32 160, %v7942_v2  ;;  %vm1945_vm0 = vcmp.eq.s32.totalorder %v1940_v9, 2  ;;  %v9733_v17 = vmul.f32 %v9730_v52, %v234_v56 }
 0x204   : > { %v2033_v0 = vmul.f32 %v2032_v48, %v2030_v26  ;;  %v2115_v44 = vadd.s32 536870912, %v2114_v29  ;;  %vm1942_vm10 = vcmp.eq.s32.totalorder %v1940_v9, 0  ;;  %v9739_v42 = vand.u32 3, %v2043_v27 }
 0x205   : > { %v9728_v25 = vpop.eup %7629  ;;  %vm2169_vm13 = vcmp.gt.s32.totalorder %v2168_v46, 0  ;;  %12035 = vst [vmem:[#allocation63_spill] sm:$0xff] %v9733_v17  ;;  %v2166_v53 = vor.u32 8388608, %v2165_v3  ;;  %v9749_v31 = vadd.s32 %v7940_v1, %v170_v20  ;;  %v2265_v56 = vand.u32 2139095040, %v9733_v17 }
 0x206   : > { %12034 = vst [vmem:[#allocation62_spill] sm:$0xff] %v9728_v25  ;;  %v9735_v41 = vpop.eup %7631  ;;  %v11796_v30 = vxor.u32 2147483648, %v9728_v25  ;;  %v2034_v50 = vxor.u32 2147483648, %v2033_v0  ;;  %v2170_v58 = vsel %vm2169_vm13, %v2168_v46, 0  ;;  %v9741_v8 = vshrl.u32 %v2115_v44, 30 }
 0x207   : > { %12036 = vst [vmem:[#allocation64_spill] sm:$0xff] %v9735_v41  ;;  %v11797_v61 = vxor.u32 2147483648, %v9735_v41  ;;  %v2172_v40 = vand.u32 31, %v2170_v58  ;;  %v9761_v21 = vadd.s32 %v9692_v34, %v9703_v35  ;;  %v2171_v3 = vshrl.u32 %v2170_v58, 5 }
 0x208   : > { %v1947_v11 = vsel %vm1945_vm0, %v11796_v30, %v9735_v41  ;;  %v2035_v5 = vsel %vm1952_vm11, %v2034_v50, %v2033_v0  ;;  %v2117_v38 = vshll.u32 %v9741_v8, 30  ;;  %vm2049_vm11 = vcmp.eq.s32.totalorder %v9739_v42, 2 }
 0x209   : > { %v1944_v32 = vsel %vm1942_vm10, %v9728_v25, %v11797_v61  ;;  %v2038_v48 = vsel %vm9708_vm8, %v9441_v45, %v2035_v5  ;;  %v2173_v27 = vsub.s32 32, %v2172_v40  ;;  %v2175_v49 = vshll.u32 %v11963_v47, %v2172_v40 }
 0x20a   : > { %v1948_v26 = vsel %vm1941_vm6, %v1944_v32, %v1947_v11  ;;  %7633 = vcosq.f32 %v2038_v48  ;;  %v9765_v0 = vsub.s32 %v2114_v29, %v2117_v38  ;;  %v2178_v20 = vshll.u32 %v11970_v62, %v2172_v40 }
 0x20b   : > { %v1949_v46 = vsel %vm11804_vm2, nan, %v1948_v26  ;;  %7635 = vsinq.f32 %v2038_v48  ;;  %v2176_v9 = vshrl.u32 %v11970_v62, %v2173_v27  ;;  %v9772_v44 = vshll.u32 %v2166_v53, 8 }
 0x20c   : > { %3629 = vst [vmem:[%s8286_s17 + $0x78] sm:$0xff] %v1949_v46  ;;  %vm2046_vm4 = vcmp.eq.s32.totalorder %v9739_v42, 0  ;;  %v2120_v34 = vsub.s32 0, %v9765_v0  ;;  %v2179_v35 = vshrl.u32 %v11971_v18, %v2173_v27  ;;  %v2181_v29 = vshll.u32 %v11971_v18, %v2172_v40 }
 0x20d   : > { %v2266_v50 = vshrl.u32 %v2265_v56, 23  ;;  %vm2045_vm8 = vcmp.lt.s32.totalorder %v9739_v42, 2  ;;  %v2182_v11 = vshrl.u32 %v11959_v14, %v2173_v27  ;;  %v2184_v58 = vshll.u32 %v11959_v14, %v2172_v40 }
 0x20e   : > { %v2185_v5 = vshrl.u32 %v11961_v23, %v2173_v27  ;;  %vm11813_vm14 = vweird.f32 %v9441_v45  ;;  %v7181_v32 = vmin.u32 %v2120_v34, %v9765_v0  ;;  %v2177_v48 = vor.u32 %v2176_v9, %v2175_v49 }
 0x20f   : > { %v2180_v38 = vor.u32 %v2179_v35, %v2178_v20  ;;  %v2187_v26 = vshll.u32 %v11961_v23, %v2172_v40  ;;  %v2174_v56 = vshrl.u32 %v11963_v47, %v2173_v27  ;;  %v2188_v30 = vshrl.u32 %v11962_v60, %v2173_v27 }
 0x210   : > { %v2186_v46 = vor.u32 %v2185_v5, %v2184_v58  ;;  %vm2190_vm6 = vcmp.lt.s32.totalorder %v2171_v3, 1  ;;  %v2122_v61 = vclz %v7181_v32  ;;  %v2183_v37 = vor.u32 %v2182_v11, %v2181_v29 }
 0x211   : > { %v11807_v7 = vand.u32 2147483647, %v9733_v17  ;;  %v7188_v25 = vadd.s32 4294967169, %v2266_v50  ;;  %v2140_v53 = vsub.s32 4, %v9741_v8  ;;  %v2189_v41 = vor.u32 %v2188_v30, %v2187_v26 }
 0x212   : > { %vm2192_vm0 = vcmp.lt.s32.totalorder %v2171_v3, 3  ;;  %vm2193_vm13 = vcmp.lt.s32.totalorder %v2171_v3, 4  ;;  %v7182_v49 = vadd.s32 4294967294, %v2122_v61  ;;  %vm2191_vm10 = vcmp.lt.s32.totalorder %v2171_v3, 2 }
 0x213   : > { %v2195_v9 = vsel %vm2193_vm13, %v2183_v37, 2102212464  ;;  %v2198_v40 = vsel %vm2190_vm6, %v2177_v48, %v2180_v38  ;;  %v2194_v27 = vsel %vm2190_vm6, %v2174_v56, %v2177_v48  ;;  %v2199_v35 = vsel %vm2193_vm13, %v2186_v46, 920167782 }
 0x214   : > { %v9791_v20 = vpop.eup %7633  ;;  %v2196_v34 = vsel %vm2192_vm0, %v2180_v38, %v2195_v9  ;;  %v2203_v29 = vsel %vm2193_vm13, %v2189_v41, 1326507024  ;;  %vm7183_vm2 = vcmp.lt.s32.totalorder %v7182_v49, 0  ;;  %v2200_v30 = vsel %vm2192_vm0, %v2183_v37, %v2199_v35 }
 0x215   : > { %12037 = vst [vmem:[#allocation65_spill] sm:$0xff] %v9791_v20  ;;  %v9795_v11 = vpop.eup %7635  ;;  %v11805_v50 = vxor.u32 2147483648, %v9791_v20  ;;  %v2202_v61 = vsel %vm2190_vm6, %v2180_v38, %v2183_v37  ;;  %v2125_v5 = vsel %vm7183_vm2, 0, %v7182_v49  ;;  %v2201_v32 = vsel %vm2191_vm10, %v2198_v40, %v2200_v30 }
 0x216   : > { %12038 = vst [vmem:[#allocation66_spill] sm:$0xff] %v9795_v11  ;;  %v11806_v58 = vxor.u32 2147483648, %v9795_v11  ;;  %v2204_v48 = vsel %vm2192_vm0, %v2186_v46, %v2203_v29  ;;  %v2126_v26 = vsub.s32 32, %v2125_v5  ;;  %v2127_v56 = vshll.u32 %v9765_v0, %v2125_v5 }
 0x217   : > { %v2051_v41 = vsel %vm2049_vm11, %v11805_v50, %v9795_v11  ;;  %v2130_v9 = vsub.s32 4294967266, %v2125_v5  ;;  %v2205_v38 = vsel %vm2191_vm10, %v2202_v61, %v2204_v48  ;;  %v2197_v29 = vsel %vm2191_vm10, %v2194_v27, %v2196_v34 }
 0x218   : > { %v2048_v37 = vsel %vm2046_vm4, %v9791_v20, %v11806_v58  ;;  %v9816_v46 = vmul.u32.u64.low %v9772_v44, %v2201_v32  ;;  %v9817_v49 = vmul.u32.u64.high %v9772_v44, %v2201_v32, %v9816_v46  ;;  %v2128_v35 = vshrl.u32 %v9761_v21, %v2126_v26 }
 0x219   : > { %v2052_v40 = vsel %vm2045_vm8, %v2048_v37, %v2051_v41  ;;  %v2131_v0 = vadd.s32 127, %v2130_v9  ;;  %v9827_v5 = vmul.u32.u64.low %v9772_v44, %v2205_v38  ;;  %v9828_v50 = vmul.u32.u64.high %v9772_v44, %v2205_v38, %v9827_v5 }
 0x21a   : > { %v2053_v30 = vsel %vm11813_vm14, nan, %v2052_v40  ;;  %v2272_v61 = vadd.s32 1, %v7188_v25  ;;  %vm2056_vm2 = vcmp.lt.s32.totalorder %v9466_v28, 0  ;;  %v2129_v32 = vor.u32 %v2128_v35, %v2127_v56 }
 0x21b   : > { %3630 = vst [vmem:[%s8286_s17 + $0x80] sm:$0xff] %v2053_v30  ;;  %v2132_v48 = vshll.u32 %v2131_v0, 23  ;;  %v2269_v42 = vand.u32 8388607, %v11807_v7  ;;  %v2141_v21 = vsel %vm2056_vm2, %v2140_v53, %v9741_v8  ;;  %v2213_v3 = vmul.u32 %v9772_v44, %v2197_v29 }
 0x21c   : > { %v2216_v27 = vadd.s32 1, %v9817_v49  ;;  %vm2273_vm11 = vcmp.gt.s32.totalorder %v2272_v61, 0  ;;  %v2136_v41 = vcvt.s32.f32 %v2129_v32  ;;  %v12039_v26 = vand.u32 2147483647, %v9466_v28 }
 0x21d   : > { %v2133_v34 = vor.u32 4788187, %v2132_v48  ;;  %v2274_v25 = vsel %vm2273_vm11, %v2272_v61, 0  ;;  %vm2215_vm8 = vc.u32 %v9828_v50, %v9816_v46  ;;  %v12042_v8 = vcvt.s32.f32 %v9749_v31 }
 0x21e   : > { %vm9841_vm4 = vcmp.le.f32.partialorder %v12039_v26, 0.7853982  ;;  %v2276_v9 = vand.u32 31, %v2274_v25  ;;  %v2217_v38 = vsel %vm2215_vm8, %v2216_v27, %v9817_v49  ;;  %v2270_v40 = vor.u32 8388608, %v2269_v42 }
 0x21f   : > { %v9850_v44 = vmul.f32 %v9730_v52, %v12042_v8  ;;  %v2134_v53 = vand.u32 2147483647, %v2133_v34  ;;  %v9854_v37 = vsel %vm9841_vm4, 0, %v2141_v21  ;;  %v2218_v35 = vadd.s32 %v2217_v38, %v2213_v3 }
 0x220   : > { %12044 = vst [vmem:[#allocation68_spill] sm:$0xff] %v9854_v37  ;;  %v2275_v0 = vshrl.u32 %v2274_v25, 5  ;;  %v2277_v29 = vsub.s32 32, %v2276_v9  ;;  %v2279_v30 = vshll.u32 %v11963_v47, %v2276_v9  ;;  %v2282_v61 = vshll.u32 %v11970_v62, %v2276_v9 }
 0x221   : > { %12043 = vst [vmem:[#allocation67_spill] sm:$0xff] %v9850_v44  ;;  %v2137_v5 = vmul.f32 %v2136_v41, %v2134_v53  ;;  %v2285_v31 = vshll.u32 %v11971_v18, %v2276_v9  ;;  %v2288_v32 = vshll.u32 %v11959_v14, %v2276_v9  ;;  %v2219_v48 = vadd.s32 536870912, %v2218_v35 }
 0x222   : > { %v2280_v34 = vshrl.u32 %v11970_v62, %v2277_v29  ;;  %v2283_v21 = vshrl.u32 %v11971_v18, %v2277_v29  ;;  %v2291_v49 = vshll.u32 %v11961_v23, %v2276_v9  ;;  %v2286_v3 = vshrl.u32 %v11959_v14, %v2277_v29 }
 0x223   : > { %v2138_v42 = vxor.u32 2147483648, %v2137_v5  ;;  %v2289_v27 = vshrl.u32 %v11961_v23, %v2277_v29  ;;  %v2292_v41 = vshrl.u32 %v11962_v60, %v2277_v29  ;;  %v2147_v25 = vadd.s32 3, %v9854_v37 }
 0x224   : > { %v9868_v26 = vshrl.u32 %v2219_v48, 30  ;;  %v2278_v8 = vshrl.u32 %v11963_v47, %v2277_v29  ;;  %v2369_v53 = vand.u32 2139095040, %v9850_v44  ;;  %v2281_v58 = vor.u32 %v2280_v34, %v2279_v30 }
 0x225   : > { %v2139_v38 = vsel %vm2056_vm2, %v2138_v42, %v2137_v5  ;;  %v2284_v9 = vor.u32 %v2283_v21, %v2282_v61  ;;  %v2290_v7 = vor.u32 %v2289_v27, %v2288_v32  ;;  %v2287_v11 = vor.u32 %v2286_v3, %v2285_v31 }
 0x226   : > { %v2142_v45 = vsel %vm9841_vm4, %v9466_v28, %v2139_v38  ;;  %v2221_v20 = vshll.u32 %v9868_v26, 30  ;;  %vm2294_vm6 = vcmp.lt.s32.totalorder %v2275_v0, 1  ;;  %v2293_v48 = vor.u32 %v2292_v41, %v2291_v49 }
 0x227   : > { %7637 = vcosq.f32 %v2142_v45  ;;  %vm2296_vm0 = vcmp.lt.s32.totalorder %v2275_v0, 3  ;;  %vm2297_vm13 = vcmp.lt.s32.totalorder %v2275_v0, 4  ;;  %vm2295_vm10 = vcmp.lt.s32.totalorder %v2275_v0, 2 }
 0x228   : > { %7639 = vsinq.f32 %v2142_v45  ;;  %v9878_v29 = vsub.s32 %v2218_v35, %v2221_v20  ;;  %v2370_v5 = vshrl.u32 %v2369_v53, 23  ;;  %v2299_v30 = vsel %vm2297_vm13, %v2287_v11, 2102212464 }
 0x229   : > { %v2302_v61 = vsel %vm2294_vm6, %v2281_v58, %v2284_v9  ;;  %v2303_v32 = vsel %vm2297_vm13, %v2290_v7, 920167782  ;;  %v2310_v34 = vshll.u32 %v2270_v40, 8  ;;  %v2148_v56 = vand.u32 3, %v2147_v25 }
 0x22a   : > { %v2224_v21 = vsub.s32 0, %v9878_v29  ;;  %v2304_v31 = vsel %vm2296_vm0, %v2287_v11, %v2303_v32  ;;  %v2298_v42 = vsel %vm2294_vm6, %v2278_v8, %v2281_v58  ;;  %v2306_v45 = vsel %vm2294_vm6, %v2284_v9, %v2287_v11 }
 0x22b   : > { %v2305_v49 = vsel %vm2295_vm10, %v2302_v61, %v2304_v31  ;;  %v2307_v20 = vsel %vm2297_vm13, %v2293_v48, 1326507024  ;;  %v2300_v3 = vsel %vm2296_vm0, %v2284_v9, %v2299_v30  ;;  %v7192_v41 = vadd.s32 4294967169, %v2370_v5 }
 0x22c   : > { %v7185_v35 = vmin.u32 %v2224_v21, %v9878_v29  ;;  %v2308_v27 = vsel %vm2296_vm0, %v2290_v7, %v2307_v20  ;;  %v9890_v25 = vmul.u32.u64.low %v2310_v34, %v2305_v49  ;;  %v9891_v53 = vmul.u32.u64.high %v2310_v34, %v2305_v49, %v9890_v25 }
 0x22d   : > { %v2309_v40 = vsel %vm2295_vm10, %v2306_v45, %v2308_v27  ;;  %vm11832_vm2 = vweird.f32 %v9466_v28  ;;  %vm2160_vm11 = vcmp.lt.s32.totalorder %v9661_v36, 0  ;;  %v2301_v11 = vsel %vm2295_vm10, %v2298_v42, %v2300_v3 }
 0x22e   : > { %v2226_v58 = vclz %v7185_v35  ;;  %v9897_v8 = vmul.u32.u64.low %v2310_v34, %v2309_v40  ;;  %v9898_v38 = vmul.u32.u64.high %v2310_v34, %v2309_v40, %v9897_v8  ;;  %v2376_v9 = vadd.s32 1, %v7192_v41 }
 0x22f   : > { %vm2149_vm4 = vcmp.lt.s32.totalorder %v2148_v56, 2  ;;  %vm2150_vm8 = vcmp.eq.s32.totalorder %v2148_v56, 0  ;;  %vm2153_vm6 = vcmp.eq.s32.totalorder %v2148_v56, 2  ;;  %v2214_v5 = vadd.s32 %v9816_v46, %v9828_v50 }
 0x230   : > { %v7186_v7 = vadd.s32 4294967294, %v2226_v58  ;;  %v2320_v30 = vadd.s32 1, %v9891_v53  ;;  %v11816_v61 = vand.u32 2147483647, %v9850_v44  ;;  %vm2377_vm0 = vcmp.gt.s32.totalorder %v2376_v9, 0 }
 0x231   : > { %v9900_v48 = vpop.eup %7637  ;;  %v12047_v21 = vand.u32 2147483647, %v9661_v36  ;;  %v2317_v42 = vmul.u32 %v2310_v34, %v2301_v11  ;;  %v2378_v49 = vsel %vm2377_vm0, %v2376_v9, 0  ;;  %v2244_v45 = vsub.s32 4, %v9868_v26 }
 0x232   : > { %12045 = vst [vmem:[#allocation69_spill] sm:$0xff] %v9900_v48  ;;  %v9906_v0 = vpop.eup %7639  ;;  %v11814_v32 = vxor.u32 2147483648, %v9900_v48  ;;  %vm7187_vm10 = vcmp.lt.s32.totalorder %v7186_v7, 0  ;;  %vm2319_vm14 = vc.u32 %v9898_v38, %v9890_v25  ;;  %v2373_v40 = vand.u32 8388607, %v11816_v61 }
 0x233   : > { %12046 = vst [vmem:[#allocation70_spill] sm:$0xff] %v9906_v0  ;;  %vm9911_vm13 = vcmp.le.f32.partialorder %v12047_v21, 0.7853982  ;;  %v11815_v50 = vxor.u32 2147483648, %v9906_v0  ;;  %v2229_v46 = vsel %vm7187_vm10, 0, %v7186_v7  ;;  %v2321_v41 = vsel %vm2319_vm14, %v2320_v30, %v9891_v53 }
 0x234   : > { %v2155_v20 = vsel %vm2153_vm6, %v11814_v32, %v9906_v0  ;;  %v2230_v35 = vsub.s32 32, %v2229_v46  ;;  %v2231_v3 = vshll.u32 %v9878_v29, %v2229_v46  ;;  %v2234_v27 = vsub.s32 4294967266, %v2229_v46 }
 0x235   : > { %v2152_v34 = vsel %vm2150_vm8, %v9900_v48, %v11815_v50  ;;  %v2380_v58 = vand.u32 31, %v2378_v49  ;;  %v2322_v7 = vadd.s32 %v2321_v41, %v2317_v42  ;;  %v2245_v21 = vsel %vm2160_vm11, %v2244_v45, %v9868_v26 }
 0x236   : > { %v2156_v11 = vsel %vm2149_vm4, %v2152_v34, %v2155_v20  ;;  %v2232_v8 = vshrl.u32 %v2214_v5, %v2230_v35  ;;  %v2235_v9 = vadd.s32 127, %v2234_v27  ;;  %v2374_v41 = vor.u32 8388608, %v2373_v40 }
 0x237   : > { %v2157_v29 = vsel %vm11832_vm2, nan, %v2156_v11  ;;  %v2381_v46 = vsub.s32 32, %v2380_v58  ;;  %v2383_v32 = vshll.u32 %v11963_v47, %v2380_v58  ;;  %v2323_v50 = vadd.s32 536870912, %v2322_v7 }
 0x238   : > { %3631 = vst [vmem:[%s8286_s17 + $0x88] sm:$0xff] %v2157_v29  ;;  %v2233_v53 = vor.u32 %v2232_v8, %v2231_v3  ;;  %v2236_v30 = vshll.u32 %v2235_v9, 23  ;;  %v2386_v56 = vshll.u32 %v11970_v62, %v2380_v58  ;;  %v2389_v20 = vshll.u32 %v11971_v18, %v2380_v58 }
 0x239   : > { %v2384_v5 = vshrl.u32 %v11970_v62, %v2381_v46  ;;  %v2387_v42 = vshrl.u32 %v11971_v18, %v2381_v46  ;;  %v2390_v35 = vshrl.u32 %v11959_v14, %v2381_v46  ;;  %v9944_v26 = vshrl.u32 %v2323_v50, 30 }
 0x23a   : > { %v2237_v27 = vor.u32 4788187, %v2236_v30  ;;  %v2240_v34 = vcvt.s32.f32 %v2233_v53  ;;  %v2392_v45 = vshll.u32 %v11959_v14, %v2380_v58  ;;  %v9949_v3 = vsel %vm9911_vm13, 0, %v2245_v21 }
 0x23b   : > { %12050 = vst [vmem:[#allocation71_spill] sm:$0xff] %v9949_v3  ;;  %v2379_v11 = vshrl.u32 %v2378_v49, 5  ;;  %v2393_v8 = vshrl.u32 %v11961_v23, %v2381_v46  ;;  %v2325_v29 = vshll.u32 %v9944_v26, 30  ;;  %v2395_v61 = vshll.u32 %v11961_v23, %v2380_v58 }
 0x23c   : > { %v2238_v9 = vand.u32 2147483647, %v2237_v27  ;;  %v171_v30 = vadd.s32 168, %v7942_v2  ;;  %v2382_v50 = vshrl.u32 %v11963_v47, %v2381_v46  ;;  %v2385_v53 = vor.u32 %v2384_v5, %v2383_v32 }
 0x23d   : > { %v2394_v28 = vor.u32 %v2393_v8, %v2392_v45  ;;  %v2396_v48 = vshrl.u32 %v11962_v60, %v2381_v46  ;;  %v9957_v21 = vsub.s32 %v2322_v7, %v2325_v29  ;;  %v2388_v40 = vor.u32 %v2387_v42, %v2386_v56 }
 0x23e   : > { %v2241_v0 = vmul.f32 %v2240_v34, %v2238_v9  ;;  %v2391_v49 = vor.u32 %v2390_v35, %v2389_v20  ;;  %vm2398_vm14 = vcmp.lt.s32.totalorder %v2379_v11, 1  ;;  %vm2401_vm4 = vcmp.lt.s32.totalorder %v2379_v11, 4 }
 0x23f   : > { %v2397_v37 = vor.u32 %v2396_v48, %v2395_v61  ;;  %v2414_v27 = vshll.u32 %v2374_v41, 8  ;;  %v2328_v58 = vsub.s32 0, %v9957_v21  ;;  %vm2400_vm8 = vcmp.lt.s32.totalorder %v2379_v11, 3 }
 0x240   : > { %v2242_v13 = vxor.u32 2147483648, %v2241_v0  ;;  %v2403_v51 = vsel %vm2401_vm4, %v2391_v49, 2102212464  ;;  %vm2399_vm6 = vcmp.lt.s32.totalorder %v2379_v11, 2  ;;  %v2402_v32 = vsel %vm2398_vm14, %v2382_v50, %v2385_v53 }
 0x241   : > { %v2407_v46 = vsel %vm2401_vm4, %v2394_v28, 920167782  ;;  %v204_v7 = vadd.s32 %v7940_v1, %v171_v30  ;;  %v7189_v48 = vmin.u32 %v2328_v58, %v9957_v21  ;;  %v2404_v61 = vsel %vm2400_vm8, %v2388_v40, %v2403_v51 }
 0x242   : > { %v2243_v56 = vsel %vm2160_vm11, %v2242_v13, %v2241_v0  ;;  %v2406_v5 = vsel %vm2398_vm14, %v2385_v53, %v2388_v40  ;;  %v2408_v20 = vsel %vm2400_vm8, %v2391_v49, %v2407_v46  ;;  %v2410_v35 = vsel %vm2398_vm14, %v2388_v40, %v2391_v49 }
 0x243   : > { %v2246_v42 = vsel %vm9911_vm13, %v9661_v36, %v2243_v56  ;;  %v2411_v34 = vsel %vm2401_vm4, %v2397_v37, 1326507024  ;;  %v2251_v45 = vadd.s32 3, %v9949_v3  ;;  %v2330_v13 = vclz %v7189_v48 }
 0x244   : > { %7641 = vcosq.f32 %v2246_v42  ;;  %v172_v0 = vadd.s32 176, %v7942_v2  ;;  %v2405_v51 = vsel %vm2399_vm6, %v2402_v32, %v2404_v61  ;;  %v2409_v41 = vsel %vm2399_vm6, %v2406_v5, %v2408_v20 }
 0x245   : > { %7643 = vsinq.f32 %v2246_v42  ;;  %v2412_v31 = vsel %vm2400_vm8, %v2394_v28, %v2411_v34  ;;  %v7190_v8 = vadd.s32 4294967294, %v2330_v13  ;;  %v2348_v37 = vsub.s32 4, %v9944_v26 }
 0x246   : > { %v2413_v9 = vsel %vm2399_vm6, %v2410_v35, %v2412_v31  ;;  %v9981_v29 = vmul.u32.u64.low %v2414_v27, %v2409_v41  ;;  %v9982_v30 = vmul.u32.u64.high %v2414_v27, %v2409_v41, %v9981_v29  ;;  %v236_v40 = vcvt.s32.f32 %v204_v7 }
 0x247   : > { %v9986_v50 = vmul.u32.u64.low %v2414_v27, %v2413_v9  ;;  %v9987_v53 = vmul.u32.u64.high %v2414_v27, %v2413_v9, %v9986_v50  ;;  %v12051_v49 = vand.u32 2147483647, %v9733_v17  ;;  %vm2264_vm0 = vcmp.lt.s32.totalorder %v9733_v17, 0 }
 0x248   : > { %v2318_v28 = vadd.s32 %v9890_v25, %v9898_v38  ;;  %vm7191_vm13 = vcmp.lt.s32.totalorder %v7190_v8, 0  ;;  %vm11831_vm10 = vweird.f32 %v9661_v36  ;;  %v2252_v11 = vand.u32 3, %v2251_v45 }
 0x249   : > { %vm9991_vm11 = vcmp.le.f32.partialorder %v12051_v49, 0.7853982  ;;  %v2333_v32 = vsel %vm7191_vm13, 0, %v7190_v8  ;;  %v2421_v46 = vmul.u32 %v2414_v27, %v2405_v51  ;;  %v10000_v56 = vmul.f32 %v9730_v52, %v236_v40 }
 0x24a   : > { %v2334_v7 = vsub.s32 32, %v2333_v32  ;;  %v2335_v48 = vshll.u32 %v9957_v21, %v2333_v32  ;;  %v2338_v61 = vsub.s32 4294967266, %v2333_v32  ;;  %v2424_v5 = vadd.s32 1, %v9982_v30 }
 0x24b   : > { %12054 = vst [vmem:[#allocation72_spill] sm:$0xff] %v10000_v56  ;;  %v2349_v42 = vsel %vm2264_vm0, %v2348_v37, %v9944_v26  ;;  %vm2423_vm14 = vc.u32 %v9987_v53, %v9981_v29  ;;  %v11829_v25 = vand.u32 2147483647, %v10000_v56  ;;  %v205_v38 = vadd.s32 %v7940_v1, %v172_v0 }
 0x24c   : > { %v2336_v27 = vshrl.u32 %v2318_v28, %v2334_v7  ;;  %v2339_v20 = vadd.s32 127, %v2338_v61  ;;  %v2425_v35 = vsel %vm2423_vm14, %v2424_v5, %v9982_v30  ;;  %v2473_v21 = vand.u32 2139095040, %v10000_v56 }
 0x24d   : > { %vm2253_vm4 = vcmp.lt.s32.totalorder %v2252_v11, 2  ;;  %vm2254_vm8 = vcmp.eq.s32.totalorder %v2252_v11, 0  ;;  %vm2257_vm6 = vcmp.eq.s32.totalorder %v2252_v11, 2  ;;  %v2426_v34 = vadd.s32 %v2425_v35, %v2421_v46 }
 0x24e   : > { %v10013_v45 = vpop.eup %7641  ;;  %v2337_v26 = vor.u32 %v2336_v27, %v2335_v48  ;;  %v2340_v13 = vshll.u32 %v2339_v20, 23  ;;  %v10017_v51 = vsel %vm9991_vm11, 0, %v2349_v42  ;;  %v2474_v41 = vshrl.u32 %v2473_v21, 23 }
 0x24f   : > { %12055 = vst [vmem:[#allocation73_spill] sm:$0xff] %v10013_v45  ;;  %12056 = vst [vmem:[#allocation74_spill] sm:$0xff] %v10017_v51  ;;  %v10019_v0 = vpop.eup %7643  ;;  %v11826_v31 = vxor.u32 2147483648, %v10013_v45  ;;  %v2427_v8 = vadd.s32 536870912, %v2426_v34  ;;  %v2477_v9 = vand.u32 8388607, %v11829_v25  ;;  %v237_v30 = vcvt.s32.f32 %v205_v38 }
 0x250   : > { %12057 = vst [vmem:[#allocation75_spill] sm:$0xff] %v10019_v0  ;;  %v11827_v37 = vxor.u32 2147483648, %v10019_v0  ;;  %v2341_v50 = vor.u32 4788187, %v2340_v13  ;;  %v2344_v40 = vcvt.s32.f32 %v2337_v26  ;;  %v7196_v49 = vadd.s32 4294967169, %v2474_v41 }
 0x251   : > { %v2259_v28 = vsel %vm2257_vm6, %v11826_v31, %v10019_v0  ;;  %vm2368_vm13 = vcmp.lt.s32.totalorder %v9850_v44, 0  ;;  %v2428_v32 = vshrl.u32 %v2427_v8, 30  ;;  %v173_v46 = vadd.s32 184, %v7942_v2 }
 0x252   : > { %v2256_v7 = vsel %vm2254_vm8, %v10013_v45, %v11827_v37  ;;  %v2342_v48 = vand.u32 2147483647, %v2341_v50  ;;  %v2355_v61 = vadd.s32 3, %v10017_v51  ;;  %v2480_v5 = vadd.s32 1, %v7196_v49 }
 0x253   : > { %v2260_v42 = vsel %vm2253_vm4, %v2256_v7, %v2259_v28  ;;  %v2429_v38 = vshll.u32 %v2428_v32, 30  ;;  %v2452_v27 = vsub.s32 4, %v2428_v32  ;;  %v2478_v20 = vor.u32 8388608, %v2477_v9 }
 0x254   : > { %v2261_v35 = vsel %vm11831_vm10, nan, %v2260_v42  ;;  %v2345_v21 = vmul.f32 %v2344_v40, %v2342_v48  ;;  %vm2481_vm14 = vcmp.gt.s32.totalorder %v2480_v5, 0  ;;  %v10040_v26 = vmul.f32 %v9730_v52, %v237_v30 }
 0x255   : > { %3632 = vst [vmem:[%s8286_s17 + $0x90] sm:$0xff] %v2261_v35  ;;  %v12059_v13 = vand.u32 2147483647, %v9850_v44  ;;  %v10049_v11 = vsub.s32 %v2426_v34, %v2429_v38  ;;  %v2453_v8 = vsel %vm2368_vm13, %v2452_v27, %v2428_v32  ;;  %v2482_v9 = vsel %vm2481_vm14, %v2480_v5, 0 }
 0x256   : > { %12058 = vst [vmem:[#allocation76_spill] sm:$0xff] %v10040_v26  ;;  %v2346_v50 = vxor.u32 2147483648, %v2345_v21  ;;  %v10053_v49 = vand.u32 3, %v2355_v61  ;;  %v2484_v40 = vand.u32 31, %v2482_v9  ;;  %v10056_v30 = vadd.s32 %v7940_v1, %v173_v46 }
 0x257   : > { %vm10045_vm8 = vcmp.le.f32.partialorder %v12059_v13, 0.7853982  ;;  %v2422_v28 = vadd.s32 %v9981_v29, %v9987_v53  ;;  %v2432_v7 = vsub.s32 0, %v10049_v11  ;;  %v10061_v48 = vshll.u32 %v2478_v20, 8 }
 0x258   : > { %v11828_v34 = vand.u32 2147483647, %v10040_v26  ;;  %v2347_v32 = vsel %vm2264_vm0, %v2346_v50, %v2345_v21  ;;  %v10068_v61 = vsel %vm10045_vm8, 0, %v2453_v8  ;;  %v2485_v5 = vsub.s32 32, %v2484_v40 }
 0x259   : > { %12062 = vst [vmem:[#allocation77_spill] sm:$0xff] %v10068_v61  ;;  %v2577_v46 = vand.u32 2139095040, %v10040_v26  ;;  %v2350_v29 = vsel %vm9991_vm11, %v9733_v17, %v2347_v32  ;;  %v7193_v53 = vmin.u32 %v2432_v7, %v10049_v11  ;;  %v2487_v42 = vshll.u32 %v11963_v47, %v2484_v40 }
 0x25a   : > { %v2490_v38 = vshll.u32 %v11970_v62, %v2484_v40  ;;  %7645 = vcosq.f32 %v2350_v29  ;;  %v2488_v27 = vshrl.u32 %v11970_v62, %v2485_v5  ;;  %v2491_v20 = vshrl.u32 %v11971_v18, %v2485_v5 }
 0x25b   : > { %v2493_v35 = vshll.u32 %v11971_v18, %v2484_v40  ;;  %7647 = vsinq.f32 %v2350_v29  ;;  %v2434_v21 = vclz %v7193_v53  ;;  %v2483_v13 = vshrl.u32 %v2482_v9, 5 }
 0x25c   : > { %v10082_v58 = vand.u32 8388607, %v11828_v34  ;;  %vm2361_vm11 = vcmp.eq.s32.totalorder %v10053_v49, 2  ;;  %v10086_v8 = vadd.s32 3, %v10068_v61  ;;  %v2486_v50 = vshrl.u32 %v11963_v47, %v2485_v5 }
 0x25d   : > { %v2494_v7 = vshrl.u32 %v11959_v14, %v2485_v5  ;;  %v2578_v32 = vshrl.u32 %v2577_v46, 23  ;;  %vm2358_vm0 = vcmp.eq.s32.totalorder %v10053_v49, 0  ;;  %v7194_v31 = vadd.s32 4294967294, %v2434_v21 }
 0x25e   : > { %v2496_v29 = vshll.u32 %v11959_v14, %v2484_v40  ;;  %v2497_v9 = vshrl.u32 %v11961_v23, %v2485_v5  ;;  %v2499_v53 = vshll.u32 %v11961_v23, %v2484_v40  ;;  %vm2357_vm4 = vcmp.lt.s32.totalorder %v10053_v49, 2 }
 0x25f   : > { %v2489_v37 = vor.u32 %v2488_v27, %v2487_v42  ;;  %v2492_v34 = vor.u32 %v2491_v20, %v2490_v38  ;;  %v2495_v25 = vor.u32 %v2494_v7, %v2493_v35  ;;  %v2500_v36 = vshrl.u32 %v11962_v60, %v2485_v5 }
 0x260   : > { %vm11874_vm6 = vweird.f32 %v9733_v17  ;;  %vm7195_vm14 = vcmp.lt.s32.totalorder %v7194_v31, 0  ;;  %v2498_v46 = vor.u32 %v2497_v9, %v2496_v29  ;;  %vm2502_vm10 = vcmp.lt.s32.totalorder %v2483_v13, 1 }
 0x261   : > { %vm2505_vm2 = vcmp.lt.s32.totalorder %v2483_v13, 4  ;;  %v2437_v21 = vsel %vm7195_vm14, 0, %v7194_v31  ;;  %v2501_v61 = vor.u32 %v2500_v36, %v2499_v53  ;;  %vm2503_vm7 = vcmp.lt.s32.totalorder %v2483_v13, 2 }
 0x262   : > { %vm2504_vm9 = vcmp.lt.s32.totalorder %v2483_v13, 3  ;;  %v2438_v45 = vsub.s32 32, %v2437_v21  ;;  %v2439_v40 = vshll.u32 %v10049_v11, %v2437_v21  ;;  %v2442_v0 = vsub.s32 4294967266, %v2437_v21 }
 0x263   : > { %v2507_v42 = vsel %vm2505_vm2, %v2495_v25, 2102212464  ;;  %v2506_v38 = vsel %vm2502_vm10, %v2486_v50, %v2489_v37  ;;  %v2510_v27 = vsel %vm2502_vm10, %v2489_v37, %v2492_v34  ;;  %v2511_v5 = vsel %vm2505_vm2, %v2498_v46, 920167782 }
 0x264   : > { %v2514_v20 = vsel %vm2502_vm10, %v2492_v34, %v2495_v25  ;;  %v2440_v35 = vshrl.u32 %v2422_v28, %v2438_v45  ;;  %v2443_v7 = vadd.s32 127, %v2442_v0  ;;  %v2512_v29 = vsel %vm2504_vm9, %v2495_v25, %v2511_v5  ;;  %v10102_v36 = vpop.eup %7645 }
 0x265   : > { %v2515_v31 = vsel %vm2505_vm2, %v2501_v61, 1326507024  ;;  %12063 = vst [vmem:[#allocation78_spill] sm:$0xff] %v10102_v36  ;;  %v2508_v9 = vsel %vm2504_vm9, %v2492_v34, %v2507_v42  ;;  %v2513_v11 = vsel %vm2503_vm7, %v2510_v27, %v2512_v29  ;;  %v7200_v21 = vadd.s32 4294967169, %v2578_v32  ;;  %v10107_v50 = vpop.eup %7647 }
 0x266   : > { %v2516_v53 = vsel %vm2504_vm9, %v2498_v46, %v2515_v31  ;;  %12064 = vst [vmem:[#allocation79_spill] sm:$0xff] %v10107_v50  ;;  %v11841_v37 = vxor.u32 2147483648, %v10102_v36  ;;  %v2441_v51 = vor.u32 %v2440_v35, %v2439_v40  ;;  %v2444_v45 = vshll.u32 %v2443_v7, 23 }
 0x267   : > { %v2517_v0 = vsel %vm2503_vm7, %v2514_v20, %v2516_v53  ;;  %v11842_v25 = vxor.u32 2147483648, %v10107_v50  ;;  %v2584_v34 = vadd.s32 1, %v7200_v21  ;;  %v2509_v40 = vsel %vm2503_vm7, %v2506_v38, %v2508_v9 }
 0x268   : > { %v10113_v28 = vmul.u32.u64.low %v10061_v48, %v2517_v0  ;;  %v10114_v61 = vmul.u32.u64.high %v10061_v48, %v2517_v0, %v10113_v28  ;;  %v2363_v32 = vsel %vm2361_vm11, %v11841_v37, %v10107_v50  ;;  %v2445_v46 = vor.u32 4788187, %v2444_v45 }
 0x269   : > { %v2448_v42 = vcvt.s32.f32 %v2441_v51  ;;  %v2360_v27 = vsel %vm2358_vm0, %v10102_v36, %v11842_v25  ;;  %v10128_v5 = vmul.u32.u64.low %v10061_v48, %v2513_v11  ;;  %v10129_v20 = vmul.u32.u64.high %v10061_v48, %v2513_v11, %v10128_v5 }
 0x26a   : > { %vm2585_vm9 = vcmp.gt.s32.totalorder %v2584_v34, 0  ;;  %v2364_v35 = vsel %vm2357_vm4, %v2360_v27, %v2363_v32  ;;  %v2446_v7 = vand.u32 2147483647, %v2445_v46  ;;  %v174_v51 = vadd.s32 192, %v7942_v2 }
 0x26b   : > { %v2586_v29 = vsel %vm2585_vm9, %v2584_v34, 0  ;;  %v2365_v13 = vsel %vm11874_vm6, nan, %v2364_v35  ;;  %v2582_v38 = vor.u32 8388608, %v10082_v58  ;;  %v238_v9 = vcvt.s32.f32 %v10056_v30 }
 0x26c   : > { %v2587_v31 = vshrl.u32 %v2586_v29, 5  ;;  %3633 = vst [vmem:[%s8286_s17 + $0x98] sm:$0xff] %v2365_v13  ;;  %v2449_v11 = vmul.f32 %v2448_v42, %v2446_v7  ;;  %v2525_v53 = vmul.u32 %v10061_v48, %v2509_v40  ;;  %vm2527_vm7 = vc.u32 %v10114_v61, %v10128_v5 }
 0x26d   : > { %v2588_v49 = vand.u32 31, %v2586_v29  ;;  %v10144_v21 = vand.u32 3, %v10086_v8  ;;  %v2528_v45 = vadd.s32 1, %v10129_v20  ;;  %v2622_v17 = vshll.u32 %v2582_v38, 8 }
 0x26e   : > { %vm2606_vm2 = vcmp.lt.s32.totalorder %v2587_v31, 1  ;;  %vm2608_vm10 = vcmp.lt.s32.totalorder %v2587_v31, 3  ;;  %v2450_v0 = vxor.u32 2147483648, %v2449_v11  ;;  %vm2609_vm11 = vcmp.lt.s32.totalorder %v2587_v31, 4 }
 0x26f   : > { %v2589_v58 = vsub.s32 32, %v2588_v49  ;;  %v2591_v28 = vshll.u32 %v11963_v47, %v2588_v49  ;;  %v2594_v30 = vshll.u32 %v11970_v62, %v2588_v49  ;;  %v2529_v34 = vsel %vm2527_vm7, %v2528_v45, %v10129_v20 }
 0x270   : > { %v2597_v48 = vshll.u32 %v11971_v18, %v2588_v49  ;;  %v2600_v32 = vshll.u32 %v11959_v14, %v2588_v49  ;;  %v2603_v46 = vshll.u32 %v11961_v23, %v2588_v49  ;;  %v2451_v8 = vsel %vm2368_vm13, %v2450_v0, %v2449_v11 }
 0x271   : > { %v2530_v42 = vadd.s32 %v2529_v34, %v2525_v53  ;;  %v2590_v40 = vshrl.u32 %v11963_v47, %v2589_v58  ;;  %v2592_v27 = vshrl.u32 %v11970_v62, %v2589_v58  ;;  %v2454_v35 = vsel %vm10045_vm8, %v9850_v44, %v2451_v8 }
 0x272   : > { %v2595_v20 = vshrl.u32 %v11971_v18, %v2589_v58  ;;  %v2598_v7 = vshrl.u32 %v11959_v14, %v2589_v58  ;;  %v2601_v29 = vshrl.u32 %v11961_v23, %v2589_v58  ;;  %7649 = vcosq.f32 %v2454_v35 }
 0x273   : > { %v2531_v13 = vadd.s32 536870912, %v2530_v42  ;;  %v2593_v49 = vor.u32 %v2592_v27, %v2591_v28  ;;  %v2604_v11 = vshrl.u32 %v11962_v60, %v2589_v58  ;;  %7651 = vsinq.f32 %v2454_v35 }
 0x274   : > { %v2596_v53 = vor.u32 %v2595_v20, %v2594_v30  ;;  %v2599_v45 = vor.u32 %v2598_v7, %v2597_v48  ;;  %v2602_v0 = vor.u32 %v2601_v29, %v2600_v32  ;;  %vm2607_vm13 = vcmp.lt.s32.totalorder %v2587_v31, 2 }
 0x275   : > { %v2532_v34 = vshrl.u32 %v2531_v13, 30  ;;  %v2605_v37 = vor.u32 %v2604_v11, %v2603_v46  ;;  %v10168_v58 = vmul.f32 %v9730_v52, %v238_v9  ;;  %v2610_v30 = vsel %vm2606_vm2, %v2590_v40, %v2593_v49 }
 0x276   : > { %v2611_v41 = vsel %vm2609_vm11, %v2599_v45, 2102212464  ;;  %v2614_v8 = vsel %vm2606_vm2, %v2593_v49, %v2596_v53  ;;  %v2615_v25 = vsel %vm2609_vm11, %v2602_v0, 920167782  ;;  %v2618_v28 = vsel %vm2606_vm2, %v2596_v53, %v2599_v45 }
 0x277   : > { %v2533_v36 = vshll.u32 %v2532_v34, 30  ;;  %v2616_v50 = vsel %vm2608_vm10, %v2599_v45, %v2615_v25  ;;  %12065 = vst [vmem:[#allocation80_spill] sm:$0xff] %v10168_v58  ;;  %v2612_v48 = vsel %vm2608_vm10, %v2596_v53, %v2611_v41  ;;  %v2619_v46 = vsel %vm2609_vm11, %v2605_v37, 1326507024 }
 0x278   : > { %v2617_v32 = vsel %vm2607_vm13, %v2614_v8, %v2616_v50  ;;  %v2556_v35 = vsub.s32 4, %v2532_v34  ;;  %v2620_v38 = vsel %vm2608_vm10, %v2602_v0, %v2619_v46  ;;  %v207_v20 = vadd.s32 %v7940_v1, %v174_v51 }
 0x279   : > { %v10173_v27 = vsub.s32 %v2530_v42, %v2533_v36  ;;  %vm11873_vm8 = vweird.f32 %v9850_v44  ;;  %v2621_v25 = vsel %vm2607_vm13, %v2618_v28, %v2620_v38  ;;  %v2613_v7 = vsel %vm2607_vm13, %v2610_v30, %v2612_v48 }
 0x27a   : > { %v10179_v52 = vmul.u32.u64.low %v2622_v17, %v2617_v32  ;;  %v10180_v9 = vmul.u32.u64.high %v2622_v17, %v2617_v32, %v10179_v52  ;;  %v10184_v50 = vmul.u32.u64.low %v2622_v17, %v2621_v25  ;;  %v10185_v37 = vmul.u32.u64.high %v2622_v17, %v2621_v25, %v10184_v50 }
 0x27b   : > { %v2536_v40 = vsub.s32 0, %v10173_v27  ;;  %vm2462_vm0 = vcmp.eq.s32.totalorder %v10144_v21, 0  ;;  %vm2472_vm4 = vcmp.lt.s32.totalorder %v10000_v56, 0  ;;  %v2681_v36 = vand.u32 2139095040, %v10168_v58 }
 0x27c   : > { %v10191_v51 = vadd.s32 200, %v7942_v2  ;;  %v10193_v42 = vpop.eup %7649  ;;  %vm2465_vm14 = vcmp.eq.s32.totalorder %v10144_v21, 2  ;;  %v2557_v31 = vsel %vm2472_vm4, %v2556_v35, %v2532_v34  ;;  %v239_v13 = vcvt.s32.f32 %v207_v20 }
 0x27d   : > { %12066 = vst [vmem:[#allocation81_spill] sm:$0xff] %v10193_v42  ;;  %v7197_v29 = vmin.u32 %v2536_v40, %v10173_v27  ;;  %v10199_v49 = vpop.eup %7651  ;;  %v11848_v11 = vxor.u32 2147483648, %v10193_v42  ;;  %v2629_v53 = vmul.u32 %v2622_v17, %v2613_v7  ;;  %v2632_v45 = vadd.s32 1, %v10180_v9  ;;  %v10228_v7 = vld [vmem:[#allocation2] ss:$0 sm:$0xff] }
 0x27e   : > { %12067 = vst [vmem:[#allocation82_spill] sm:$0xff] %v10199_v49  ;;  %v2682_v0 = vshrl.u32 %v2681_v36, 23  ;;  %vm2461_vm9 = vcmp.lt.s32.totalorder %v10144_v21, 2  ;;  %v11849_v41 = vxor.u32 2147483648, %v10199_v49  ;;  %v12068_v8 = vand.u32 2147483647, %v10000_v56 }
 0x27f   : > { %v2538_v34 = vclz %v7197_v29  ;;  %v2467_v30 = vsel %vm2465_vm14, %v11848_v11, %v10199_v49  ;;  %vm2631_vm2 = vc.u32 %v10185_v37, %v10179_v52  ;;  %v11850_v48 = vand.u32 2147483647, %v10168_v58 }
 0x280   : > { %vm10207_vm7 = vcmp.le.f32.partialorder %v12068_v8, 0.7853982  ;;  %v2464_v32 = vsel %vm2462_vm0, %v10193_v42, %v11849_v41  ;;  %v2633_v35 = vsel %vm2631_vm2, %v2632_v45, %v10180_v9  ;;  %v7204_v38 = vadd.s32 4294967169, %v2682_v0 }
 0x281   : > { %v10216_v17 = vsel %vm10207_vm7, 0, %v2557_v31  ;;  %v7198_v46 = vadd.s32 4294967294, %v2538_v34  ;;  %v2468_v20 = vsel %vm2461_vm9, %v2464_v32, %v2467_v30  ;;  %v2526_v25 = vadd.s32 %v10128_v5, %v10114_v61 }
 0x282   : > { %12071 = vst [vmem:[#allocation83_spill] sm:$0xff] %v10216_v17  ;;  %v2634_v40 = vadd.s32 %v2633_v35, %v2629_v53  ;;  %v10231_v50 = vmul.f32 %v10228_v7, %v239_v13  ;;  %v2469_v36 = vsel %vm11873_vm8, nan, %v2468_v20  ;;  %v2563_v21 = vadd.s32 3, %v10216_v17 }
 0x283   : > { %vm7199_vm10 = vcmp.lt.s32.totalorder %v7198_v46, 0  ;;  %v2688_v29 = vadd.s32 1, %v7204_v38  ;;  %3634 = vst [vmem:[%s8286_s17 + $0xa0] sm:$0xff] %v2469_v36  ;;  %vm2576_vm13 = vcmp.lt.s32.totalorder %v10040_v26, 0  ;;  %v2685_v61 = vand.u32 8388607, %v11850_v48 }
 0x284   : > { %12072 = vst [vmem:[#allocation84_spill] sm:$0xff] %v10231_v50  ;;  %v2541_v9 = vsel %vm7199_vm10, 0, %v7198_v46  ;;  %v2635_v31 = vadd.s32 536870912, %v2634_v40  ;;  %v12073_v45 = vand.u32 2147483647, %v10040_v26  ;;  %v2785_v30 = vand.u32 2139095040, %v10231_v50 }
 0x285   : > { %v2542_v5 = vsub.s32 32, %v2541_v9  ;;  %v2543_v53 = vshll.u32 %v10173_v27, %v2541_v9  ;;  %v2546_v13 = vsub.s32 4294967266, %v2541_v9  ;;  %vm2689_vm11 = vcmp.gt.s32.totalorder %v2688_v29, 0 }
 0x286   : > { %vm10243_vm0 = vcmp.le.f32.partialorder %v12073_v45, 0.7853982  ;;  %v2636_v8 = vshrl.u32 %v2635_v31, 30  ;;  %v2690_v34 = vsel %vm2689_vm11, %v2688_v29, 0  ;;  %v10248_v35 = vand.u32 3, %v2563_v21 }
 0x287   : > { %v2544_v32 = vshrl.u32 %v2526_v25, %v2542_v5  ;;  %v2547_v46 = vadd.s32 127, %v2546_v13  ;;  %v2692_v38 = vand.u32 31, %v2690_v34  ;;  %v10251_v20 = vadd.s32 %v10179_v52, %v10185_v37 }
 0x288   : > { %v2637_v27 = vshll.u32 %v2636_v8, 30  ;;  %v2660_v36 = vsub.s32 4, %v2636_v8  ;;  %v2686_v9 = vor.u32 8388608, %v2685_v61  ;;  %v11860_v48 = vand.u32 2147483647, %v10231_v50 }
 0x289   : > { %v2545_v11 = vor.u32 %v2544_v32, %v2543_v53  ;;  %v2548_v45 = vshll.u32 %v2547_v46, 23  ;;  %v2693_v41 = vsub.s32 32, %v2692_v38  ;;  %v2691_v29 = vshrl.u32 %v2690_v34, 5 }
 0x28a   : > { %v10254_v31 = vsub.s32 %v2634_v40, %v2637_v27  ;;  %v2695_v25 = vshll.u32 %v11963_v47, %v2692_v38  ;;  %v2786_v5 = vshrl.u32 %v2785_v30, 23  ;;  %v2661_v52 = vsel %vm2576_vm13, %v2660_v36, %v2636_v8 }
 0x28b   : > { %v2549_v21 = vor.u32 4788187, %v2548_v45  ;;  %v2552_v13 = vcvt.s32.f32 %v2545_v11  ;;  %v2698_v37 = vshll.u32 %v11970_v62, %v2692_v38  ;;  %v2696_v53 = vshrl.u32 %v11970_v62, %v2693_v41 }
 0x28c   : > { %v2640_v61 = vsub.s32 0, %v10254_v31  ;;  %v2699_v32 = vshrl.u32 %v11971_v18, %v2693_v41  ;;  %v2701_v40 = vshll.u32 %v11971_v18, %v2692_v38  ;;  %v2702_v34 = vshrl.u32 %v11959_v14, %v2693_v41 }
 0x28d   : > { %v2550_v46 = vand.u32 2147483647, %v2549_v21  ;;  %v2704_v30 = vshll.u32 %v11959_v14, %v2692_v38  ;;  %v2705_v11 = vshrl.u32 %v11961_v23, %v2693_v41  ;;  %v10268_v8 = vshll.u32 %v2686_v9, 8 }
 0x28e   : > { %v7201_v27 = vmin.u32 %v2640_v61, %v10254_v31  ;;  %v7208_v36 = vadd.s32 4294967169, %v2786_v5  ;;  %v10272_v45 = vand.u32 8388607, %v11860_v48  ;;  %v10276_v17 = vsel %vm10243_vm0, 0, %v2661_v52 }
 0x28f   : > { %v2553_v44 = vmul.f32 %v2552_v13, %v2550_v46  ;;  %v2694_v21 = vshrl.u32 %v11963_v47, %v2693_v41  ;;  %v2707_v42 = vshll.u32 %v11961_v23, %v2692_v38  ;;  %v2697_v3 = vor.u32 %v2696_v53, %v2695_v25 }
 0x290   : > { %v2642_v49 = vclz %v7201_v27  ;;  %v2700_v33 = vor.u32 %v2699_v32, %v2698_v37  ;;  %v2706_v61 = vor.u32 %v2705_v11, %v2704_v30  ;;  %v2703_v24 = vor.u32 %v2702_v34, %v2701_v40 }
 0x291   : > { %v2554_v9 = vxor.u32 2147483648, %v2553_v44  ;;  %v2708_v5 = vshrl.u32 %v11962_v60, %v2693_v41  ;;  %vm2710_vm14 = vcmp.lt.s32.totalorder %v2691_v29, 1  ;;  %vm2711_vm9 = vcmp.lt.s32.totalorder %v2691_v29, 2 }
 0x292   : > { %v7202_v48 = vadd.s32 4294967294, %v2642_v49  ;;  %vm2712_vm2 = vcmp.lt.s32.totalorder %v2691_v29, 3  ;;  %vm2713_vm10 = vcmp.lt.s32.totalorder %v2691_v29, 4  ;;  %v2714_v46 = vsel %vm2710_vm14, %v2694_v21, %v2697_v3 }
 0x293   : > { %v2555_v13 = vsel %vm2472_vm4, %v2554_v9, %v2553_v44  ;;  %v2709_v52 = vor.u32 %v2708_v5, %v2707_v42  ;;  %v2715_v38 = vsel %vm2713_vm10, %v2703_v24, 2102212464  ;;  %v2718_v41 = vsel %vm2710_vm14, %v2697_v3, %v2700_v33 }
 0x294   : > { %v2558_v25 = vsel %vm10207_vm7, %v10000_v56, %v2555_v13  ;;  %vm7203_vm11 = vcmp.lt.s32.totalorder %v7202_v48, 0  ;;  %v2719_v49 = vsel %vm2713_vm10, %v2706_v61, 920167782  ;;  %v2716_v53 = vsel %vm2712_vm2, %v2700_v33, %v2715_v38 }
 0x295   : > { %7653 = vcosq.f32 %v2558_v25  ;;  %v2645_v37 = vsel %vm7203_vm11, 0, %v7202_v48  ;;  %v2720_v44 = vsel %vm2712_vm2, %v2703_v24, %v2719_v49  ;;  %v2667_v34 = vadd.s32 3, %v10276_v17 }
 0x296   : > { %7655 = vsinq.f32 %v2558_v25  ;;  %v2646_v42 = vsub.s32 32, %v2645_v37  ;;  %v2647_v32 = vshll.u32 %v10254_v31, %v2645_v37  ;;  %v2650_v40 = vsub.s32 4294967266, %v2645_v37 }
 0x297   : > { %v2721_v28 = vsel %vm2711_vm9, %v2718_v41, %v2720_v44  ;;  %v2722_v30 = vsel %vm2710_vm14, %v2700_v33, %v2703_v24  ;;  %v2723_v3 = vsel %vm2713_vm10, %v2709_v52, 1326507024  ;;  %v2792_v21 = vadd.s32 1, %v7208_v36 }
 0x298   : > { %v2648_v11 = vshrl.u32 %v10251_v20, %v2646_v42  ;;  %v2651_v48 = vadd.s32 127, %v2650_v40  ;;  %v2724_v27 = vsel %vm2712_vm2, %v2706_v61, %v2723_v3  ;;  %v2717_v9 = vsel %vm2711_vm9, %v2714_v46, %v2716_v53 }
 0x299   : > { %v2725_v5 = vsel %vm2711_vm9, %v2722_v30, %v2724_v27  ;;  %v10302_v31 = vmul.u32.u64.low %v10268_v8, %v2721_v28  ;;  %v10303_v13 = vmul.u32.u64.high %v10268_v8, %v2721_v28, %v10302_v31  ;;  %vm11872_vm4 = vweird.f32 %v10000_v56 }
 0x29a   : > { %v2649_v38 = vor.u32 %v2648_v11, %v2647_v32  ;;  %v2652_v25 = vshll.u32 %v2651_v48, 23  ;;  %v10307_v33 = vmul.u32.u64.low %v10268_v8, %v2725_v5  ;;  %v10308_v24 = vmul.u32.u64.high %v10268_v8, %v2725_v5, %v10307_v33 }
 0x29b   : > { %vm2565_vm7 = vcmp.lt.s32.totalorder %v10248_v35, 2  ;;  %vm2793_vm14 = vcmp.gt.s32.totalorder %v2792_v21, 0  ;;  %v176_v20 = vadd.s32 208, %v7942_v2  ;;  %v2733_v61 = vmul.u32 %v10268_v8, %v2717_v9 }
 0x29c   : > { %v2653_v29 = vor.u32 4788187, %v2652_v25  ;;  %v2656_v36 = vcvt.s32.f32 %v2649_v38  ;;  %v2794_v52 = vsel %vm2793_vm14, %v2792_v21, 0  ;;  %vm2566_vm9 = vcmp.eq.s32.totalorder %v10248_v35, 0 }
 0x29d   : > { %vm2569_vm2 = vcmp.eq.s32.totalorder %v10248_v35, 2  ;;  %v2736_v46 = vadd.s32 1, %v10303_v13  ;;  %v2796_v41 = vand.u32 31, %v2794_v52  ;;  %v10317_v37 = vand.u32 3, %v2667_v34 }
 0x29e   : > { %v2654_v49 = vand.u32 2147483647, %v2653_v29  ;;  %vm2735_vm10 = vc.u32 %v10308_v24, %v10302_v31  ;;  %v2790_v53 = vor.u32 8388608, %v10272_v45  ;;  %v10328_v40 = vadd.s32 %v7940_v1, %v10191_v51 }
 0x29f   : > { %v10322_v44 = vpop.eup %7653  ;;  %v2737_v8 = vsel %vm2735_vm10, %v2736_v46, %v10303_v13  ;;  %v2797_v42 = vsub.s32 32, %v2796_v41  ;;  %v2799_v32 = vshll.u32 %v11963_v47, %v2796_v41  ;;  %v2802_v11 = vshll.u32 %v11970_v62, %v2796_v41 }
 0x2a0   : > { %12076 = vst [vmem:[#allocation85_spill] sm:$0xff] %v10322_v44  ;;  %v10330_v28 = vpop.eup %7655  ;;  %v11863_v34 = vxor.u32 2147483648, %v10322_v44  ;;  %v2657_v30 = vmul.f32 %v2656_v36, %v2654_v49  ;;  %v2738_v3 = vadd.s32 %v2737_v8, %v2733_v61  ;;  %v2795_v48 = vshrl.u32 %v2794_v52, 5 }
 0x2a1   : > { %12077 = vst [vmem:[#allocation86_spill] sm:$0xff] %v10330_v28  ;;  %v11864_v45 = vxor.u32 2147483648, %v10330_v28  ;;  %v2800_v27 = vshrl.u32 %v11970_v62, %v2797_v42  ;;  %v2803_v21 = vshrl.u32 %v11971_v18, %v2797_v42  ;;  %v2805_v13 = vshll.u32 %v11971_v18, %v2796_v41 }
 0x2a2   : > { %v2571_v51 = vsel %vm2569_vm2, %v11863_v34, %v10330_v28  ;;  %v2658_v9 = vxor.u32 2147483648, %v2657_v30  ;;  %v2739_v5 = vadd.s32 536870912, %v2738_v3  ;;  %v2806_v33 = vshrl.u32 %v11959_v14, %v2797_v42 }
 0x2a3   : > { %v2568_v38 = vsel %vm2566_vm9, %v10322_v44, %v11864_v45  ;;  %v2801_v25 = vor.u32 %v2800_v27, %v2799_v32  ;;  %v2808_v29 = vshll.u32 %v11959_v14, %v2796_v41  ;;  %v2804_v46 = vor.u32 %v2803_v21, %v2802_v11 }
 0x2a4   : > { %v2572_v36 = vsel %vm2565_vm7, %v2568_v38, %v2571_v51  ;;  %v2659_v61 = vsel %vm2576_vm13, %v2658_v9, %v2657_v30  ;;  %v2740_v52 = vshrl.u32 %v2739_v5, 30  ;;  %v2809_v32 = vshrl.u32 %v11961_v23, %v2797_v42 }
 0x2a5   : > { %v2573_v49 = vsel %vm11872_vm4, nan, %v2572_v36  ;;  %v2662_v8 = vsel %vm10243_vm0, %v10040_v26, %v2659_v61  ;;  %v2811_v27 = vshll.u32 %v11961_v23, %v2796_v41  ;;  %v2798_v51 = vshrl.u32 %v11963_v47, %v2797_v42 }
 0x2a6   : > { %3635 = vst [vmem:[%s8286_s17 + $0xa8] sm:$0xff] %v2573_v49  ;;  %7657 = vcosq.f32 %v2662_v8  ;;  %v2741_v35 = vshll.u32 %v2740_v52, 30  ;;  %v2812_v30 = vshrl.u32 %v11962_v60, %v2797_v42  ;;  %v2807_v11 = vor.u32 %v2806_v33, %v2805_v13 }
 0x2a7   : > { %7659 = vsinq.f32 %v2662_v8  ;;  %v2810_v21 = vor.u32 %v2809_v32, %v2808_v29  ;;  %vm2814_vm13 = vcmp.lt.s32.totalorder %v2795_v48, 1  ;;  %vm2816_vm11 = vcmp.lt.s32.totalorder %v2795_v48, 3 }
 0x2a8   : > { %v10364_v9 = vsub.s32 %v2738_v3, %v2741_v35  ;;  %v2813_v5 = vor.u32 %v2812_v30, %v2811_v27  ;;  %v10366_v0 = vshll.u32 %v2790_v53, 8  ;;  %vm2815_vm0 = vcmp.lt.s32.totalorder %v2795_v48, 2 }
 0x2a9   : > { %vm2817_vm7 = vcmp.lt.s32.totalorder %v2795_v48, 4  ;;  %v2822_v41 = vsel %vm2814_vm13, %v2801_v25, %v2804_v46  ;;  %v209_v38 = vadd.s32 %v7940_v1, %v176_v20  ;;  %v240_v13 = vcvt.s32.f32 %v10328_v40 }
 0x2aa   : > { %v2744_v36 = vsub.s32 0, %v10364_v9  ;;  %v2819_v61 = vsel %vm2817_vm7, %v2807_v11, 2102212464  ;;  %v2823_v42 = vsel %vm2817_vm7, %v2810_v21, 920167782  ;;  %v2818_v33 = vsel %vm2814_vm13, %v2798_v51, %v2801_v25 }
 0x2ab   : > { %v2820_v3 = vsel %vm2816_vm11, %v2804_v46, %v2819_v61  ;;  %v2824_v29 = vsel %vm2816_vm11, %v2807_v11, %v2823_v42  ;;  %v2827_v53 = vsel %vm2817_vm7, %v2813_v5, 1326507024  ;;  %vm11871_vm14 = vweird.f32 %v10040_v26 }
 0x2ac   : > { %v7205_v49 = vmin.u32 %v2744_v36, %v10364_v9  ;;  %v2825_v8 = vsel %vm2815_vm0, %v2822_v41, %v2824_v29  ;;  %v2826_v20 = vsel %vm2814_vm13, %v2804_v46, %v2807_v11  ;;  %v2764_v32 = vsub.s32 4, %v2740_v52 }
 0x2ad   : > { %v2828_v27 = vsel %vm2816_vm11, %v2810_v21, %v2827_v53  ;;  %v10381_v40 = vmul.u32.u64.low %v10366_v0, %v2825_v8  ;;  %v10382_v35 = vmul.u32.u64.high %v10366_v0, %v2825_v8, %v10381_v40  ;;  %vm2669_vm9 = vcmp.lt.s32.totalorder %v10317_v37, 2 }
 0x2ae   : > { %v12078_v25 = vand.u32 2147483647, %v10168_v58  ;;  %vm2680_vm10 = vcmp.lt.s32.totalorder %v10168_v58, 0  ;;  %v2746_v30 = vclz %v7205_v49  ;;  %v2821_v46 = vsel %vm2815_vm0, %v2818_v33, %v2820_v3 }
 0x2af   : > { %vm2670_vm13 = vcmp.eq.s32.totalorder %v10317_v37, 0  ;;  %v2829_v11 = vsel %vm2815_vm0, %v2826_v20, %v2828_v27  ;;  %v10397_v21 = vmul.f32 %v10228_v7, %v240_v13  ;;  %v241_v5 = vcvt.s32.f32 %v209_v38 }
 0x2b0   : > { %vm10388_vm2 = vcmp.le.f32.partialorder %v12078_v25, 0.7853982  ;;  %v10399_v41 = vpop.eup %7657  ;;  %vm2673_vm11 = vcmp.eq.s32.totalorder %v10317_v37, 2  ;;  %v7206_v36 = vadd.s32 4294967294, %v2746_v30  ;;  %v2734_v48 = vadd.s32 %v10302_v31, %v10308_v24 }
 0x2b1   : > { %12081 = vst [vmem:[#allocation87_spill] sm:$0xff] %v10397_v21  ;;  %12082 = vst [vmem:[#allocation88_spill] sm:$0xff] %v10399_v41  ;;  %v10403_v61 = vmul.u32.u64.low %v10366_v0, %v2829_v11  ;;  %v10404_v42 = vmul.u32.u64.high %v10366_v0, %v2829_v11, %v10403_v61  ;;  %v10406_v29 = vpop.eup %7659  ;;  %v11861_v33 = vxor.u32 2147483648, %v10399_v41  ;;  %v2765_v13 = vsel %vm2680_vm10, %v2764_v32, %v2740_v52 }
 0x2b2   : > { %12083 = vst [vmem:[#allocation89_spill] sm:$0xff] %v10406_v29  ;;  %v2837_v38 = vmul.u32 %v10366_v0, %v2821_v46  ;;  %v11862_v3 = vxor.u32 2147483648, %v10406_v29  ;;  %vm7207_vm0 = vcmp.lt.s32.totalorder %v7206_v36, 0  ;;  %v2840_v53 = vadd.s32 1, %v10382_v35 }
 0x2b3   : > { %v2889_v49 = vand.u32 2139095040, %v10397_v21  ;;  %v2675_v8 = vsel %vm2673_vm11, %v11861_v33, %v10406_v29  ;;  %v2749_v20 = vsel %vm7207_vm0, 0, %v7206_v36  ;;  %v11866_v31 = vand.u32 2147483647, %v10397_v21 }
 0x2b4   : > { %v10422_v24 = vmul.f32 %v10228_v7, %v241_v5  ;;  %v2672_v52 = vsel %vm2670_vm13, %v10399_v41, %v11862_v3  ;;  %v2750_v0 = vsub.s32 32, %v2749_v20  ;;  %v2751_v32 = vshll.u32 %v10364_v9, %v2749_v20 }
 0x2b5   : > { %v2754_v27 = vsub.s32 4294967266, %v2749_v20  ;;  %v2676_v25 = vsel %vm2669_vm9, %v2672_v52, %v2675_v8  ;;  %vm2839_vm7 = vc.u32 %v10404_v42, %v10381_v40  ;;  %v2890_v30 = vshrl.u32 %v2889_v49, 23 }
 0x2b6   : > { %12084 = vst [vmem:[#allocation90_spill] sm:$0xff] %v10422_v24  ;;  %v177_v46 = vadd.s32 216, %v7942_v2  ;;  %v2677_v11 = vsel %vm11871_vm14, nan, %v2676_v25  ;;  %v2752_v5 = vshrl.u32 %v2734_v48, %v2750_v0  ;;  %v2841_v61 = vsel %vm2839_vm7, %v2840_v53, %v10382_v35 }
 0x2b7   : > { %v2755_v36 = vadd.s32 127, %v2754_v27  ;;  %3636 = vst [vmem:[%s8286_s17 + $0xb0] sm:$0xff] %v2677_v11  ;;  %v10441_v9 = vsel %vm10388_vm2, 0, %v2765_v13  ;;  %v2842_v37 = vadd.s32 %v2841_v61, %v2837_v38  ;;  %v7212_v8 = vadd.s32 4294967169, %v2890_v30 }
 0x2b8   : > { %v2893_v20 = vand.u32 8388607, %v11866_v31  ;;  %v2753_v49 = vor.u32 %v2752_v5, %v2751_v32  ;;  %v2993_v33 = vand.u32 2139095040, %v10422_v24  ;;  %v11865_v48 = vand.u32 2147483647, %v10422_v24 }
 0x2b9   : > { %v2756_v52 = vshll.u32 %v2755_v36, 23  ;;  %v2843_v3 = vadd.s32 536870912, %v2842_v37  ;;  %v2896_v25 = vadd.s32 1, %v7212_v8  ;;  %v2771_v53 = vadd.s32 3, %v10441_v9 }
 0x2ba   : > { %v2760_v35 = vcvt.s32.f32 %v2753_v49  ;;  %v2894_v13 = vor.u32 8388608, %v2893_v20  ;;  %v10451_v38 = vadd.s32 %v7940_v1, %v177_v46  ;;  %v2994_v11 = vshrl.u32 %v2993_v33, 23 }
 0x2bb   : > { %v2757_v0 = vor.u32 4788187, %v2756_v52  ;;  %v10448_v27 = vshrl.u32 %v2843_v3, 30  ;;  %vm2897_vm9 = vcmp.gt.s32.totalorder %v2896_v25, 0  ;;  %v10456_v61 = vand.u32 8388607, %v11865_v48 }
 0x2bc   : > { %v2898_v32 = vsel %vm2897_vm9, %v2896_v25, 0  ;;  %v10458_v49 = vand.u32 3, %v2771_v53  ;;  %v10462_v3 = vadd.s32 %v10381_v40, %v10404_v42  ;;  %v10466_v52 = vshll.u32 %v2894_v13, 8 }
 0x2bd   : > { %v2758_v30 = vand.u32 2147483647, %v2757_v0  ;;  %v2845_v5 = vshll.u32 %v10448_v27, 30  ;;  %v2900_v36 = vand.u32 31, %v2898_v32  ;;  %v7216_v45 = vadd.s32 4294967169, %v2994_v11 }
 0x2be   : > { %vm2784_vm13 = vcmp.lt.s32.totalorder %v10231_v50, 0  ;;  %v2899_v31 = vshrl.u32 %v2898_v32, 5  ;;  %v2868_v56 = vsub.s32 4, %v10448_v27  ;;  %v12085_v51 = vand.u32 2147483647, %v10231_v50 }
 0x2bf   : > { %v2761_v8 = vmul.f32 %v2760_v35, %v2758_v30  ;;  %v10464_v20 = vsub.s32 %v2842_v37, %v2845_v5  ;;  %v2901_v46 = vsub.s32 32, %v2900_v36  ;;  %v2903_v0 = vshll.u32 %v11963_v47, %v2900_v36 }
 0x2c0   : > { %v2906_v34 = vshll.u32 %v11970_v62, %v2900_v36  ;;  %v2909_v40 = vshll.u32 %v11971_v18, %v2900_v36  ;;  %v2912_v5 = vshll.u32 %v11959_v14, %v2900_v36  ;;  %vm2774_vm11 = vcmp.eq.s32.totalorder %v10458_v49, 0 }
 0x2c1   : > { %v2762_v25 = vxor.u32 2147483648, %v2761_v8  ;;  %v2848_v35 = vsub.s32 0, %v10464_v20  ;;  %v2904_v53 = vshrl.u32 %v11970_v62, %v2901_v46  ;;  %v2907_v13 = vshrl.u32 %v11971_v18, %v2901_v46 }
 0x2c2   : > { %v2910_v30 = vshrl.u32 %v11959_v14, %v2901_v46  ;;  %v2902_v33 = vshrl.u32 %v11963_v47, %v2901_v46  ;;  %vm2918_vm0 = vcmp.lt.s32.totalorder %v2899_v31, 1  ;;  %vm2919_vm7 = vcmp.lt.s32.totalorder %v2899_v31, 2 }
 0x2c3   : > { %v2763_v37 = vsel %vm2680_vm10, %v2762_v25, %v2761_v8  ;;  %v7209_v48 = vmin.u32 %v2848_v35, %v10464_v20  ;;  %v2905_v42 = vor.u32 %v2904_v53, %v2903_v0  ;;  %v2908_v8 = vor.u32 %v2907_v13, %v2906_v34 }
 0x2c4   : > { %v2766_v11 = vsel %vm10388_vm2, %v10168_v58, %v2763_v37  ;;  %v2913_v25 = vshrl.u32 %v11961_v23, %v2901_v46  ;;  %v2911_v41 = vor.u32 %v2910_v30, %v2909_v40  ;;  %vm2777_vm10 = vcmp.eq.s32.totalorder %v10458_v49, 2 }
 0x2c5   : > { %7661 = vcosq.f32 %v2766_v11  ;;  %v2850_v26 = vclz %v7209_v48  ;;  %vm10491_vm2 = vcmp.le.f32.partialorder %v12085_v51, 0.7853982  ;;  %v2915_v35 = vshll.u32 %v11961_v23, %v2900_v36 }
 0x2c6   : > { %7663 = vsinq.f32 %v2766_v11  ;;  %v2914_v32 = vor.u32 %v2913_v25, %v2912_v5  ;;  %v2916_v34 = vshrl.u32 %v11962_v60, %v2901_v46  ;;  %v3000_v0 = vadd.s32 1, %v7216_v45 }
 0x2c7   : > { %v7210_v48 = vadd.s32 4294967294, %v2850_v26  ;;  %vm2920_vm9 = vcmp.lt.s32.totalorder %v2899_v31, 3  ;;  %vm2773_vm14 = vcmp.lt.s32.totalorder %v10458_v49, 2  ;;  %vm2921_vm4 = vcmp.lt.s32.totalorder %v2899_v31, 4 }
 0x2c8   : > { %v2917_v53 = vor.u32 %v2916_v34, %v2915_v35  ;;  %v2922_v40 = vsel %vm2918_vm0, %v2902_v33, %v2905_v42  ;;  %v2926_v13 = vsel %vm2918_vm0, %v2905_v42, %v2908_v8  ;;  %vm11921_vm8 = vweird.f32 %v10168_v58 }
 0x2c9   : > { %vm7211_vm6 = vcmp.lt.s32.totalorder %v7210_v48, 0  ;;  %v2923_v30 = vsel %vm2921_vm4, %v2911_v41, 2102212464  ;;  %v2927_v36 = vsel %vm2921_vm4, %v2914_v32, 920167782  ;;  %v2930_v5 = vsel %vm2918_vm0, %v2908_v8, %v2911_v41 }
 0x2ca   : > { %v2853_v46 = vsel %vm7211_vm6, 0, %v7210_v48  ;;  %v2924_v45 = vsel %vm2920_vm9, %v2908_v8, %v2923_v30  ;;  %v2928_v26 = vsel %vm2920_vm9, %v2911_v41, %v2927_v36  ;;  %v2931_v11 = vsel %vm2921_vm4, %v2917_v53, 1326507024 }
 0x2cb   : > { %v2854_v25 = vsub.s32 32, %v2853_v46  ;;  %v2855_v51 = vshll.u32 %v10464_v20, %v2853_v46  ;;  %v2858_v29 = vsub.s32 4294967266, %v2853_v46  ;;  %v2869_v33 = vsel %vm2784_vm13, %v2868_v56, %v10448_v27 }
 0x2cc   : > { %v2925_v42 = vsel %vm2919_vm7, %v2922_v40, %v2924_v45  ;;  %v2929_v35 = vsel %vm2919_vm7, %v2926_v13, %v2928_v26  ;;  %v2932_v34 = vsel %vm2920_vm9, %v2914_v32, %v2931_v11  ;;  %vm3001_vm6 = vcmp.gt.s32.totalorder %v3000_v0, 0 }
 0x2cd   : > { %v2856_v8 = vshrl.u32 %v10462_v3, %v2854_v25  ;;  %v2859_v48 = vadd.s32 127, %v2858_v29  ;;  %v2933_v41 = vsel %vm2919_vm7, %v2930_v5, %v2932_v34  ;;  %v3002_v53 = vsel %vm3001_vm6, %v3000_v0, 0 }
 0x2ce   : > { %v10514_v20 = vmul.u32.u64.low %v10466_v52, %v2933_v41  ;;  %v10515_v36 = vmul.u32.u64.high %v10466_v52, %v2933_v41, %v10514_v20  ;;  %v10518_v56 = vmul.u32.u64.low %v10466_v52, %v2929_v35  ;;  %v10519_v27 = vmul.u32.u64.high %v10466_v52, %v2929_v35, %v10518_v56 }
 0x2cf   : > { %v10511_v30 = vpop.eup %7661  ;;  %v2857_v3 = vor.u32 %v2856_v8, %v2855_v51  ;;  %v2860_v29 = vshll.u32 %v2859_v48, 23  ;;  %v10527_v31 = vsel %vm10491_vm2, 0, %v2869_v33  ;;  %v3004_v13 = vand.u32 31, %v3002_v53 }
 0x2d0   : > { %12088 = vst [vmem:[#allocation91_spill] sm:$0xff] %v10511_v30  ;;  %v10522_v40 = vpop.eup %7663  ;;  %v11877_v32 = vxor.u32 2147483648, %v10511_v30  ;;  %v12090_v5 = vor.u32 8388608, %v10456_v61  ;;  %v12091_v45 = vcvt.s32.f32 %v10451_v38  ;;  %v2941_v33 = vmul.u32 %v10466_v52, %v2925_v42 }
 0x2d1   : > { %12089 = vst [vmem:[#allocation92_spill] sm:$0xff] %v10522_v40  ;;  %v11878_v0 = vxor.u32 2147483648, %v10522_v40  ;;  %v2861_v25 = vor.u32 4788187, %v2860_v29  ;;  %v2864_v51 = vcvt.s32.f32 %v2857_v3  ;;  %v2875_v61 = vadd.s32 3, %v10527_v31 }
 0x2d2   : > { %v10532_v46 = vshll.u32 %v12090_v5, 8  ;;  %v10537_v26 = vmul.f32 %v10228_v7, %v12091_v45  ;;  %v2779_v11 = vsel %vm2777_vm10, %v11877_v32, %v10522_v40  ;;  %vm2943_vm4 = vc.u32 %v10515_v36, %v10518_v56 }
 0x2d3   : > { %v2776_v38 = vsel %vm2774_vm11, %v10511_v30, %v11878_v0  ;;  %v2944_v35 = vadd.s32 1, %v10519_v27  ;;  %v2862_v8 = vand.u32 2147483647, %v2861_v25  ;;  %v3003_v48 = vshrl.u32 %v3002_v53, 5 }
 0x2d4   : > { %v2780_v34 = vsel %vm2773_vm14, %v2776_v38, %v2779_v11  ;;  %v3005_v41 = vsub.s32 32, %v3004_v13  ;;  %v3007_v20 = vshll.u32 %v11963_v47, %v3004_v13  ;;  %v3010_v3 = vshll.u32 %v11970_v62, %v3004_v13 }
 0x2d5   : > { %v2781_v52 = vsel %vm11921_vm8, nan, %v2780_v34  ;;  %v2945_v42 = vsel %vm2943_vm4, %v2944_v35, %v10519_v27  ;;  %v2865_v29 = vmul.f32 %v2864_v51, %v2862_v8  ;;  %v3013_v49 = vshll.u32 %v11971_v18, %v3004_v13 }
 0x2d6   : > { %3637 = vst [vmem:[%s8286_s17 + $0xb8] sm:$0xff] %v2781_v52  ;;  %v2946_v5 = vadd.s32 %v2945_v42, %v2941_v33  ;;  %v3008_v45 = vshrl.u32 %v11970_v62, %v3005_v41  ;;  %v3011_v11 = vshrl.u32 %v11971_v18, %v3005_v41  ;;  %v3014_v53 = vshrl.u32 %v11959_v14, %v3005_v41 }
 0x2d7   : > { %v3016_v25 = vshll.u32 %v11959_v14, %v3004_v13  ;;  %v3017_v38 = vshrl.u32 %v11961_v23, %v3005_v41  ;;  %v2866_v27 = vxor.u32 2147483648, %v2865_v29  ;;  %v3006_v34 = vshrl.u32 %v11963_v47, %v3005_v41 }
 0x2d8   : > { %v2947_v35 = vadd.s32 536870912, %v2946_v5  ;;  %v3019_v52 = vshll.u32 %v11961_v23, %v3004_v13  ;;  %v3009_v51 = vor.u32 %v3008_v45, %v3007_v20  ;;  %v3012_v33 = vor.u32 %v3011_v11, %v3010_v3 }
 0x2d9   : > { %v3018_v8 = vor.u32 %v3017_v38, %v3016_v25  ;;  %v3020_v42 = vshrl.u32 %v11962_v60, %v3005_v41  ;;  %v2867_v32 = vsel %vm2784_vm13, %v2866_v27, %v2865_v29  ;;  %v3015_v58 = vor.u32 %v3014_v53, %v3013_v49 }
 0x2da   : > { %v2948_v0 = vshrl.u32 %v2947_v35, 30  ;;  %vm3022_vm14 = vcmp.lt.s32.totalorder %v3003_v48, 1  ;;  %v2870_v30 = vsel %vm10491_vm2, %v10231_v50, %v2867_v32  ;;  %vm3024_vm10 = vcmp.lt.s32.totalorder %v3003_v48, 3 }
 0x2db   : > { %v3021_v40 = vor.u32 %v3020_v42, %v3019_v52  ;;  %vm3025_vm11 = vcmp.lt.s32.totalorder %v3003_v48, 4  ;;  %7665 = vcosq.f32 %v2870_v30  ;;  %vm3023_vm0 = vcmp.lt.s32.totalorder %v3003_v48, 2 }
 0x2dc   : > { %v2949_v13 = vshll.u32 %v2948_v0, 30  ;;  %v3027_v20 = vsel %vm3025_vm11, %v3015_v58, 2102212464  ;;  %7667 = vsinq.f32 %v2870_v30  ;;  %v3026_v41 = vsel %vm3022_vm14, %v3006_v34, %v3009_v51 }
 0x2dd   : > { %v3030_v3 = vsel %vm3022_vm14, %v3009_v51, %v3012_v33  ;;  %v3031_v29 = vsel %vm3025_vm11, %v3018_v8, 920167782  ;;  %v2972_v49 = vsub.s32 4, %v2948_v0  ;;  %v3028_v37 = vsel %vm3024_vm10, %v3012_v33, %v3027_v20 }
 0x2de   : > { %v10580_v45 = vsub.s32 %v2946_v5, %v2949_v13  ;;  %v3032_v32 = vsel %vm3024_vm10, %v3015_v58, %v3031_v29  ;;  %vm2888_vm13 = vcmp.lt.s32.totalorder %v10397_v21, 0  ;;  %v3034_v53 = vsel %vm3022_vm14, %v3012_v33, %v3015_v58 }
 0x2df   : > { %v3033_v11 = vsel %vm3023_vm0, %v3030_v3, %v3032_v32  ;;  %v3035_v30 = vsel %vm3025_vm11, %v3021_v40, 1326507024  ;;  %v2876_v25 = vand.u32 3, %v2875_v61  ;;  %v11885_v5 = vand.u32 2147483647, %v10537_v26 }
 0x2e0   : > { %v2952_v38 = vsub.s32 0, %v10580_v45  ;;  %v3036_v27 = vsel %vm3024_vm10, %v3018_v8, %v3035_v30  ;;  %v3029_v35 = vsel %vm3023_vm0, %v3026_v41, %v3028_v37  ;;  %v2973_v58 = vsel %vm2888_vm13, %v2972_v49, %v2948_v0 }
 0x2e1   : > { %v3037_v34 = vsel %vm3023_vm0, %v3034_v53, %v3036_v27  ;;  %v10594_v52 = vmul.u32.u64.low %v10532_v46, %v3033_v11  ;;  %v10595_v51 = vmul.u32.u64.high %v10532_v46, %v3033_v11, %v10594_v52  ;;  %vm11900_vm2 = vweird.f32 %v10231_v50 }
 0x2e2   : > { %v7213_v42 = vmin.u32 %v2952_v38, %v10580_v45  ;;  %v10601_v40 = vmul.u32.u64.low %v10532_v46, %v3037_v34  ;;  %v10602_v61 = vmul.u32.u64.high %v10532_v46, %v3037_v34, %v10601_v40  ;;  %v12092_v33 = vand.u32 2147483647, %v10397_v21 }
 0x2e3   : > { %v3097_v8 = vand.u32 2139095040, %v10537_v26  ;;  %v178_v13 = vadd.s32 224, %v7942_v2  ;;  %vm2877_vm9 = vcmp.lt.s32.totalorder %v2876_v25, 2  ;;  %vm2878_vm6 = vcmp.eq.s32.totalorder %v2876_v25, 0 }
 0x2e4   : > { %vm10607_vm7 = vcmp.le.f32.partialorder %v12092_v33, 0.7853982  ;;  %v2954_v20 = vclz %v7213_v42  ;;  %v3045_v0 = vmul.u32 %v10532_v46, %v3029_v35  ;;  %v3048_v3 = vadd.s32 1, %v10595_v51 }
 0x2e5   : > { %v10616_v41 = vsel %vm10607_vm7, 0, %v2973_v58  ;;  %v3098_v29 = vshrl.u32 %v3097_v8, 23  ;;  %v3101_v49 = vand.u32 8388607, %v11885_v5  ;;  %v10621_v37 = vpop.eup %7665  ;;  %vm2881_vm4 = vcmp.eq.s32.totalorder %v2876_v25, 2 }
 0x2e6   : > { %12095 = vst [vmem:[#allocation93_spill] sm:$0xff] %v10616_v41  ;;  %12096 = vst [vmem:[#allocation94_spill] sm:$0xff] %v10621_v37  ;;  %v2942_v32 = vadd.s32 %v10518_v56, %v10515_v36  ;;  %v7214_v11 = vadd.s32 4294967294, %v2954_v20  ;;  %vm3047_vm14 = vc.u32 %v10602_v61, %v10594_v52  ;;  %v10626_v46 = vpop.eup %7667  ;;  %v11884_v53 = vxor.u32 2147483648, %v10621_v37 }
 0x2e7   : > { %12097 = vst [vmem:[#allocation95_spill] sm:$0xff] %v10626_v46  ;;  %v3049_v30 = vsel %vm3047_vm14, %v3048_v3, %v10595_v51  ;;  %v7220_v38 = vadd.s32 4294967169, %v3098_v29  ;;  %v211_v27 = vadd.s32 %v7940_v1, %v178_v13  ;;  %v11886_v35 = vxor.u32 2147483648, %v10626_v46 }
 0x2e8   : > { %vm7215_vm10 = vcmp.lt.s32.totalorder %v7214_v11, 0  ;;  %v2979_v34 = vadd.s32 3, %v10616_v41  ;;  %v3050_v42 = vadd.s32 %v3049_v30, %v3045_v0  ;;  %v2883_v36 = vsel %vm2881_vm4, %v11884_v53, %v10626_v46 }
 0x2e9   : > { %v2957_v56 = vsel %vm7215_vm10, 0, %v7214_v11  ;;  %v3102_v58 = vor.u32 8388608, %v3101_v49  ;;  %v3104_v40 = vadd.s32 1, %v7220_v38  ;;  %v2880_v51 = vsel %vm2878_vm6, %v10621_v37, %v11886_v35 }
 0x2ea   : > { %v2958_v33 = vsub.s32 32, %v2957_v56  ;;  %v2959_v8 = vshll.u32 %v10580_v45, %v2957_v56  ;;  %v2962_v13 = vsub.s32 4294967266, %v2957_v56  ;;  %v2884_v20 = vsel %vm2877_vm9, %v2880_v51, %v2883_v36 }
 0x2eb   : > { %v3051_v0 = vadd.s32 536870912, %v3050_v42  ;;  %vm3105_vm11 = vcmp.gt.s32.totalorder %v3104_v40, 0  ;;  %v243_v3 = vcvt.s32.f32 %v211_v27  ;;  %v2885_v29 = vsel %vm11900_vm2, nan, %v2884_v20 }
 0x2ec   : > { %v2960_v11 = vshrl.u32 %v2942_v32, %v2958_v33  ;;  %v2963_v49 = vadd.s32 127, %v2962_v13  ;;  %v3106_v30 = vsel %vm3105_vm11, %v3104_v40, 0  ;;  %3638 = vst [vmem:[%s8286_s17 + $0xc0] sm:$0xff] %v2885_v29  ;;  %v10645_v41 = vand.u32 3, %v2979_v34 }
 0x2ed   : > { %v3052_v38 = vshrl.u32 %v3051_v0, 30  ;;  %v3108_v53 = vand.u32 31, %v3106_v30  ;;  %vm2992_vm0 = vcmp.lt.s32.totalorder %v10422_v24, 0  ;;  %v10649_v45 = vadd.s32 %v10594_v52, %v10602_v61 }
 0x2ee   : > { %v2961_v5 = vor.u32 %v2960_v11, %v2959_v8  ;;  %v2964_v35 = vshll.u32 %v2963_v49, 23  ;;  %v179_v36 = vadd.s32 232, %v7942_v2  ;;  %v10652_v51 = vshll.u32 %v3102_v58, 8 }
 0x2ef   : > { %v3053_v25 = vshll.u32 %v3052_v38, 30  ;;  %v3109_v27 = vsub.s32 32, %v3108_v53  ;;  %v10655_v40 = vmul.f32 %v10228_v7, %v243_v3  ;;  %v3076_v34 = vsub.s32 4, %v3052_v38 }
 0x2f0   : > { %v2965_v56 = vor.u32 4788187, %v2964_v35  ;;  %v2968_v32 = vcvt.s32.f32 %v2961_v5  ;;  %v3107_v8 = vshrl.u32 %v3106_v30, 5  ;;  %v3111_v13 = vshll.u32 %v11963_v47, %v3108_v53 }
 0x2f1   : > { %v10657_v33 = vsub.s32 %v3050_v42, %v3053_v25  ;;  %v3112_v52 = vshrl.u32 %v11970_v62, %v3109_v27  ;;  %v3114_v61 = vshll.u32 %v11970_v62, %v3108_v53  ;;  %v3115_v0 = vshrl.u32 %v11971_v18, %v3109_v27 }
 0x2f2   : > { %v2966_v20 = vand.u32 2147483647, %v2965_v56  ;;  %v3117_v35 = vshll.u32 %v11971_v18, %v3108_v53  ;;  %v3118_v7 = vshrl.u32 %v11959_v14, %v3109_v27  ;;  %v3120_v42 = vshll.u32 %v11959_v14, %v3108_v53 }
 0x2f3   : > { %v3056_v5 = vsub.s32 0, %v10657_v33  ;;  %v3121_v3 = vshrl.u32 %v11961_v23, %v3109_v27  ;;  %v3201_v29 = vand.u32 2139095040, %v10655_v40  ;;  %v10670_v11 = vadd.s32 %v7940_v1, %v179_v36 }
 0x2f4   : > { %v2969_v58 = vmul.f32 %v2968_v32, %v2966_v20  ;;  %v3110_v30 = vshrl.u32 %v11963_v47, %v3109_v27  ;;  %v3123_v25 = vshll.u32 %v11961_v23, %v3108_v53  ;;  %v3124_v56 = vshrl.u32 %v11962_v60, %v3109_v27 }
 0x2f5   : > { %v7217_v49 = vmin.u32 %v3056_v5, %v10657_v33  ;;  %v3113_v37 = vor.u32 %v3112_v52, %v3111_v13  ;;  %v3116_v46 = vor.u32 %v3115_v0, %v3114_v61  ;;  %v3122_v44 = vor.u32 %v3121_v3, %v3120_v42 }
 0x2f6   : > { %v2970_v50 = vxor.u32 2147483648, %v2969_v58  ;;  %v3077_v20 = vsel %vm2992_vm0, %v3076_v34, %v3052_v38  ;;  %v3119_v28 = vor.u32 %v3118_v7, %v3117_v35  ;;  %vm3126_vm9 = vcmp.lt.s32.totalorder %v3107_v8, 1 }
 0x2f7   : > { %v3058_v32 = vclz %v7217_v49  ;;  %v3125_v5 = vor.u32 %v3124_v56, %v3123_v25  ;;  %vm3128_vm6 = vcmp.lt.s32.totalorder %v3107_v8, 3  ;;  %vm3129_vm4 = vcmp.lt.s32.totalorder %v3107_v8, 4 }
 0x2f8   : > { %v2971_v36 = vsel %vm2888_vm13, %v2970_v50, %v2969_v58  ;;  %vm3127_vm14 = vcmp.lt.s32.totalorder %v3107_v8, 2  ;;  %v3131_v13 = vsel %vm3129_vm4, %v3119_v28, 2102212464  ;;  %v3130_v52 = vsel %vm3126_vm9, %v3110_v30, %v3113_v37 }
 0x2f9   : > { %v2974_v53 = vsel %vm10607_vm7, %v10397_v21, %v2971_v36  ;;  %v7218_v27 = vadd.s32 4294967294, %v3058_v32  ;;  %v3134_v38 = vsel %vm3126_vm9, %v3113_v37, %v3116_v46  ;;  %v3135_v34 = vsel %vm3129_vm4, %v3122_v44, 920167782 }
 0x2fa   : > { %7669 = vcosq.f32 %v2974_v53  ;;  %v3132_v50 = vsel %vm3128_vm6, %v3116_v46, %v3131_v13  ;;  %v3136_v61 = vsel %vm3128_vm6, %v3119_v28, %v3135_v34  ;;  %v3138_v35 = vsel %vm3126_vm9, %v3116_v46, %v3119_v28 }
 0x2fb   : > { %7671 = vsinq.f32 %v2974_v53  ;;  %vm7219_vm13 = vcmp.lt.s32.totalorder %v7218_v27, 0  ;;  %v3137_v48 = vsel %vm3127_vm14, %v3134_v38, %v3136_v61  ;;  %v3139_v7 = vsel %vm3129_vm4, %v3125_v5, 1326507024 }
 0x2fc   : > { %v3061_v0 = vsel %vm7219_vm13, 0, %v7218_v27  ;;  %v3140_v37 = vsel %vm3128_vm6, %v3122_v44, %v3139_v7  ;;  %v3133_v49 = vsel %vm3127_vm14, %v3130_v52, %v3132_v50  ;;  %vm11897_vm7 = vweird.f32 %v10397_v21 }
 0x2fd   : > { %v3062_v42 = vsub.s32 32, %v3061_v0  ;;  %v3063_v58 = vshll.u32 %v10657_v33, %v3061_v0  ;;  %v3066_v3 = vsub.s32 4294967266, %v3061_v0  ;;  %v3141_v30 = vsel %vm3127_vm14, %v3138_v35, %v3140_v37 }
 0x2fe   : > { %v10697_v25 = vmul.u32.u64.low %v10652_v51, %v3137_v48  ;;  %v10698_v56 = vmul.u32.u64.high %v10652_v51, %v3137_v48, %v10697_v25  ;;  %v10703_v46 = vmul.u32.u64.low %v10652_v51, %v3141_v30  ;;  %v10704_v36 = vmul.u32.u64.high %v10652_v51, %v3141_v30, %v10703_v46 }
 0x2ff   : > { %v3064_v32 = vshrl.u32 %v10649_v45, %v3062_v42  ;;  %v3067_v28 = vadd.s32 127, %v3066_v3  ;;  %v12098_v44 = vand.u32 2147483647, %v10422_v24  ;;  %v3202_v8 = vshrl.u32 %v3201_v29, 23  ;;  %v10736_v3 = vld [vmem:[#allocation2] ss:$0 sm:$0xff] }
 0x300   : > { %v3149_v27 = vmul.u32 %v10652_v51, %v3133_v49  ;;  %v11901_v45 = vand.u32 2147483647, %v10655_v40  ;;  %v3152_v52 = vadd.s32 1, %v10698_v56  ;;  %v244_v34 = vcvt.s32.f32 %v10670_v11 }
 0x301   : > { %vm10709_vm10 = vcmp.le.f32.partialorder %v12098_v44, 0.7853982  ;;  %v3065_v5 = vor.u32 %v3064_v32, %v3063_v58  ;;  %v3068_v53 = vshll.u32 %v3067_v28, 23  ;;  %v7224_v38 = vadd.s32 4294967169, %v3202_v8 }
 0x302   : > { %v10717_v13 = vsel %vm10709_vm10, 0, %v3077_v20  ;;  %vm2981_vm11 = vcmp.lt.s32.totalorder %v10645_v41, 2  ;;  %vm3151_vm9 = vc.u32 %v10704_v36, %v10697_v25  ;;  %vm2982_vm6 = vcmp.eq.s32.totalorder %v10645_v41, 0 }
 0x303   : > { %v3069_v50 = vor.u32 4788187, %v3068_v53  ;;  %v3072_v61 = vcvt.s32.f32 %v3065_v5  ;;  %vm2985_vm4 = vcmp.eq.s32.totalorder %v10645_v41, 2  ;;  %v3153_v51 = vsel %vm3151_vm9, %v3152_v52, %v10698_v56 }
 0x304   : > { %v10724_v29 = vpop.eup %7669  ;;  %v3208_v20 = vadd.s32 1, %v7224_v38  ;;  %v3083_v35 = vadd.s32 3, %v10717_v13  ;;  %v3154_v7 = vadd.s32 %v3153_v51, %v3149_v27  ;;  %v3205_v58 = vand.u32 8388607, %v11901_v45 }
 0x305   : > { %12101 = vst [vmem:[#allocation96_spill] sm:$0xff] %v10724_v29  ;;  %v10729_v0 = vpop.eup %7671  ;;  %v11898_v11 = vxor.u32 2147483648, %v10724_v29  ;;  %v3070_v48 = vand.u32 2147483647, %v3069_v50  ;;  %v10739_v37 = vmul.f32 %v10736_v3, %v244_v34 }
 0x306   : > { %12102 = vst [vmem:[#allocation97_spill] sm:$0xff] %v10729_v0  ;;  %v11899_v42 = vxor.u32 2147483648, %v10729_v0  ;;  %vm3209_vm14 = vcmp.gt.s32.totalorder %v3208_v20, 0  ;;  %v3155_v56 = vadd.s32 536870912, %v3154_v7  ;;  %v10751_v5 = vand.u32 3, %v3083_v35 }
 0x307   : > { %v2987_v49 = vsel %vm2985_vm4, %v11898_v11, %v10729_v0  ;;  %v3073_v30 = vmul.f32 %v3072_v61, %v3070_v48  ;;  %v3210_v32 = vsel %vm3209_vm14, %v3208_v20, 0  ;;  %v3206_v52 = vor.u32 8388608, %v3205_v58 }
 0x308   : > { %v2984_v28 = vsel %vm2982_vm6, %v10724_v29, %v11899_v42  ;;  %v3212_v46 = vand.u32 31, %v3210_v32  ;;  %v10753_v53 = vshrl.u32 %v3155_v56, 30  ;;  %v3305_v34 = vand.u32 2139095040, %v10739_v37 }
 0x309   : > { %v2988_v44 = vsel %vm2981_vm11, %v2984_v28, %v2987_v49  ;;  %v3074_v8 = vxor.u32 2147483648, %v3073_v30  ;;  %v3150_v28 = vadd.s32 %v10697_v25, %v10704_v36  ;;  %vm3086_vm13 = vcmp.eq.s32.totalorder %v10751_v5, 0 }
 0x30a   : > { %v2989_v27 = vsel %vm11897_vm7, nan, %v2988_v44  ;;  %v3213_v38 = vsub.s32 32, %v3212_v46  ;;  %v3157_v61 = vshll.u32 %v10753_v53, 30  ;;  %v3215_v41 = vshll.u32 %v11963_v47, %v3212_v46 }
 0x30b   : > { %3639 = vst [vmem:[%s8286_s17 + $0xc8] sm:$0xff] %v2989_v27  ;;  %v3075_v50 = vsel %vm2992_vm0, %v3074_v8, %v3073_v30  ;;  %v3218_v51 = vshll.u32 %v11970_v62, %v3212_v46  ;;  %v3221_v58 = vshll.u32 %v11971_v18, %v3212_v46  ;;  %v3211_v30 = vshrl.u32 %v3210_v32, 5 }
 0x30c   : > { %v3078_v20 = vsel %vm10709_vm10, %v10422_v24, %v3075_v50  ;;  %v3216_v48 = vshrl.u32 %v11970_v62, %v3213_v38  ;;  %v3219_v35 = vshrl.u32 %v11971_v18, %v3213_v38  ;;  %v10770_v49 = vsub.s32 %v3154_v7, %v3157_v61 }
 0x30d   : > { %7673 = vcosq.f32 %v3078_v20  ;;  %v3222_v56 = vshrl.u32 %v11959_v14, %v3213_v38  ;;  %v3214_v44 = vshrl.u32 %v11963_v47, %v3213_v38  ;;  %vm3089_vm0 = vcmp.eq.s32.totalorder %v10751_v5, 2 }
 0x30e   : > { %7675 = vsinq.f32 %v3078_v20  ;;  %v3160_v33 = vsub.s32 0, %v10770_v49  ;;  %v3217_v8 = vor.u32 %v3216_v48, %v3215_v41  ;;  %v3220_v27 = vor.u32 %v3219_v35, %v3218_v51 }
 0x30f   : > { %v3224_v50 = vshll.u32 %v11959_v14, %v3212_v46  ;;  %v3223_v7 = vor.u32 %v3222_v56, %v3221_v58  ;;  %v3225_v32 = vshrl.u32 %v11961_v23, %v3213_v38  ;;  %v3227_v61 = vshll.u32 %v11961_v23, %v3212_v46 }
 0x310   : > { %v3228_v20 = vshrl.u32 %v11962_v60, %v3213_v38  ;;  %vm3085_vm10 = vcmp.lt.s32.totalorder %v10751_v5, 2  ;;  %vm3096_vm11 = vcmp.lt.s32.totalorder %v10537_v26, 0  ;;  %v7221_v25 = vmin.u32 %v3160_v33, %v10770_v49 }
 0x311   : > { %vm3230_vm9 = vcmp.lt.s32.totalorder %v3211_v30, 1  ;;  %v3246_v36 = vshll.u32 %v3206_v52, 8  ;;  %v3306_v41 = vshrl.u32 %v3305_v34, 23  ;;  %vm11920_vm6 = vweird.f32 %v10422_v24 }
 0x312   : > { %v3226_v51 = vor.u32 %v3225_v32, %v3224_v50  ;;  %v3229_v48 = vor.u32 %v3228_v20, %v3227_v61  ;;  %vm3232_vm4 = vcmp.lt.s32.totalorder %v3211_v30, 3  ;;  %vm3233_vm14 = vcmp.lt.s32.totalorder %v3211_v30, 4 }
 0x313   : > { %v3162_v35 = vclz %v7221_v25  ;;  %v3180_v46 = vsub.s32 4, %v10753_v53  ;;  %vm3231_vm7 = vcmp.lt.s32.totalorder %v3211_v30, 2  ;;  %v3234_v38 = vsel %vm3230_vm9, %v3214_v44, %v3217_v8 }
 0x314   : > { %v3235_v58 = vsel %vm3233_vm14, %v3223_v7, 2102212464  ;;  %v3238_v56 = vsel %vm3230_vm9, %v3217_v8, %v3220_v27  ;;  %v3239_v11 = vsel %vm3233_vm14, %v3226_v51, 920167782  ;;  %v3242_v42 = vsel %vm3230_vm9, %v3220_v27, %v3223_v7 }
 0x315   : > { %v12103_v33 = vand.u32 2147483647, %v10537_v26  ;;  %v7222_v34 = vadd.s32 4294967294, %v3162_v35  ;;  %v3236_v50 = vsel %vm3232_vm4, %v3220_v27, %v3235_v58  ;;  %v3240_v32 = vsel %vm3232_vm4, %v3223_v7, %v3239_v11 }
 0x316   : > { %v3243_v61 = vsel %vm3233_vm14, %v3229_v48, 1326507024  ;;  %v3237_v20 = vsel %vm3231_vm7, %v3234_v38, %v3236_v50  ;;  %v3241_v44 = vsel %vm3231_vm7, %v3238_v56, %v3240_v32  ;;  %v7228_v25 = vadd.s32 4294967169, %v3306_v41 }
 0x317   : > { %vm10790_vm2 = vcmp.le.f32.partialorder %v12103_v33, 0.7853982  ;;  %v3244_v8 = vsel %vm3232_vm4, %v3226_v51, %v3243_v61  ;;  %v10799_v45 = vpop.eup %7673  ;;  %vm7223_vm9 = vcmp.lt.s32.totalorder %v7222_v34, 0  ;;  %v3181_v30 = vsel %vm3096_vm11, %v3180_v46, %v10753_v53 }
 0x318   : > { %12106 = vst [vmem:[#allocation98_spill] sm:$0xff] %v10799_v45  ;;  %v3245_v33 = vsel %vm3231_vm7, %v3242_v42, %v3244_v8  ;;  %v10802_v21 = vmul.u32.u64.low %v3246_v36, %v3241_v44  ;;  %v10803_v29 = vmul.u32.u64.high %v3246_v36, %v3241_v44, %v10802_v21  ;;  %v10806_v27 = vpop.eup %7675  ;;  %v11905_v11 = vxor.u32 2147483648, %v10799_v45 }
 0x319   : > { %12107 = vst [vmem:[#allocation99_spill] sm:$0xff] %v10806_v27  ;;  %v3165_v7 = vsel %vm7223_vm9, 0, %v7222_v34  ;;  %v10809_v48 = vmul.u32.u64.low %v3246_v36, %v3245_v33  ;;  %v10810_v35 = vmul.u32.u64.high %v3246_v36, %v3245_v33, %v10809_v48  ;;  %v11906_v51 = vxor.u32 2147483648, %v10806_v27 }
 0x31a   : > { %v3166_v41 = vsub.s32 32, %v3165_v7  ;;  %v3167_v38 = vshll.u32 %v10770_v49, %v3165_v7  ;;  %v3170_v58 = vsub.s32 4294967266, %v3165_v7  ;;  %v3091_v42 = vsel %vm3089_vm0, %v11905_v11, %v10806_v27 }
 0x31b   : > { %v3253_v56 = vmul.u32 %v3246_v36, %v3237_v20  ;;  %v3312_v34 = vadd.s32 1, %v7228_v25  ;;  %v3088_v49 = vsel %vm3086_vm13, %v10799_v45, %v11906_v51  ;;  %v3256_v61 = vadd.s32 1, %v10803_v29 }
 0x31c   : > { %v3168_v50 = vshrl.u32 %v3150_v28, %v3166_v41  ;;  %v3171_v32 = vadd.s32 127, %v3170_v58  ;;  %v3092_v44 = vsel %vm3085_vm10, %v3088_v49, %v3091_v42  ;;  %vm3255_vm7 = vc.u32 %v10810_v35, %v10802_v21 }
 0x31d   : > { %v11907_v53 = vand.u32 2147483647, %v10739_v37  ;;  %vm3313_vm0 = vcmp.gt.s32.totalorder %v3312_v34, 0  ;;  %v3093_v36 = vsel %vm11920_vm6, nan, %v3092_v44  ;;  %v3257_v8 = vsel %vm3255_vm7, %v3256_v61, %v10803_v29 }
 0x31e   : > { %v3169_v46 = vor.u32 %v3168_v50, %v3167_v38  ;;  %v3172_v20 = vshll.u32 %v3171_v32, 23  ;;  %3640 = vst [vmem:[%s8286_s17 + $0xd0] sm:$0xff] %v3093_v36  ;;  %v10839_v28 = vsel %vm10790_vm2, 0, %v3181_v30  ;;  %v3258_v5 = vadd.s32 %v3257_v8, %v3253_v56 }
 0x31f   : > { %12108 = vst [vmem:[#allocation100_spill] sm:$0xff] %v10839_v28  ;;  %v3314_v25 = vsel %vm3313_vm0, %v3312_v34, 0  ;;  %v180_v58 = vadd.s32 240, %v7942_v2  ;;  %v3187_v49 = vadd.s32 3, %v10839_v28  ;;  %v3309_v38 = vand.u32 8388607, %v11907_v53 }
 0x320   : > { %v3173_v33 = vor.u32 4788187, %v3172_v20  ;;  %v3176_v7 = vcvt.s32.f32 %v3169_v46  ;;  %v3316_v48 = vand.u32 31, %v3314_v25  ;;  %v3259_v41 = vadd.s32 536870912, %v3258_v5 }
 0x321   : > { %v3315_v32 = vshrl.u32 %v3314_v25, 5  ;;  %v3310_v53 = vor.u32 8388608, %v3309_v38  ;;  %vm3200_vm13 = vcmp.lt.s32.totalorder %v10655_v40, 0  ;;  %v213_v38 = vadd.s32 %v7940_v1, %v180_v58 }
 0x322   : > { %v3174_v42 = vand.u32 2147483647, %v3173_v33  ;;  %v3317_v29 = vsub.s32 32, %v3316_v48  ;;  %v10845_v50 = vshrl.u32 %v3259_v41, 30  ;;  %v3319_v30 = vshll.u32 %v11963_v47, %v3316_v48 }
 0x323   : > { %v3322_v56 = vshll.u32 %v11970_v62, %v3316_v48  ;;  %v3328_v36 = vshll.u32 %v11959_v14, %v3316_v48  ;;  %v3325_v20 = vshll.u32 %v11971_v18, %v3316_v48  ;;  %v3331_v41 = vshll.u32 %v11961_v23, %v3316_v48 }
 0x324   : > { %v3177_v34 = vmul.f32 %v3176_v7, %v3174_v42  ;;  %v3320_v61 = vshrl.u32 %v11970_v62, %v3317_v29  ;;  %v3323_v44 = vshrl.u32 %v11971_v18, %v3317_v29  ;;  %v3261_v46 = vshll.u32 %v10845_v50, 30 }
 0x325   : > { %v3326_v8 = vshrl.u32 %v11959_v14, %v3317_v29  ;;  %v3329_v33 = vshrl.u32 %v11961_v23, %v3317_v29  ;;  %v3332_v11 = vshrl.u32 %v11962_v60, %v3317_v29  ;;  %v181_v7 = vadd.s32 248, %v7942_v2 }
 0x326   : > { %v3178_v25 = vxor.u32 2147483648, %v3177_v34  ;;  %v10859_v42 = vand.u32 3, %v3187_v49  ;;  %v10861_v51 = vsub.s32 %v3258_v5, %v3261_v46  ;;  %v3318_v24 = vshrl.u32 %v11963_v47, %v3317_v29 }
 0x327   : > { %v3321_v27 = vor.u32 %v3320_v61, %v3319_v30  ;;  %v3324_v0 = vor.u32 %v3323_v44, %v3322_v56  ;;  %v3330_v28 = vor.u32 %v3329_v33, %v3328_v36  ;;  %v3327_v49 = vor.u32 %v3326_v8, %v3325_v20 }
 0x328   : > { %v3179_v45 = vsel %vm3096_vm11, %v3178_v25, %v3177_v34  ;;  %v3264_v2 = vsub.s32 0, %v10861_v51  ;;  %vm3334_vm10 = vcmp.lt.s32.totalorder %v3315_v32, 1  ;;  %v3333_v5 = vor.u32 %v3332_v11, %v3331_v41 }
 0x329   : > { %v3182_v48 = vsel %vm10790_vm2, %v10537_v26, %v3179_v45  ;;  %vm3337_vm4 = vcmp.lt.s32.totalorder %v3315_v32, 4  ;;  %vm3336_vm11 = vcmp.lt.s32.totalorder %v3315_v32, 3  ;;  %v12109_v52 = vand.u32 2147483647, %v10655_v40 }
 0x32a   : > { %7677 = vcosq.f32 %v3182_v48  ;;  %v7225_v29 = vmin.u32 %v3264_v2, %v10861_v51  ;;  %v3339_v30 = vsel %vm3337_vm4, %v3327_v49, 2102212464  ;;  %vm3335_vm14 = vcmp.lt.s32.totalorder %v3315_v32, 2 }
 0x32b   : > { %7679 = vsinq.f32 %v3182_v48  ;;  %vm10876_vm2 = vcmp.le.f32.partialorder %v12109_v52, 0.7853982  ;;  %v3342_v56 = vsel %vm3334_vm10, %v3321_v27, %v3324_v0  ;;  %v3343_v11 = vsel %vm3337_vm4, %v3330_v28, 920167782 }
 0x32c   : > { %v3350_v34 = vshll.u32 %v3310_v53, 8  ;;  %vm3190_vm9 = vcmp.eq.s32.totalorder %v10859_v42, 0  ;;  %v3266_v58 = vclz %v7225_v29  ;;  %v3284_v61 = vsub.s32 4, %v10845_v50 }
 0x32d   : > { %v3338_v44 = vsel %vm3334_vm10, %v3318_v24, %v3321_v27  ;;  %v3346_v36 = vsel %vm3334_vm10, %v3324_v0, %v3327_v49  ;;  %vm3189_vm7 = vcmp.lt.s32.totalorder %v10859_v42, 2  ;;  %v3340_v46 = vsel %vm3336_vm11, %v3324_v0, %v3339_v30 }
 0x32e   : > { %v3344_v20 = vsel %vm3336_vm11, %v3327_v49, %v3343_v11  ;;  %v3347_v8 = vsel %vm3337_vm4, %v3333_v5, 1326507024  ;;  %v245_v33 = vcvt.s32.f32 %v213_v38  ;;  %vm11919_vm0 = vweird.f32 %v10537_v26 }
 0x32f   : > { %v3254_v53 = vadd.s32 %v10802_v21, %v10810_v35  ;;  %v7226_v25 = vadd.s32 4294967294, %v3266_v58  ;;  %v3345_v41 = vsel %vm3335_vm14, %v3342_v56, %v3344_v20  ;;  %v3348_v24 = vsel %vm3336_vm11, %v3330_v28, %v3347_v8 }
 0x330   : > { %v3349_v27 = vsel %vm3335_vm14, %v3346_v36, %v3348_v24  ;;  %v10896_v48 = vmul.u32.u64.low %v3350_v34, %v3345_v41  ;;  %v10897_v2 = vmul.u32.u64.high %v3350_v34, %v3345_v41, %v10896_v48  ;;  %v10900_v0 = vmul.f32 %v10736_v3, %v245_v33 }
 0x331   : > { %vm7227_vm10 = vcmp.lt.s32.totalorder %v7226_v25, 0  ;;  %v3341_v49 = vsel %vm3335_vm14, %v3338_v44, %v3340_v46  ;;  %v10903_v5 = vmul.u32.u64.low %v3350_v34, %v3349_v27  ;;  %v10904_v38 = vmul.u32.u64.high %v3350_v34, %v3349_v27, %v10903_v5 }
 0x332   : > { %v3269_v21 = vsel %vm7227_vm10, 0, %v7226_v25  ;;  %v3285_v35 = vsel %vm3200_vm13, %v3284_v61, %v10845_v50  ;;  %v11918_v28 = vand.u32 2147483647, %v10900_v0  ;;  %v3409_v29 = vand.u32 2139095040, %v10900_v0 }
 0x333   : > { %vm3193_vm4 = vcmp.eq.s32.totalorder %v10859_v42, 2  ;;  %v3270_v30 = vsub.s32 32, %v3269_v21  ;;  %v3271_v52 = vshll.u32 %v10861_v51, %v3269_v21  ;;  %v3274_v56 = vsub.s32 4294967266, %v3269_v21 }
 0x334   : > { %v10913_v32 = vpop.eup %7677  ;;  %v3357_v11 = vmul.u32 %v3350_v34, %v3341_v49  ;;  %v3360_v58 = vadd.s32 1, %v10897_v2  ;;  %v3410_v44 = vshrl.u32 %v3409_v29, 23  ;;  %v214_v36 = vadd.s32 %v7940_v1, %v181_v7 }
 0x335   : > { %v10917_v46 = vpop.eup %7679  ;;  %v11916_v50 = vxor.u32 2147483648, %v10913_v32  ;;  %v3272_v61 = vshrl.u32 %v3254_v53, %v3270_v30  ;;  %v3275_v20 = vadd.s32 127, %v3274_v56  ;;  %v10922_v8 = vsel %vm10876_vm2, 0, %v3285_v35 }
 0x336   : > { %v11917_v51 = vxor.u32 2147483648, %v10917_v46  ;;  %vm3359_vm11 = vc.u32 %v10904_v38, %v10896_v48  ;;  %v7232_v34 = vadd.s32 4294967169, %v3410_v44  ;;  %v3413_v33 = vand.u32 8388607, %v11918_v28 }
 0x337   : > { %v3195_v1 = vsel %vm3193_vm4, %v11916_v50, %v10917_v46  ;;  %v3273_v7 = vor.u32 %v3272_v61, %v3271_v52  ;;  %v3276_v53 = vshll.u32 %v3275_v20, 23  ;;  %v3361_v25 = vsel %vm3359_vm11, %v3360_v58, %v10897_v2 }
 0x338   : > { %v3192_v41 = vsel %vm3190_vm9, %v10913_v32, %v11917_v51  ;;  %v3291_v24 = vadd.s32 3, %v10922_v8  ;;  %v3362_v27 = vadd.s32 %v3361_v25, %v3357_v11  ;;  %v3416_v49 = vadd.s32 1, %v7232_v34 }
 0x339   : > { %v3196_v5 = vsel %vm3189_vm7, %v3192_v41, %v3195_v1  ;;  %v3277_v21 = vor.u32 4788187, %v3276_v53  ;;  %v3280_v35 = vcvt.s32.f32 %v3273_v7  ;;  %v246_v29 = vcvt.s32.f32 %v214_v36 }
 0x33a   : > { %v3197_v30 = vsel %vm11919_vm0, nan, %v3196_v5  ;;  %v3363_v2 = vadd.s32 536870912, %v3362_v27  ;;  %v3414_v52 = vor.u32 8388608, %v3413_v33  ;;  %vm3417_vm14 = vcmp.gt.s32.totalorder %v3416_v49, 0 }
 0x33b   : > { %3641 = vst [vmem:[%s8286_s17 + $0xd8] sm:$0xff] %v3197_v30  ;;  %v3278_v56 = vand.u32 2147483647, %v3277_v21  ;;  %v3418_v58 = vsel %vm3417_vm14, %v3416_v49, 0  ;;  %v10945_v11 = vand.u32 3, %v3291_v24  ;;  %vm3304_vm9 = vcmp.lt.s32.totalorder %v10739_v37, 0 }
 0x33c   : > { %v3364_v44 = vshrl.u32 %v3363_v2, 30  ;;  %v3420_v61 = vand.u32 31, %v3418_v58  ;;  %v10949_v42 = vmul.f32 %v10736_v3, %v246_v29  ;;  %v10952_v36 = vand.u32 3, %v8135_v4 }
 0x33d   : > { %v3281_v20 = vmul.f32 %v3280_v35, %v3278_v56  ;;  %v10955_v34 = vadd.s32 %v10896_v48, %v10904_v38  ;;  %v10957_v7 = vshll.u32 %v3414_v52, 8  ;;  %v3419_v25 = vshrl.u32 %v3418_v58, 5 }
 0x33e   : > { %v3365_v33 = vshll.u32 %v3364_v44, 30  ;;  %v3421_v1 = vsub.s32 32, %v3420_v61  ;;  %v3423_v41 = vshll.u32 %v11963_v47, %v3420_v61  ;;  %v3510_v24 = vand.u32 2147483647, %v10949_v42 }
 0x33f   : > { %v3282_v53 = vxor.u32 2147483648, %v3281_v20  ;;  %v3426_v4 = vshll.u32 %v11970_v62, %v3420_v61  ;;  %v3429_v5 = vshll.u32 %v11971_v18, %v3420_v61  ;;  %v12112_v38 = vand.u32 2147483647, %v10739_v37 }
 0x340   : > { %v10961_v49 = vsub.s32 %v3362_v27, %v3365_v33  ;;  %v3424_v3 = vshrl.u32 %v11970_v62, %v3421_v1  ;;  %v3427_v35 = vshrl.u32 %v11971_v18, %v3421_v1  ;;  %v3430_v27 = vshrl.u32 %v11959_v14, %v3421_v1 }
 0x341   : > { %v3283_v48 = vsel %vm3200_vm13, %v3282_v53, %v3281_v20  ;;  %vm10970_vm7 = vcmp.le.f32.partialorder %v12112_v38, 0.7853982  ;;  %v3432_v29 = vshll.u32 %v11959_v14, %v3420_v61  ;;  %v3388_v52 = vsub.s32 4, %v3364_v44 }
 0x342   : > { %v3286_v30 = vsel %vm10876_vm2, %v10655_v40, %v3283_v48  ;;  %v3368_v2 = vsub.s32 0, %v10961_v49  ;;  %v3513_v56 = vand.u32 2139095040, %v10949_v42  ;;  %v3422_v58 = vshrl.u32 %v11963_v47, %v3421_v1 }
 0x343   : > { %7681 = vcosq.f32 %v3286_v30  ;;  %v3425_v20 = vor.u32 %v3424_v3, %v3423_v41  ;;  %v3433_v33 = vshrl.u32 %v11961_v23, %v3421_v1  ;;  %v3428_v38 = vor.u32 %v3427_v35, %v3426_v4 }
 0x344   : > { %7683 = vsinq.f32 %v3286_v30  ;;  %v7229_v53 = vmin.u32 %v3368_v2, %v10961_v49  ;;  %v3435_v50 = vshll.u32 %v11961_v23, %v3420_v61  ;;  %vm3297_vm13 = vcmp.eq.s32.totalorder %v10945_v11, 2 }
 0x345   : > { %v3431_v45 = vor.u32 %v3430_v27, %v3429_v5  ;;  %v3434_v48 = vor.u32 %v3433_v33, %v3432_v29  ;;  %v3436_v51 = vshrl.u32 %v11962_v60, %v3421_v1  ;;  %vm3438_vm2 = vcmp.lt.s32.totalorder %v3419_v25, 1 }
 0x346   : > { %vm3294_vm10 = vcmp.eq.s32.totalorder %v10945_v11, 0  ;;  %v3370_v28 = vclz %v7229_v53  ;;  %v3389_v41 = vsel %vm3304_vm9, %v3388_v52, %v3364_v44  ;;  %vm3439_vm4 = vcmp.lt.s32.totalorder %v3419_v25, 2 }
 0x347   : > { %v10993_v3 = vand.u32 8388607, %v3510_v24  ;;  %vm3293_vm11 = vcmp.lt.s32.totalorder %v10945_v11, 2  ;;  %v3437_v61 = vor.u32 %v3436_v51, %v3435_v50  ;;  %vm3440_vm14 = vcmp.lt.s32.totalorder %v3419_v25, 3 }
 0x348   : > { %vm3441_vm0 = vcmp.lt.s32.totalorder %v3419_v25, 4  ;;  %v3442_v4 = vsel %vm3438_vm2, %v3422_v58, %v3425_v20  ;;  %vm11923_vm6 = vweird.f32 %v10655_v40  ;;  %v7230_v1 = vadd.s32 4294967294, %v3370_v28 }
 0x349   : > { %v3443_v5 = vsel %vm3441_vm0, %v3431_v45, 2102212464  ;;  %v3446_v35 = vsel %vm3438_vm2, %v3425_v20, %v3428_v38  ;;  %v3447_v27 = vsel %vm3441_vm0, %v3434_v48, 920167782  ;;  %v3450_v30 = vsel %vm3438_vm2, %v3428_v38, %v3431_v45 }
 0x34a   : > { %v3444_v44 = vsel %vm3440_vm14, %v3428_v38, %v3443_v5  ;;  %v3448_v29 = vsel %vm3440_vm14, %v3431_v45, %v3447_v27  ;;  %v3451_v2 = vsel %vm3441_vm0, %v3437_v61, 1326507024  ;;  %vm7231_vm8 = vcmp.lt.s32.totalorder %v7230_v1, 0 }
 0x34b   : > { %v11002_v50 = vsel %vm10970_vm7, 0, %v3389_v41  ;;  %v3449_v51 = vsel %vm3439_vm4, %v3446_v35, %v3448_v29  ;;  %v3452_v52 = vsel %vm3440_vm14, %v3434_v48, %v3451_v2  ;;  %vm3740_vm1 = vcmp.lt.s32.totalorder %v10952_v36, 2 }
 0x34c   : > { %v3373_v28 = vsel %vm7231_vm8, 0, %v7230_v1  ;;  %v3453_v58 = vsel %vm3439_vm4, %v3450_v30, %v3452_v52  ;;  %v11008_v20 = vmul.u32.u64.low %v10957_v7, %v3449_v51  ;;  %v11009_v33 = vmul.u32.u64.high %v10957_v7, %v3449_v51, %v11008_v20 }
 0x34d   : > { %v3374_v53 = vsub.s32 32, %v3373_v28  ;;  %v3375_v38 = vshll.u32 %v10961_v49, %v3373_v28  ;;  %v3378_v45 = vsub.s32 4294967266, %v3373_v28  ;;  %v3445_v41 = vsel %vm3439_vm4, %v3442_v4, %v3444_v44  ;;  %v11014_v61 = vpop.eup %7681 }
 0x34e   : > { %v3395_v48 = vadd.s32 3, %v11002_v50  ;;  %v11018_v5 = vmul.u32.u64.low %v10957_v7, %v3453_v58  ;;  %v11019_v1 = vmul.u32.u64.high %v10957_v7, %v3453_v58, %v11018_v5  ;;  %v3514_v35 = vshrl.u32 %v3513_v56, 23  ;;  %v11021_v27 = vpop.eup %7683 }
 0x34f   : > { %v3298_v29 = vxor.u32 2147483648, %v11014_v61  ;;  %v3376_v30 = vshrl.u32 %v10955_v34, %v3374_v53  ;;  %v3379_v2 = vadd.s32 127, %v3378_v45  ;;  %vm3741_vm8 = vcmp.eq.s32.totalorder %v10952_v36, 0 }
 0x350   : > { %v3295_v25 = vxor.u32 2147483648, %v11021_v27  ;;  %v3461_v49 = vmul.u32 %v10957_v7, %v3445_v41  ;;  %v3464_v4 = vadd.s32 1, %v11009_v33  ;;  %v7236_v44 = vadd.s32 4294967169, %v3514_v35 }
 0x351   : > { %v3299_v56 = vsel %vm3297_vm13, %v3298_v29, %v11021_v27  ;;  %v3377_v51 = vor.u32 %v3376_v30, %v3375_v38  ;;  %v3380_v52 = vshll.u32 %v3379_v2, 23  ;;  %v3518_v34 = vor.u32 8388608, %v10993_v3 }
 0x352   : > { %v3296_v7 = vsel %vm3294_vm10, %v11014_v61, %v3295_v25  ;;  %vm3463_vm0 = vc.u32 %v11019_v1, %v11008_v20  ;;  %v3520_v28 = vadd.s32 1, %v7236_v44  ;;  %v12115_v58 = vxor.u32 2147483648, %v8231_v57 }
 0x353   : > { %v3300_v38 = vsel %vm3293_vm11, %v3296_v7, %v3299_v56  ;;  %v3381_v45 = vor.u32 4788187, %v3380_v52  ;;  %v3384_v41 = vcvt.s32.f32 %v3377_v51  ;;  %vm3408_vm13 = vcmp.lt.s32.totalorder %v10900_v0, 0 }
 0x354   : > { %v3743_v53 = vsel %vm3741_vm8, %v8223_v55, %v12115_v58  ;;  %v3465_v3 = vsel %vm3463_vm0, %v3464_v4, %v11009_v33  ;;  %v3301_v5 = vsel %vm11923_vm6, nan, %v3300_v38  ;;  %vm3521_vm2 = vcmp.gt.s32.totalorder %v3520_v28, 0 }
 0x355   : > { %v3466_v35 = vadd.s32 %v3465_v3, %v3461_v49  ;;  %vm3744_vm10 = vcmp.eq.s32.totalorder %v10952_v36, 2  ;;  %3642 = vst [vmem:[%s8286_s17 + $0xe0] sm:$0xff] %v3301_v5  ;;  %v3382_v30 = vand.u32 2147483647, %v3381_v45  ;;  %v12116_v2 = vand.u32 2147483647, %v10900_v0 }
 0x356   : > { %v3522_v44 = vsel %vm3521_vm2, %v3520_v28, 0  ;;  %v12119_v33 = vxor.u32 2147483648, %v8223_v55  ;;  %v11062_v56 = vand.u32 3, %v3395_v48  ;;  %v11066_v58 = vshll.u32 %v3518_v34, 8 }
 0x357   : > { %vm11055_vm4 = vcmp.le.f32.partialorder %v12116_v2, 0.7853982  ;;  %v3467_v49 = vadd.s32 536870912, %v3466_v35  ;;  %v3524_v51 = vand.u32 31, %v3522_v44  ;;  %v3385_v7 = vmul.f32 %v3384_v41, %v3382_v30 }
 0x358   : > { %v3746_v4 = vsel %vm3744_vm10, %v12119_v33, %v8231_v57  ;;  %v11071_v45 = vand.u32 3, %v8179_v19  ;;  %v3523_v3 = vshrl.u32 %v3522_v44, 5  ;;  %vm3397_vm8 = vcmp.lt.s32.totalorder %v11062_v56, 2 }
 0x359   : > { %v3747_v52 = vsel %vm3740_vm1, %v3743_v53, %v3746_v4  ;;  %v3468_v28 = vshrl.u32 %v3467_v49, 30  ;;  %v3525_v55 = vsub.s32 32, %v3524_v51  ;;  %v3527_v57 = vshll.u32 %v11963_v47, %v3524_v51 }
 0x35a   : > { %v3748_v38 = vsel %vm378_vm12, nan, %v3747_v52  ;;  %v3386_v36 = vxor.u32 2147483648, %v3385_v7  ;;  %v3530_v48 = vshll.u32 %v11970_v62, %v3524_v51  ;;  %v3533_v34 = vshll.u32 %v11971_v18, %v3524_v51 }
 0x35b   : > { %6942 = vst [vmem:[%s11076_s21] sm:$0xff] %v3748_v38  ;;  %v3536_v10 = vshll.u32 %v11959_v14, %v3524_v51  ;;  %v3469_v53 = vshll.u32 %v3468_v28, 30  ;;  %v3492_v19 = vsub.s32 4, %v3468_v28  ;;  %v3528_v41 = vshrl.u32 %v11970_v62, %v3525_v55 }
 0x35c   : > { %v3539_v5 = vshll.u32 %v11961_v23, %v3524_v51  ;;  %v3387_v30 = vsel %vm3304_vm9, %v3386_v36, %v3385_v7  ;;  %v3531_v2 = vshrl.u32 %v11971_v18, %v3525_v55  ;;  %v3534_v44 = vshrl.u32 %v11959_v14, %v3525_v55 }
 0x35d   : > { %v3537_v33 = vshrl.u32 %v11961_v23, %v3525_v55  ;;  %v3390_v4 = vsel %vm10970_vm7, %v10739_v37, %v3387_v30  ;;  %v11092_v49 = vsub.s32 %v3466_v35, %v3469_v53  ;;  %v3493_v62 = vsel %vm3408_vm13, %v3492_v19, %v3468_v28 }
 0x35e   : > { %v3526_v51 = vshrl.u32 %v11963_v47, %v3525_v55  ;;  %7685 = vcosq.f32 %v3390_v4  ;;  %v11099_v52 = vsel %vm11055_vm4, 0, %v3493_v62  ;;  %v3529_v18 = vor.u32 %v3528_v41, %v3527_v57 }
 0x35f   : > { %v3532_v14 = vor.u32 %v3531_v2, %v3530_v48  ;;  %7687 = vsinq.f32 %v3390_v4  ;;  %v3472_v23 = vsub.s32 0, %v11092_v49  ;;  %v3535_v7 = vor.u32 %v3534_v44, %v3533_v34 }
 0x360   : > { %v3538_v21 = vor.u32 %v3537_v33, %v3536_v10  ;;  %vm3401_vm12 = vcmp.eq.s32.totalorder %v11062_v56, 2  ;;  %v3499_v35 = vadd.s32 3, %v11099_v52  ;;  %v3540_v38 = vshrl.u32 %v11962_v60, %v3525_v55 }
 0x361   : > { %vm3542_vm1 = vcmp.lt.s32.totalorder %v3523_v3, 1  ;;  %vm3543_vm9 = vcmp.lt.s32.totalorder %v3523_v3, 2  ;;  %vm3398_vm7 = vcmp.eq.s32.totalorder %v11062_v56, 0  ;;  %v7233_v47 = vmin.u32 %v3472_v23, %v11092_v49 }
 0x362   : > { %vm3544_vm11 = vcmp.lt.s32.totalorder %v3523_v3, 3  ;;  %vm3545_vm14 = vcmp.lt.s32.totalorder %v3523_v3, 4  ;;  %v3546_v28 = vsel %vm3542_vm1, %v3526_v51, %v3529_v18  ;;  %v3541_v57 = vor.u32 %v3540_v38, %v3539_v5 }
 0x363   : > { %v3547_v36 = vsel %vm3545_vm14, %v3535_v7, 2102212464  ;;  %v3550_v48 = vsel %vm3542_vm1, %v3529_v18, %v3532_v14  ;;  %v3551_v34 = vsel %vm3545_vm14, %v3538_v21, 920167782  ;;  %vm3394_vm0 = vweird.f32 %v10739_v37 }
 0x364   : > { %v3462_v60 = vadd.s32 %v11008_v20, %v11019_v1  ;;  %v3474_v55 = vclz %v7233_v47  ;;  %vm3843_vm2 = vcmp.lt.s32.totalorder %v11071_v45, 2  ;;  %vm3844_vm10 = vcmp.eq.s32.totalorder %v11071_v45, 0 }
 0x365   : > { %v3548_v10 = vsel %vm3544_vm11, %v3532_v14, %v3547_v36  ;;  %v3552_v53 = vsel %vm3544_vm11, %v3535_v7, %v3551_v34  ;;  %v3554_v19 = vsel %vm3542_vm1, %v3532_v14, %v3535_v7  ;;  %v3555_v41 = vsel %vm3545_vm14, %v3541_v57, 1326507024 }
 0x366   : > { %v7234_v5 = vadd.s32 4294967294, %v3474_v55  ;;  %v3549_v30 = vsel %vm3543_vm9, %v3546_v28, %v3548_v10  ;;  %v3553_v2 = vsel %vm3543_vm9, %v3550_v48, %v3552_v53  ;;  %v3556_v44 = vsel %vm3544_vm11, %v3538_v21, %v3555_v41 }
 0x367   : > { %v11121_v20 = vand.u32 3, %v3499_v35  ;;  %v3557_v1 = vsel %vm3543_vm9, %v3554_v19, %v3556_v44  ;;  %v11125_v33 = vmul.u32.u64.low %v11066_v58, %v3553_v2  ;;  %v11126_v4 = vmul.u32.u64.high %v11066_v58, %v3553_v2, %v11125_v33 }
 0x368   : > { %vm7235_vm6 = vcmp.lt.s32.totalorder %v7234_v5, 0  ;;  %v11130_v62 = vmul.u32.u64.low %v11066_v58, %v3557_v1  ;;  %v11131_v51 = vmul.u32.u64.high %v11066_v58, %v3557_v1, %v11130_v62  ;;  %v3565_v18 = vmul.u32 %v11066_v58, %v3549_v30  ;;  %v11134_v14 = vpop.eup %7685 }
 0x369   : > { %v3477_v23 = vsel %vm7235_vm6, 0, %v7234_v5  ;;  %v12120_v7 = vxor.u32 2147483648, %v8307_v63  ;;  %vm3847_vm1 = vcmp.eq.s32.totalorder %v11071_v45, 2  ;;  %v3945_v21 = vand.u32 3, %v8327_v43  ;;  %v11143_v35 = vpop.eup %7687 }
 0x36a   : > { %v3402_v38 = vxor.u32 2147483648, %v11134_v14  ;;  %v3478_v47 = vsub.s32 32, %v3477_v23  ;;  %v3479_v58 = vshll.u32 %v11092_v49, %v3477_v23  ;;  %v3482_v28 = vsub.s32 4294967266, %v3477_v23 }
 0x36b   : > { %v3846_v3 = vsel %vm3844_vm10, %v8302_v59, %v12120_v7  ;;  %v3399_v57 = vxor.u32 2147483648, %v11143_v35  ;;  %v3568_v36 = vadd.s32 1, %v11126_v4  ;;  %v12121_v48 = vxor.u32 2147483648, %v8302_v59 }
 0x36c   : > { %v4048_v55 = vand.u32 3, %v8409_v54  ;;  %v3403_v43 = vsel %vm3401_vm12, %v3402_v38, %v11143_v35  ;;  %v3480_v10 = vshrl.u32 %v3462_v60, %v3478_v47  ;;  %v3483_v53 = vadd.s32 127, %v3482_v28 }
 0x36d   : > { %v3849_v34 = vsel %vm3847_vm1, %v12121_v48, %v8307_v63  ;;  %vm3946_vm6 = vcmp.lt.s32.totalorder %v3945_v21, 2  ;;  %v3400_v49 = vsel %vm3398_vm7, %v11134_v14, %v3399_v57  ;;  %vm3567_vm9 = vc.u32 %v11131_v51, %v11125_v33 }
 0x36e   : > { %v3850_v59 = vsel %vm3843_vm2, %v3846_v3, %v3849_v34  ;;  %vm3947_vm11 = vcmp.eq.s32.totalorder %v3945_v21, 0  ;;  %v3404_v63 = vsel %vm3397_vm8, %v3400_v49, %v3403_v43  ;;  %v3481_v54 = vor.u32 %v3480_v10, %v3479_v58  ;;  %v12131_v10 = vld [vmem:[#allocation24_spill] sm:$0xff] }
 0x36f   : > { %v3484_v60 = vshll.u32 %v3483_v53, 23  ;;  %vm3512_vm12 = vcmp.lt.s32.totalorder %v10949_v42, 0  ;;  %v3569_v19 = vsel %vm3567_vm9, %v3568_v36, %v11126_v4  ;;  %v3405_v41 = vsel %vm3394_vm0, nan, %v3404_v63  ;;  %v12134_v63 = vld [vmem:[#allocation17_spill] sm:$0xff] }
 0x370   : > { %vm11175_vm7 = vcmp.le.f32.partialorder %v3510_v24, 0.7853982  ;;  %v3570_v45 = vadd.s32 %v3569_v19, %v3565_v18  ;;  %v3851_v56 = vsel %vm482_vm3, nan, %v3850_v59  ;;  %v12124_v30 = vxor.u32 2147483648, %v8393_v22  ;;  %3643 = vst [vmem:[%s8286_s17 + $0xe8] sm:$0xff] %v3405_v41 }
 0x371   : > { %v3485_v44 = vor.u32 4788187, %v3484_v60  ;;  %v3488_v1 = vcvt.s32.f32 %v3481_v54  ;;  %6943 = vst [vmem:[%s11076_s21 + $0x8] sm:$0xff] %v3851_v56  ;;  %vm3950_vm14 = vcmp.eq.s32.totalorder %v3945_v21, 2  ;;  %vm4049_vm8 = vcmp.lt.s32.totalorder %v4048_v55, 2 }
 0x372   : > { %v3949_v2 = vsel %vm3947_vm11, %v8386_v12, %v12124_v30  ;;  %v3571_v4 = vadd.s32 536870912, %v3570_v45  ;;  %v12125_v24 = vxor.u32 2147483648, %v8386_v12  ;;  %vm4050_vm2 = vcmp.eq.s32.totalorder %v4048_v55, 0 }
 0x373   : > { %vm4053_vm10 = vcmp.eq.s32.totalorder %v4048_v55, 2  ;;  %v3486_v15 = vand.u32 2147483647, %v3485_v44  ;;  %v12126_v23 = vxor.u32 2147483648, %v8501_v6  ;;  %v12127_v3 = vxor.u32 2147483648, %v8495_v39  ;;  %v12130_v55 = vld [vmem:[#allocation19_spill] sm:$0xff] }
 0x374   : > { %v3952_v62 = vsel %vm3950_vm14, %v12125_v24, %v8393_v22  ;;  %v3572_v58 = vshrl.u32 %v3571_v4, 30  ;;  %v12128_v22 = vld [vmem:[#allocation15_spill] sm:$0xff]  ;;  %v4254_v43 = vand.u32 3, %v12130_v55  ;;  %v4357_v53 = vand.u32 3, %v12131_v10 }
 0x375   : > { %v3953_v18 = vsel %vm3946_vm6, %v3949_v2, %v3952_v62  ;;  %v4052_v7 = vsel %vm4050_vm2, %v8495_v39, %v12126_v23  ;;  %v4055_v47 = vsel %vm4053_vm10, %v12127_v3, %v8501_v6  ;;  %v4151_v36 = vand.u32 3, %v12128_v22  ;;  %v12139_v23 = vld [vmem:[#allocation12_spill] sm:$0xff]  ;;  %v12144_v22 = vld [vmem:[#allocation25_spill] sm:$0xff] }
 0x376   : > { %v3954_v28 = vsel %vm586_vm15, nan, %v3953_v18  ;;  %v4056_v12 = vsel %vm4049_vm8, %v4052_v7, %v4055_v47  ;;  %v3489_v48 = vmul.f32 %v3488_v1, %v3486_v15  ;;  %v3573_v49 = vshll.u32 %v3572_v58, 30  ;;  %v12136_v1 = vld [vmem:[#allocation23_spill] sm:$0xff] }
 0x377   : > { %6944 = vst [vmem:[%s11076_s21 + $0x10] sm:$0xff] %v3954_v28  ;;  %v4057_v21 = vsel %vm690_vm5, nan, %v4056_v12  ;;  %v3596_v59 = vsub.s32 4, %v3572_v58  ;;  %vm4152_vm3 = vcmp.lt.s32.totalorder %v4151_v36, 2  ;;  %vm4153_vm1 = vcmp.eq.s32.totalorder %v4151_v36, 0  ;;  %v12142_v28 = vld [vmem:[#allocation26_spill] sm:$0xff] }
 0x378   : > { %6945 = vst [vmem:[%s11076_s21 + $0x18] sm:$0xff] %v4057_v21  ;;  %v3490_v39 = vxor.u32 2147483648, %v3489_v48  ;;  %v12133_v6 = vxor.u32 2147483648, %v12132_v16  ;;  %vm4156_vm15 = vcmp.eq.s32.totalorder %v4151_v36, 2  ;;  %vm4255_vm6 = vcmp.lt.s32.totalorder %v4254_v43, 2 }
 0x379   : > { %v11208_v60 = vsub.s32 %v3570_v45, %v3573_v49  ;;  %v3597_v19 = vsel %vm3512_vm12, %v3596_v59, %v3572_v58  ;;  %v12135_v41 = vxor.u32 2147483648, %v12134_v63  ;;  %vm4256_vm5 = vcmp.eq.s32.totalorder %v4254_v43, 0  ;;  %v12138_v45 = vld [vmem:[#allocation22_spill] sm:$0xff] }
 0x37a   : > { %v4155_v54 = vsel %vm4153_vm1, %v12134_v63, %v12133_v6  ;;  %v3491_v30 = vsel %vm3408_vm13, %v3490_v39, %v3489_v48  ;;  %v11219_v2 = vsel %vm11175_vm7, 0, %v3597_v19  ;;  %v12137_v4 = vxor.u32 2147483648, %v12136_v1  ;;  %v12145_v48 = vld [vmem:[#allocation27_spill] sm:$0xff]  ;;  %v12151_v63 = vld [vmem:[#allocation30_spill] sm:$0xff] }
 0x37b   : > { %v4158_v56 = vsel %vm4156_vm15, %v12135_v41, %v12132_v16  ;;  %v3494_v62 = vsel %vm11055_vm4, %v10900_v0, %v3491_v30  ;;  %v3576_v15 = vsub.s32 0, %v11208_v60  ;;  %v3603_v18 = vadd.s32 3, %v11219_v2  ;;  %v12152_v19 = vld [vmem:[#allocation14_spill] sm:$0xff] }
 0x37c   : > { %v4159_v44 = vsel %vm4152_vm3, %v4155_v54, %v4158_v56  ;;  %v4258_v24 = vsel %vm4256_vm5, %v12138_v45, %v12137_v4  ;;  %vm12140_vm9 = vweird.f32 %v12139_v23  ;;  %7689 = vcosq.f32 %v3494_v62  ;;  %v12156_v4 = vld [vmem:[#allocation35_spill] sm:$0xff] }
 0x37d   : > { %v4160_v7 = vsel %vm12140_vm9, nan, %v4159_v44  ;;  %vm4259_vm13 = vcmp.eq.s32.totalorder %v4254_v43, 2  ;;  %vm4359_vm11 = vcmp.eq.s32.totalorder %v4357_v53, 0  ;;  %7691 = vsinq.f32 %v3494_v62  ;;  %v12146_v43 = vld [vmem:[#allocation13_spill] sm:$0xff] }
 0x37e   : > { %6946 = vst [vmem:[%s11076_s21 + $0x20] sm:$0xff] %v4160_v7  ;;  %v7237_v3 = vmin.u32 %v3576_v15, %v11208_v60  ;;  %v12141_v47 = vxor.u32 2147483648, %v12138_v45  ;;  %vm4358_vm14 = vcmp.lt.s32.totalorder %v4357_v53, 2  ;;  %v12143_v12 = vxor.u32 2147483648, %v12142_v28  ;;  %v12155_v44 = vld [vmem:[#allocation29_spill] sm:$0xff]  ;;  %v12158_v15 = vld [vmem:[#allocation42_spill] sm:$0xff] }
 0x37f   : > { %vm4362_vm4 = vcmp.eq.s32.totalorder %v4357_v53, 2  ;;  %v4460_v34 = vand.u32 3, %v12145_v48  ;;  %vm3502_vm8 = vcmp.eq.s32.totalorder %v11121_v20, 0  ;;  %vm3505_vm2 = vcmp.eq.s32.totalorder %v11121_v20, 2  ;;  %v12159_v7 = vld [vmem:[#allocation16_spill] sm:$0xff] }
 0x380   : > { %v4261_v58 = vsel %vm4259_vm13, %v12141_v47, %v12136_v1  ;;  %v4361_v36 = vsel %vm4359_vm11, %v12144_v22, %v12143_v12  ;;  %v3566_v21 = vadd.s32 %v11125_v33, %v11131_v51  ;;  %v3578_v55 = vclz %v7237_v3  ;;  %v12149_v51 = vld [vmem:[#allocation31_spill] sm:$0xff] }
 0x381   : > { %v4262_v11 = vsel %vm4255_vm6, %v4258_v24, %v4261_v58  ;;  %v11245_v10 = vand.u32 3, %v3603_v18  ;;  %vm3501_vm10 = vcmp.lt.s32.totalorder %v11121_v20, 2  ;;  %vm12147_vm3 = vweird.f32 %v12146_v43  ;;  %v12157_v24 = vld [vmem:[#allocation39_spill] sm:$0xff] }
 0x382   : > { %v4263_v49 = vsel %vm12147_vm3, nan, %v4262_v11  ;;  %v12148_v59 = vxor.u32 2147483648, %v12144_v22  ;;  %vm4461_vm1 = vcmp.lt.s32.totalorder %v4460_v34, 2  ;;  %vm4462_vm15 = vcmp.eq.s32.totalorder %v4460_v34, 0  ;;  %v12163_v22 = vld [vmem:[#allocation33_spill] sm:$0xff] }
 0x383   : > { %vm3498_vm6 = vweird.f32 %v10900_v0  ;;  %v7238_v16 = vadd.s32 4294967294, %v3578_v55  ;;  %6947 = vst [vmem:[%s11076_s21 + $0x28] sm:$0xff] %v4263_v49  ;;  %v12150_v6 = vxor.u32 2147483648, %v12149_v51  ;;  %vm4465_vm5 = vcmp.eq.s32.totalorder %v4460_v34, 2 }
 0x384   : > { %v4364_v39 = vsel %vm4362_vm4, %v12148_v59, %v12142_v28  ;;  %vm12153_vm9 = vweird.f32 %v12152_v19  ;;  %v12154_v56 = vxor.u32 2147483648, %v12151_v63  ;;  %v4563_v1 = vand.u32 3, %v12155_v44  ;;  %v12161_v28 = vld [vmem:[#allocation34_spill] sm:$0xff] }
 0x385   : > { %v4365_v33 = vsel %vm4358_vm14, %v4361_v36, %v4364_v39  ;;  %v4464_v54 = vsel %vm4462_vm15, %v12151_v63, %v12150_v6  ;;  %v4666_v45 = vand.u32 3, %v12156_v4  ;;  %vm7239_vm13 = vcmp.lt.s32.totalorder %v7238_v16, 0  ;;  %v12167_v6 = vld [vmem:[#allocation37_spill] sm:$0xff] }
 0x386   : > { %v4366_v41 = vsel %vm12153_vm9, nan, %v4365_v33  ;;  %v4467_v30 = vsel %vm4465_vm5, %v12154_v56, %v12149_v51  ;;  %v4769_v62 = vand.u32 3, %v12157_v24  ;;  %v4872_v18 = vand.u32 3, %v12158_v15  ;;  %v11276_v48 = vpop.eup %7689  ;;  %v12165_v33 = vld [vmem:[#allocation38_spill] sm:$0xff] }
 0x387   : > { %6948 = vst [vmem:[%s11076_s21 + $0x30] sm:$0xff] %v4366_v41  ;;  %v4468_v53 = vsel %vm4461_vm1, %v4464_v54, %v4467_v30  ;;  %v3581_v23 = vsel %vm7239_vm13, 0, %v7238_v16  ;;  %vm12160_vm11 = vweird.f32 %v12159_v7  ;;  %vm4564_vm14 = vcmp.lt.s32.totalorder %v4563_v1, 2  ;;  %v11278_v34 = vpop.eup %7691  ;;  %v12169_v30 = vld [vmem:[#allocation20_spill] sm:$0xff] }
 0x388   : > { %v4469_v3 = vsel %vm12160_vm11, nan, %v4468_v53  ;;  %vm4565_vm4 = vcmp.eq.s32.totalorder %v4563_v1, 0  ;;  %v3582_v47 = vsub.s32 32, %v3581_v23  ;;  %v3583_v58 = vshll.u32 %v11208_v60, %v3581_v23 }
 0x389   : > { %v3586_v11 = vsub.s32 4294967266, %v3581_v23  ;;  %6949 = vst [vmem:[%s11076_s21 + $0x38] sm:$0xff] %v4469_v3  ;;  %v12162_v12 = vxor.u32 2147483648, %v12161_v28  ;;  %vm4568_vm3 = vcmp.eq.s32.totalorder %v4563_v1, 2  ;;  %vm4667_vm1 = vcmp.lt.s32.totalorder %v4666_v45, 2  ;;  %v12171_v23 = vld [vmem:[#allocation21_spill] sm:$0xff] }
 0x38a   : > { %vm4668_vm15 = vcmp.eq.s32.totalorder %v4666_v45, 0  ;;  %vm4671_vm5 = vcmp.eq.s32.totalorder %v4666_v45, 2  ;;  %v3506_v55 = vxor.u32 2147483648, %v11276_v48  ;;  %v3584_v43 = vshrl.u32 %v3566_v21, %v3582_v47  ;;  %v12173_v47 = vld [vmem:[#allocation43_spill] sm:$0xff] }
 0x38b   : > { %v4567_v36 = vsel %vm4565_vm4, %v12163_v22, %v12162_v12  ;;  %v3587_v49 = vadd.s32 127, %v3586_v11  ;;  %v12164_v60 = vxor.u32 2147483648, %v12163_v22  ;;  %v3503_v39 = vxor.u32 2147483648, %v11278_v34  ;;  %v12175_v11 = vld [vmem:[#allocation41_spill] sm:$0xff] }
 0x38c   : > { %v12166_v51 = vxor.u32 2147483648, %v12165_v33  ;;  %v12168_v54 = vxor.u32 2147483648, %v12167_v6  ;;  %v3507_v21 = vsel %vm3505_vm2, %v3506_v55, %v11278_v34  ;;  %v3585_v41 = vor.u32 %v3584_v43, %v3583_v58 }
 0x38d   : > { %v4570_v59 = vsel %vm4568_vm3, %v12164_v60, %v12161_v28  ;;  %v3588_v56 = vshll.u32 %v3587_v49, 23  ;;  %vm12170_vm9 = vweird.f32 %v12169_v30  ;;  %v3504_v1 = vsel %vm3502_vm8, %v11276_v48, %v3503_v39  ;;  %v12179_v49 = vld [vmem:[#allocation45_spill] sm:$0xff]  ;;  %v12187_v30 = vld [vmem:[#allocation50_spill] sm:$0xff] }
 0x38e   : > { %v4571_v16 = vsel %vm4564_vm14, %v4567_v36, %v4570_v59  ;;  %v4670_v63 = vsel %vm4668_vm15, %v12167_v6, %v12166_v51  ;;  %v4673_v19 = vsel %vm4671_vm5, %v12168_v54, %v12165_v33  ;;  %vm4770_vm13 = vcmp.lt.s32.totalorder %v4769_v62, 2  ;;  %v12177_v36 = vld [vmem:[#allocation47_spill] sm:$0xff]  ;;  %v12181_v33 = vld [vmem:[#allocation46_spill] sm:$0xff] }
 0x38f   : > { %v4572_v44 = vsel %vm12170_vm9, nan, %v4571_v16  ;;  %v4674_v4 = vsel %vm4667_vm1, %v4670_v63, %v4673_v19  ;;  %vm4771_vm11 = vcmp.eq.s32.totalorder %v4769_v62, 0  ;;  %v3508_v53 = vsel %vm3501_vm10, %v3504_v1, %v3507_v21  ;;  %v12182_v63 = vld [vmem:[#allocation28_spill] sm:$0xff]  ;;  %v12184_v21 = vld [vmem:[#allocation51_spill] sm:$0xff]  ;;  %v12189_v1 = vld [vmem:[#allocation49_spill] sm:$0xff] }
 0x390   : > { %6950 = vst [vmem:[%s11076_s21 + $0x40] sm:$0xff] %v4572_v44  ;;  %v3589_v24 = vor.u32 4788187, %v3588_v56  ;;  %v3592_v15 = vcvt.s32.f32 %v3585_v41  ;;  %vm12172_vm2 = vweird.f32 %v12171_v23  ;;  %v3509_v3 = vsel %vm3498_vm6, nan, %v3508_v53  ;;  %v12191_v23 = vld [vmem:[#allocation54_spill] sm:$0xff] }
 0x391   : > { %v4675_v7 = vsel %vm12172_vm2, nan, %v4674_v4  ;;  %v12174_v58 = vxor.u32 2147483648, %v12173_v47  ;;  %vm4774_vm8 = vcmp.eq.s32.totalorder %v4769_v62, 2  ;;  %vm4873_vm14 = vcmp.lt.s32.totalorder %v4872_v18, 2  ;;  %3644 = vst [vmem:[%s8286_s17 + $0xf0] sm:$0xff] %v3509_v3  ;;  %v12185_v62 = vld [vmem:[#allocation32_spill] sm:$0xff] }
 0x392   : > { %6951 = vst [vmem:[%s11076_s21 + $0x48] sm:$0xff] %v4675_v7  ;;  %v3590_v45 = vand.u32 2147483647, %v3589_v24  ;;  %v12176_v20 = vxor.u32 2147483648, %v12175_v11  ;;  %vm4874_vm10 = vcmp.eq.s32.totalorder %v4872_v18, 0  ;;  %vm4877_vm4 = vcmp.eq.s32.totalorder %v4872_v18, 2 }
 0x393   : > { %v4773_v28 = vsel %vm4771_vm11, %v12175_v11, %v12174_v58  ;;  %v12178_v43 = vxor.u32 2147483648, %v12177_v36  ;;  %v12180_v59 = vxor.u32 2147483648, %v12179_v49  ;;  %v4975_v51 = vand.u32 3, %v12181_v33  ;;  %v12194_v11 = vld [vmem:[#allocation56_spill] sm:$0xff]  ;;  %v12202_v33 = vld [vmem:[#allocation57_spill] sm:$0xff] }
 0x394   : > { %v4776_v12 = vsel %vm4774_vm8, %v12176_v20, %v12173_v47  ;;  %v3593_v6 = vmul.f32 %v3592_v15, %v3590_v45  ;;  %vm12183_vm3 = vweird.f32 %v12182_v63  ;;  %v5078_v41 = vand.u32 3, %v12184_v21  ;;  %v12192_v47 = vld [vmem:[#allocation36_spill] sm:$0xff]  ;;  %v12196_v45 = vld [vmem:[#allocation55_spill] sm:$0xff] }
 0x395   : > { %v4777_v22 = vsel %vm4770_vm13, %v4773_v28, %v4776_v12  ;;  %v4876_v60 = vsel %vm4874_vm10, %v12179_v49, %v12178_v43  ;;  %v4879_v16 = vsel %vm4877_vm4, %v12180_v59, %v12177_v36  ;;  %vm12186_vm1 = vweird.f32 %v12185_v62  ;;  %v12198_v49 = vld [vmem:[#allocation40_spill] sm:$0xff]  ;;  %v12200_v59 = vld [vmem:[#allocation58_spill] sm:$0xff]  ;;  %v12204_v63 = vld [vmem:[#allocation59_spill] sm:$0xff] }
 0x396   : > { %v4778_v54 = vsel %vm12183_vm3, nan, %v4777_v22  ;;  %v4880_v19 = vsel %vm4873_vm14, %v4876_v60, %v4879_v16  ;;  %vm4976_vm15 = vcmp.lt.s32.totalorder %v4975_v51, 2  ;;  %vm4977_vm5 = vcmp.eq.s32.totalorder %v4975_v51, 0  ;;  %v12206_v62 = vld [vmem:[#allocation68_spill] sm:$0xff] }
 0x397   : > { %6952 = vst [vmem:[%s11076_s21 + $0x50] sm:$0xff] %v4778_v54  ;;  %v4881_v18 = vsel %vm12186_vm1, nan, %v4880_v19  ;;  %vm4980_vm9 = vcmp.eq.s32.totalorder %v4975_v51, 2  ;;  %v3594_v56 = vxor.u32 2147483648, %v3593_v6  ;;  %v12188_v44 = vxor.u32 2147483648, %v12187_v30  ;;  %v12205_v19 = vld [vmem:[#allocation61_spill] sm:$0xff] }
 0x398   : > { %6953 = vst [vmem:[%s11076_s21 + $0x58] sm:$0xff] %v4881_v18  ;;  %v12190_v53 = vxor.u32 2147483648, %v12189_v1  ;;  %vm5079_vm13 = vcmp.lt.s32.totalorder %v5078_v41, 2  ;;  %vm5080_vm11 = vcmp.eq.s32.totalorder %v5078_v41, 0  ;;  %vm5083_vm2 = vcmp.eq.s32.totalorder %v5078_v41, 2 }
 0x399   : > { %v4979_v4 = vsel %vm4977_vm5, %v12189_v1, %v12188_v44  ;;  %v5181_v7 = vand.u32 3, %v12191_v23  ;;  %v3595_v3 = vsel %vm3512_vm12, %v3594_v56, %v3593_v6  ;;  %vm12193_vm8 = vweird.f32 %v12192_v47  ;;  %v12207_v56 = vld [vmem:[#allocation71_spill] sm:$0xff]  ;;  %v12208_v44 = vld [vmem:[#allocation74_spill] sm:$0xff] }
 0x39a   : > { %v4982_v24 = vsel %vm4980_vm9, %v12190_v53, %v12187_v30  ;;  %v12195_v28 = vxor.u32 2147483648, %v12194_v11  ;;  %v12197_v12 = vxor.u32 2147483648, %v12196_v45  ;;  %v3598_v36 = vsel %vm11175_vm7, %v10949_v42, %v3595_v3  ;;  %v12213_v23 = vld [vmem:[#allocation62_spill] sm:$0xff] }
 0x39b   : > { %v4983_v15 = vsel %vm4976_vm15, %v4979_v4, %v4982_v24  ;;  %vm5182_vm14 = vcmp.lt.s32.totalorder %v5181_v7, 2  ;;  %vm5183_vm10 = vcmp.eq.s32.totalorder %v5181_v7, 0  ;;  %7693 = vcosq.f32 %v3598_v36  ;;  %v12209_v4 = vld [vmem:[#allocation44_spill] sm:$0xff] }
 0x39c   : > { %v4984_v58 = vsel %vm12193_vm8, nan, %v4983_v15  ;;  %v5082_v20 = vsel %vm5080_vm11, %v12196_v45, %v12195_v28  ;;  %v5085_v22 = vsel %vm5083_vm2, %v12197_v12, %v12194_v11  ;;  %vm12199_vm12 = vweird.f32 %v12198_v49  ;;  %v12211_v24 = vld [vmem:[#allocation64_spill] sm:$0xff]  ;;  %v12215_v11 = vld [vmem:[#allocation66_spill] sm:$0xff]  ;;  %v12217_v45 = vld [vmem:[#allocation65_spill] sm:$0xff] }
 0x39d   : > { %6954 = vst [vmem:[%s11076_s21 + $0x60] sm:$0xff] %v4984_v58  ;;  %v5086_v43 = vsel %vm5079_vm13, %v5082_v20, %v5085_v22  ;;  %v12201_v16 = vxor.u32 2147483648, %v12200_v59  ;;  %vm5186_vm4 = vcmp.eq.s32.totalorder %v5181_v7, 2  ;;  %7695 = vsinq.f32 %v3598_v36  ;;  %v12218_v12 = vld [vmem:[#allocation48_spill] sm:$0xff] }
 0x39e   : > { %v5087_v60 = vsel %vm12199_vm12, nan, %v5086_v43  ;;  %v12203_v5 = vxor.u32 2147483648, %v12202_v33  ;;  %v5284_v54 = vand.u32 3, %v12204_v63  ;;  %v5387_v21 = vand.u32 3, %v12205_v19  ;;  %v12227_v19 = vld [vmem:[#allocation53_spill] sm:$0xff] }
 0x39f   : > { %v5185_v51 = vsel %vm5183_vm10, %v12202_v33, %v12201_v16  ;;  %6955 = vst [vmem:[%s11076_s21 + $0x68] sm:$0xff] %v5087_v60  ;;  %vm3609_vm7 = vcmp.eq.s32.totalorder %v11245_v10, 2  ;;  %v5490_v18 = vand.u32 3, %v12206_v62  ;;  %v5593_v30 = vand.u32 3, %v12207_v56  ;;  %v12221_v60 = vld [vmem:[#allocation70_spill] sm:$0xff]  ;;  %v12223_v16 = vld [vmem:[#allocation69_spill] sm:$0xff] }
 0x3a0   : > { %v5188_v6 = vsel %vm5186_vm4, %v12203_v5, %v12200_v59  ;;  %v5696_v1 = vand.u32 3, %v12208_v44  ;;  %vm3606_vm3 = vcmp.eq.s32.totalorder %v11245_v10, 0  ;;  %vm12210_vm1 = vweird.f32 %v12209_v4 }
 0x3a1   : > { %v5189_v41 = vsel %vm5182_vm14, %v5185_v51, %v5188_v6  ;;  %vm5285_vm15 = vcmp.lt.s32.totalorder %v5284_v54, 2  ;;  %vm5286_vm5 = vcmp.eq.s32.totalorder %v5284_v54, 0  ;;  %vm5289_vm9 = vcmp.eq.s32.totalorder %v5284_v54, 2  ;;  %v12225_v6 = vld [vmem:[#allocation52_spill] sm:$0xff] }
 0x3a2   : > { %v5190_v53 = vsel %vm12210_vm1, nan, %v5189_v41  ;;  %vm3605_vm13 = vcmp.lt.s32.totalorder %v11245_v10, 2  ;;  %v12212_v15 = vxor.u32 2147483648, %v12211_v24  ;;  %v12214_v3 = vxor.u32 2147483648, %v12213_v23  ;;  %v12229_v41 = vld [vmem:[#allocation75_spill] sm:$0xff]  ;;  %v12249_v10 = vld [vmem:[#allocation86_spill] sm:$0xff] }
 0x3a3   : > { %6956 = vst [vmem:[%s11076_s21 + $0x70] sm:$0xff] %v5190_v53  ;;  %vm5388_vm11 = vcmp.lt.s32.totalorder %v5387_v21, 2  ;;  %vm5389_vm2 = vcmp.eq.s32.totalorder %v5387_v21, 0  ;;  %vm3602_vm8 = vweird.f32 %v10949_v42  ;;  %v12216_v28 = vxor.u32 2147483648, %v12215_v11 }
 0x3a4   : > { %v5288_v7 = vsel %vm5286_vm5, %v12213_v23, %v12212_v15  ;;  %v5291_v47 = vsel %vm5289_vm9, %v12214_v3, %v12211_v24  ;;  %vm5392_vm14 = vcmp.eq.s32.totalorder %v5387_v21, 2  ;;  %vm5491_vm10 = vcmp.lt.s32.totalorder %v5490_v18, 2  ;;  %v12233_v24 = vld [vmem:[#allocation77_spill] sm:$0xff]  ;;  %v12234_v3 = vld [vmem:[#allocation60_spill] sm:$0xff] }
 0x3a5   : > { %v5292_v58 = vsel %vm5285_vm15, %v5288_v7, %v5291_v47  ;;  %v5391_v20 = vsel %vm5389_vm2, %v12217_v45, %v12216_v28  ;;  %vm12219_vm12 = vweird.f32 %v12218_v12  ;;  %v12220_v36 = vxor.u32 2147483648, %v12217_v45  ;;  %v11409_v53 = vpop.eup %7693  ;;  %v12238_v28 = vld [vmem:[#allocation78_spill] sm:$0xff] }
 0x3a6   : > { %v5293_v22 = vsel %vm12219_vm12, nan, %v5292_v58  ;;  %vm5492_vm4 = vcmp.eq.s32.totalorder %v5490_v18, 0  ;;  %vm5495_vm1 = vcmp.eq.s32.totalorder %v5490_v18, 2  ;;  %v12222_v59 = vxor.u32 2147483648, %v12221_v60  ;;  %v12231_v18 = vld [vmem:[#allocation73_spill] sm:$0xff]  ;;  %v12236_v58 = vld [vmem:[#allocation79_spill] sm:$0xff] }
 0x3a7   : > { %v5394_v43 = vsel %vm5392_vm14, %v12220_v36, %v12215_v11  ;;  %6957 = vst [vmem:[%s11076_s21 + $0x78] sm:$0xff] %v5293_v22  ;;  %v12224_v51 = vxor.u32 2147483648, %v12223_v16  ;;  %vm5594_vm15 = vcmp.lt.s32.totalorder %v5593_v30, 2  ;;  %vm12226_vm5 = vweird.f32 %v12225_v6  ;;  %v11413_v23 = vpop.eup %7695 }
 0x3a8   : > { %v5395_v49 = vsel %vm5388_vm11, %v5391_v20, %v5394_v43  ;;  %v5494_v33 = vsel %vm5492_vm4, %v12223_v16, %v12222_v59  ;;  %vm5595_vm9 = vcmp.eq.s32.totalorder %v5593_v30, 0  ;;  %vm5598_vm2 = vcmp.eq.s32.totalorder %v5593_v30, 2  ;;  %v12242_v59 = vld [vmem:[#allocation82_spill] sm:$0xff] }
 0x3a9   : > { %v5497_v5 = vsel %vm5495_vm1, %v12224_v51, %v12221_v60  ;;  %v5396_v63 = vsel %vm12226_vm5, nan, %v5395_v49  ;;  %vm12228_vm14 = vweird.f32 %v12227_v19  ;;  %v12230_v62 = vxor.u32 2147483648, %v12229_v41  ;;  %v12240_v49 = vld [vmem:[#allocation63_spill] sm:$0xff] }
 0x3aa   : > { %v5498_v54 = vsel %vm5491_vm10, %v5494_v33, %v5497_v5  ;;  %6958 = vst [vmem:[%s11076_s21 + $0x80] sm:$0xff] %v5396_v63  ;;  %v12232_v44 = vxor.u32 2147483648, %v12231_v18  ;;  %vm5697_vm11 = vcmp.lt.s32.totalorder %v5696_v1, 2  ;;  %vm5698_vm10 = vcmp.eq.s32.totalorder %v5696_v1, 0  ;;  %v12244_v33 = vld [vmem:[#allocation81_spill] sm:$0xff]  ;;  %v12246_v63 = vld [vmem:[#allocation83_spill] sm:$0xff] }
 0x3ab   : > { %v5499_v21 = vsel %vm12228_vm14, nan, %v5498_v54  ;;  %v5597_v56 = vsel %vm5595_vm9, %v12231_v18, %v12230_v62  ;;  %vm5701_vm12 = vcmp.eq.s32.totalorder %v5696_v1, 2  ;;  %v5799_v15 = vand.u32 3, %v12233_v24 }
 0x3ac   : > { %v5600_v4 = vsel %vm5598_vm2, %v12232_v44, %v12229_v41  ;;  %6959 = vst [vmem:[%s11076_s21 + $0x88] sm:$0xff] %v5499_v21  ;;  %v3610_v7 = vxor.u32 2147483648, %v11409_v53  ;;  %vm12235_vm4 = vweird.f32 %v12234_v3  ;;  %v12237_v11 = vxor.u32 2147483648, %v12236_v58 }
 0x3ad   : > { %v5601_v30 = vsel %vm5594_vm15, %v5597_v56, %v5600_v4  ;;  %v12239_v20 = vxor.u32 2147483648, %v12238_v28  ;;  %v3607_v22 = vxor.u32 2147483648, %v11413_v23  ;;  %vm5800_vm1 = vcmp.lt.s32.totalorder %v5799_v15, 2  ;;  %v12247_v56 = vld [vmem:[#allocation67_spill] sm:$0xff] }
 0x3ae   : > { %v5602_v47 = vsel %vm12235_vm4, nan, %v5601_v30  ;;  %v5700_v45 = vsel %vm5698_vm10, %v12238_v28, %v12237_v11  ;;  %vm5801_vm15 = vcmp.eq.s32.totalorder %v5799_v15, 0  ;;  %v3611_v43 = vsel %vm3609_vm7, %v3610_v7, %v11413_v23 }
 0x3af   : > { %v5703_v12 = vsel %vm5701_vm12, %v12239_v20, %v12236_v58  ;;  %6960 = vst [vmem:[%s11076_s21 + $0x90] sm:$0xff] %v5602_v47  ;;  %vm12241_vm5 = vweird.f32 %v12240_v49  ;;  %v12243_v16 = vxor.u32 2147483648, %v12242_v59  ;;  %vm5804_vm9 = vcmp.eq.s32.totalorder %v5799_v15, 2  ;;  %v12253_v15 = vld [vmem:[#allocation89_spill] sm:$0xff]  ;;  %v12255_v47 = vld [vmem:[#allocation88_spill] sm:$0xff] }
 0x3b0   : > { %v5704_v36 = vsel %vm5697_vm11, %v5700_v45, %v5703_v12  ;;  %v3608_v1 = vsel %vm3606_vm3, %v11409_v53, %v3607_v22  ;;  %v12245_v5 = vxor.u32 2147483648, %v12244_v33  ;;  %v5902_v54 = vand.u32 3, %v12246_v63 }
 0x3b1   : > { %v5705_v60 = vsel %vm12241_vm5, nan, %v5704_v36  ;;  %v5803_v51 = vsel %vm5801_vm15, %v12244_v33, %v12243_v16  ;;  %v6005_v19 = vand.u32 3, %v10276_v17  ;;  %v3612_v21 = vsel %vm3605_vm13, %v3608_v1, %v3611_v43 }
 0x3b2   : > { %6961 = vst [vmem:[%s11076_s21 + $0x98] sm:$0xff] %v5705_v60  ;;  %v5806_v6 = vsel %vm5804_vm9, %v12245_v5, %v12242_v59  ;;  %v6108_v62 = vand.u32 3, %v10441_v9  ;;  %v11463_v18 = vand.u32 3, %v10527_v31  ;;  %v3613_v17 = vsel %vm3602_vm8, nan, %v3612_v21  ;;  %v12251_v9 = vld [vmem:[#allocation85_spill] sm:$0xff] }
 0x3b3   : > { %v5807_v41 = vsel %vm5800_vm1, %v5803_v51, %v5806_v6  ;;  %vm12248_vm7 = vweird.f32 %v12247_v56  ;;  %vm5903_vm3 = vcmp.lt.s32.totalorder %v5902_v54, 2  ;;  %vm5904_vm2 = vcmp.eq.s32.totalorder %v5902_v54, 0  ;;  %3645 = vst [vmem:[%s8286_s17 + $0xf8] sm:$0xff] %v3613_v17 }
 0x3b4   : > { %v5808_v44 = vsel %vm12248_vm7, nan, %v5807_v41  ;;  %v12250_v4 = vxor.u32 2147483648, %v12249_v10  ;;  %vm5907_vm13 = vcmp.eq.s32.totalorder %v5902_v54, 2  ;;  %vm6006_vm14 = vcmp.lt.s32.totalorder %v6005_v19, 2 }
 0x3b5   : > { %6962 = vst [vmem:[%s11076_s21 + $0xa0] sm:$0xff] %v5808_v44  ;;  %vm6007_vm11 = vcmp.eq.s32.totalorder %v6005_v19, 0  ;;  %v12252_v31 = vxor.u32 2147483648, %v12251_v9  ;;  %v12254_v3 = vxor.u32 2147483648, %v12253_v15  ;;  %vm6010_vm10 = vcmp.eq.s32.totalorder %v6005_v19, 2 }
 0x3b6   : > { %v5906_v30 = vsel %vm5904_vm2, %v12251_v9, %v12250_v4  ;;  %vm6109_vm12 = vcmp.lt.s32.totalorder %v6108_v62, 2 }
 0x3b7   : > { %v5909_v24 = vsel %vm5907_vm13, %v12252_v31, %v12249_v10  ;;  %v6009_v58 = vsel %vm6007_vm11, %v12255_v47, %v12254_v3 }
 0x3b8   : > { %7743 = shalt.err (!%p7740_p4)
}
 0x3b9   : > { %s7744_s4 = scalar_lea.hbm %s11455_s26, 4096  ;;  %s7748_s7 = scalar_lea.hbm %s11666_s1, 8192 }
 0x3ba   : > { %p7745_p7 = scmp.ne.s32.totalorder %s11455_s26, %s7744_s4  ;;  %p7749_p13 = scmp.lt.u32.totalorder %s11455_s26, %s11666_s1 }
 0x3bb   : > { %p7750_p1 = scmp.lt.u32.totalorder %s7748_s7, %s7744_s4  ;;  %p7752_p5 = scmp.lt.u32.totalorder %s7744_s4, %s11455_s26 }
 0x3bc   : > { %p7746_p8 = pnand %p7745_p7, %p12256_p6 }
 0x3bd   : > { %p7751_p0 = por %p7750_p1, %p7749_p13 }
 0x3be   : > { %p7747_p11 = pneg %p7746_p8 }
 0x3bf   : > { %p7753_p9 = por %p7752_p5, %p7751_p0 }
 0x3c1   : > { %p7754_p10 = pnand %p7753_p9, %p7747_p11 }
 0x3c3   : > { %7757 = shalt.err (!%p7754_p10)
}
 0x3c4   : > { %s7838_s17 = smov 128   ;;  %s7839_s24 = smov 8   ;;  %v5910_v11 = vsel %vm5903_vm3, %v5906_v30, %v5909_v24  ;;  %v12257_v28 = vxor.u32 2147483648, %v12255_v47  ;;  %vm6110_vm4 = vcmp.eq.s32.totalorder %v6108_v62, 0  ;;  %vm6113_vm1 = vcmp.eq.s32.totalorder %v6108_v62, 2  ;;  %v12258_v20 = vld [vmem:[#allocation72_spill] sm:$0xff] }
 0x3c5   : > { %7510 = dma.vmem_to_hbm [thread:$0]  (%p12256_p6), %s11457_s23, 4096, %s11455_s26, %s6975_s27, %s7838_s17, %s7838_s17, %s7839_s24   ;;  %vm12259_vm15 = vweird.f32 %v12258_v20  ;;  %v12260_v43 = vld [vmem:[#allocation92_spill] sm:$0xff]  ;;  %v12262_v60 = vld [vmem:[#allocation91_spill] sm:$0xff]  ;;  %vm6212_vm9 = vcmp.lt.s32.totalorder %v11463_v18, 2  ;;  %vm6213_vm7 = vcmp.eq.s32.totalorder %v11463_v18, 0  ;;  %v12270_v21 = vld [vmem:[#allocation94_spill] sm:$0xff] }
 0x3c6   : > { %v6012_v45 = vsel %vm6010_vm10, %v12257_v28, %v12253_v15  ;;  %v5911_v12 = vsel %vm12259_vm15, nan, %v5910_v11  ;;  %v12261_v49 = vxor.u32 2147483648, %v12260_v43  ;;  %v12263_v16 = vxor.u32 2147483648, %v12262_v60  ;;  %v12264_v51 = vld [vmem:[#allocation76_spill] sm:$0xff]  ;;  %v12268_v54 = vld [vmem:[#allocation95_spill] sm:$0xff]  ;;  %v12271_v17 = vld [vmem:[#allocation93_spill] sm:$0xff]  ;;  %s11613_s27 = scalar_lea.hbm %s11667_s2, %s7376_s22 }
 0x3c7   : > { %v6013_v36 = vsel %vm6006_vm14, %v6009_v58, %v6012_v45  ;;  %6963 = vst [vmem:[%s11076_s21 + $0xa8] sm:$0xff] %v5911_v12  ;;  %vm12265_vm5 = vweird.f32 %v12264_v51  ;;  %v12266_v6 = vld [vmem:[#allocation80_spill] sm:$0xff]  ;;  %v12269_v19 = vxor.u32 2147483648, %v12268_v54  ;;  %vm6216_vm2 = vcmp.eq.s32.totalorder %v11463_v18, 2  ;;  %v12276_v15 = vld [vmem:[#allocation97_spill] sm:$0xff]  ;;  %v12282_v20 = vld [vmem:[#allocation99_spill] sm:$0xff] }
 0x3c8   : > { %v6112_v59 = vsel %vm6110_vm4, %v12262_v60, %v12261_v49  ;;  %v6115_v33 = vsel %vm6113_vm1, %v12263_v16, %v12260_v43  ;;  %v6014_v1 = vsel %vm12265_vm5, nan, %v6013_v36  ;;  %vm12267_vm3 = vweird.f32 %v12266_v6  ;;  %v12273_v4 = vld [vmem:[#allocation100_spill] sm:$0xff]  ;;  %v12284_v36 = vld [vmem:[#allocation98_spill] sm:$0xff]  ;;  %s7009_s23 = sshll.u32 %s11076_s21, 4  ;;  %s6980_s28 = scalar_lea.sflag [#allocation7], %s8213_s14  ;;  %s11615_s23 = int_to_ptr.vmem [resolvable:$true] %s7009_s23 }
 0x3c9   : > { %v6116_v5 = vsel %vm6109_vm12, %v6112_v59, %v6115_v33  ;;  %6964 = vst [vmem:[%s11076_s21 + $0xb0] sm:$0xff] %v6014_v1  ;;  %v6215_v41 = vsel %vm6213_vm7, %v12270_v21, %v12269_v19  ;;  %v6314_v56 = vand.u32 3, %v12271_v17  ;;  %v12272_v62 = vxor.u32 2147483648, %v12270_v21  ;;  %v12274_v24 = vld [vmem:[#allocation84_spill] sm:$0xff]  ;;  %v12287_v51 = vld [vmem:[#allocation90_spill] sm:$0xff]  ;;  %s7758_s29 = scalar_lea.vmem %s11615_s23, 4096 }
 0x3ca   : > { %v6117_v63 = vsel %vm12267_vm3, nan, %v6116_v5  ;;  %v6417_v10 = vand.u32 3, %v10717_v13  ;;  %v6520_v9 = vand.u32 3, %v12273_v4  ;;  %v6623_v30 = vand.u32 3, %v10922_v8  ;;  %v12278_v47 = vld [vmem:[#allocation96_spill] sm:$0xff]  ;;  %v12280_v8 = vld [vmem:[#allocation87_spill] sm:$0xff]  ;;  %p7759_p12 = scmp.ne.s32.totalorder %s11615_s23, %s7758_s29 }
 0x3cb   : > { %6965 = vst [vmem:[%s11076_s21 + $0xb8] sm:$0xff] %v6117_v63  ;;  %v6218_v44 = vsel %vm6216_vm2, %v12272_v62, %v12268_v54  ;;  %vm6315_vm13 = vcmp.lt.s32.totalorder %v6314_v56, 2  ;;  %vm6316_vm14 = vcmp.eq.s32.totalorder %v6314_v56, 0  ;;  %vm6319_vm11 = vcmp.eq.s32.totalorder %v6314_v56, 2  ;;  %s7840_s13 = smov [#allocation6]  }
 0x3cc   : > { %v6219_v31 = vsel %vm6212_vm9, %v6215_v41, %v6218_v44  ;;  %vm12275_vm10 = vweird.f32 %v12274_v24  ;;  %v12277_v3 = vxor.u32 2147483648, %v12276_v15  ;;  %v12279_v11 = vxor.u32 2147483648, %v12278_v47  ;;  %p7760_p2 = pnand %p7759_p12, %p12256_p6  ;;  %s7762_s30 = sshll.u32 %s7840_s13, 4  ;;  %s7763_s30 = int_to_ptr.vmem [resolvable:$false] %s7762_s30 }
 0x3cd   : > { %v6220_v18 = vsel %vm12275_vm10, nan, %v6219_v31  ;;  %vm6418_vm12 = vcmp.lt.s32.totalorder %v6417_v10, 2  ;;  %vm6419_vm4 = vcmp.eq.s32.totalorder %v6417_v10, 0  ;;  %vm6422_vm1 = vcmp.eq.s32.totalorder %v6417_v10, 2  ;;  %s7764_s22 = scalar_lea.vmem %s7763_s30, 8192  ;;  %p7765_p4 = scmp.lt.s32.totalorder %s11615_s23, %s7763_s30 }
 0x3ce   : > { %v6318_v58 = vsel %vm6316_vm14, %v12278_v47, %v12277_v3  ;;  %v6321_v13 = vsel %vm6319_vm11, %v12279_v11, %v12276_v15  ;;  %6966 = vst [vmem:[%s11076_s21 + $0xc0] sm:$0xff] %v6220_v18  ;;  %vm6521_vm15 = vcmp.lt.s32.totalorder %v6520_v9, 2  ;;  %vm12281_vm5 = vweird.f32 %v12280_v8  ;;  %p7761_p3 = pneg %p7760_p2  ;;  %p7766_p7 = scmp.lt.s32.totalorder %s7764_s22, %s7758_s29 }
 0x3cf   : > { %v6322_v28 = vsel %vm6315_vm13, %v6318_v58, %v6321_v13  ;;  %v12283_v12 = vxor.u32 2147483648, %v12282_v20  ;;  %v12285_v49 = vxor.u32 2147483648, %v12284_v36  ;;  %vm6522_vm9 = vcmp.eq.s32.totalorder %v6520_v9, 0 }
 0x3d0   : > { %v6323_v45 = vsel %vm12281_vm5, nan, %v6322_v28  ;;  %v12286_v16 = vxor.u32 2147483648, %v10917_v46  ;;  %vm6525_vm7 = vcmp.eq.s32.totalorder %v6520_v9, 2  ;;  %vm6624_vm3 = vcmp.lt.s32.totalorder %v6623_v30, 2  ;;  %p7767_p8 = por %p7766_p7, %p7765_p4 }
 0x3d1   : > { %v6421_v43 = vsel %vm6419_vm4, %v12284_v36, %v12283_v12  ;;  %v6424_v60 = vsel %vm6422_vm1, %v12285_v49, %v12282_v20  ;;  %6967 = vst [vmem:[%s11076_s21 + $0xc8] sm:$0xff] %v6323_v45  ;;  %vm12288_vm2 = vweird.f32 %v12287_v51  ;;  %v12289_v5 = vxor.u32 2147483648, %v10913_v32 }
 0x3d2   : > { %v6425_v59 = vsel %vm6418_vm12, %v6421_v43, %v6424_v60  ;;  %v6524_v33 = vsel %vm6522_vm9, %v10913_v32, %v12286_v16  ;;  %vm6625_vm13 = vcmp.eq.s32.totalorder %v6623_v30, 0  ;;  %vm6628_vm14 = vcmp.eq.s32.totalorder %v6623_v30, 2  ;;  %p7768_p11 = pnand %p7767_p8, %p7761_p3 }
 0x3d3   : > { %v6426_v1 = vsel %vm12288_vm2, nan, %v6425_v59  ;;  %v6527_v6 = vsel %vm6525_vm7, %v12289_v5, %v10917_v46  ;;  %v6627_v54 = vsel %vm6625_vm13, %v11014_v61, %v3295_v25  ;;  %v6630_v19 = vsel %vm6628_vm14, %v3298_v29, %v11021_v27 }
 0x3d4   : > { %6968 = vst [vmem:[%s11076_s21 + $0xd0] sm:$0xff] %v6426_v1  ;;  %v6528_v63 = vsel %vm6521_vm15, %v6524_v33, %v6527_v6  ;;  %v6726_v21 = vand.u32 3, %v11002_v50  ;;  %vm12290_vm11 = vweird.f32 %v10537_v26  ;;  %v6631_v32 = vsel %vm6624_vm3, %v6627_v54, %v6630_v19 }
 0x3d5   : > { %v6529_v41 = vsel %vm12290_vm11, nan, %v6528_v63  ;;  %v6829_v46 = vand.u32 3, %v11099_v52  ;;  %v6932_v17 = vand.u32 3, %v11219_v2  ;;  %vm12291_vm10 = vweird.f32 %v10655_v40 }
 0x3d6   : > { %6969 = vst [vmem:[%s11076_s21 + $0xd8] sm:$0xff] %v6529_v41  ;;  %v6632_v56 = vsel %vm12291_vm10, nan, %v6631_v32  ;;  %vm6727_vm12 = vcmp.lt.s32.totalorder %v6726_v21, 2  ;;  %vm6728_vm4 = vcmp.eq.s32.totalorder %v6726_v21, 0  ;;  %vm6731_vm1 = vcmp.eq.s32.totalorder %v6726_v21, 2 }
 0x3d7   : > { %6970 = vst [vmem:[%s11076_s21 + $0xe0] sm:$0xff] %v6632_v56  ;;  %v6730_v26 = vsel %vm6728_vm4, %v11134_v14, %v3399_v57  ;;  %v6733_v50 = vsel %vm6731_vm1, %v3402_v38, %v11143_v35  ;;  %vm6830_vm15 = vcmp.lt.s32.totalorder %v6829_v46, 2  ;;  %vm6831_vm5 = vcmp.eq.s32.totalorder %v6829_v46, 0 }
 0x3d8   : > { %v6734_v61 = vsel %vm6727_vm12, %v6730_v26, %v6733_v50  ;;  %v6833_v40 = vsel %vm6831_vm5, %v11276_v48, %v3503_v39  ;;  %vm6834_vm9 = vcmp.eq.s32.totalorder %v6829_v46, 2  ;;  %vm6933_vm7 = vcmp.lt.s32.totalorder %v6932_v17, 2 }
 0x3d9   : > { %v6735_v27 = vsel %vm3394_vm0, nan, %v6734_v61  ;;  %v6836_v29 = vsel %vm6834_vm9, %v3506_v55, %v11278_v34  ;;  %vm6934_vm3 = vcmp.eq.s32.totalorder %v6932_v17, 0  ;;  %vm6937_vm2 = vcmp.eq.s32.totalorder %v6932_v17, 2 }
 0x3da   : > { %6971 = vst [vmem:[%s11076_s21 + $0xe8] sm:$0xff] %v6735_v27  ;;  %v6837_v25 = vsel %vm6830_vm15, %v6833_v40, %v6836_v29  ;;  %v6936_v52 = vsel %vm6934_vm3, %v11409_v53, %v3607_v22  ;;  %v6939_v14 = vsel %vm6937_vm2, %v3610_v7, %v11413_v23 }
 0x3db   : > { %v6838_v37 = vsel %vm3498_vm6, nan, %v6837_v25  ;;  %v6940_v35 = vsel %vm6933_vm7, %v6936_v52, %v6939_v14 }
 0x3dc   : > { %6972 = vst [vmem:[%s11076_s21 + $0xf0] sm:$0xff] %v6838_v37  ;;  %v6941_v38 = vsel %vm3602_vm8, nan, %v6940_v35 }
 0x3dd   : > { %6973 = vst [vmem:[%s11076_s21 + $0xf8] sm:$0xff] %v6941_v38 }
 0x3de   : > { %7771 = shalt.err (!%p7768_p11)
}
 0x3df   : > { %s7772_s21 = scalar_lea.hbm %s11613_s27, 4096  ;;  %s7776_s5 = scalar_lea.hbm %s11667_s2, 8192 }
 0x3e0   : > { %p7773_p13 = scmp.ne.s32.totalorder %s11613_s27, %s7772_s21  ;;  %p7777_p5 = scmp.lt.u32.totalorder %s11613_s27, %s11667_s2 }
 0x3e1   : > { %p7778_p9 = scmp.lt.u32.totalorder %s7776_s5, %s7772_s21  ;;  %p7780_p12 = scmp.lt.u32.totalorder %s7772_s21, %s11613_s27 }
 0x3e2   : > { %p7774_p1 = pnand %p7773_p13, %p12256_p6 }
 0x3e3   : > { %p7779_p10 = por %p7778_p9, %p7777_p5 }
 0x3e4   : > { %p7775_p0 = pneg %p7774_p1 }
 0x3e5   : > { %p7781_p2 = por %p7780_p12, %p7779_p10 }
 0x3e7   : > { %p7782_p3 = pnand %p7781_p2, %p7775_p0 }
 0x3e9   : > { %7785 = shalt.err (!%p7782_p3)
}
 0x3ea   : > { %7511 = dma.vmem_to_hbm [thread:$0]  (%p12256_p6), %s11615_s23, 4096, %s11613_s27, %s6980_s28, %s7838_s17, %s7838_s17, %s7839_s24  }
 0x3eb PF: > { %p7527_p4 = scmp.ge.s32.totalorder %s7828_s12, 2  ;;  %s7024_s8 = sand.u32 1, %s7816_s9  }
 0x3ec   : > { %p12292_p7 = scmp.ne.s32.totalorder %s11925_s20, 0  ;;  %s7025_s16 = scalar_lea.sflag [#allocation4], %s7024_s8 }
 0x3ee   : > { %p7519_p8 = pnand %p7527_p4, %p12292_p7 }
 0x3f0   : > { %7807 = dma.done.wait (!%p7519_p8), %s7025_s16, 4096  }
 0x3f1   : > { %7809 = vsyncadd (!%p7519_p8), %s7025_s16, 4294963200  ;;  %s7034_s19 = scalar_lea.sflag [#allocation7], %s7024_s8 }
 0x3f2   : > { %7811 = dma.done.wait (!%p7519_p8), %s7034_s19, 4096  }
 0x3f3   : > { %7813 = vsyncadd (!%p7519_p8), %s7034_s19, 4294963200  ;;  %p17_p6 = scmp.ge.s32.totalorder %s7881_s15, 4   ;;  %s12293_s9 = smov %s7820_s10 }
 0x3f4   : > { %s12294_s10 = smov %s7824_s11  ;;  %s12295_s11 = smov %s7892_s18 }
 0x3f5   : > { %s12296_s12 = smov %s7881_s15  ;;  %19 = sbr.rel (!%p17_p6) target bundleno = 6 (0x6), region = 78 }
 0x3fc   :  { %7039 = vsyncpa [#allocation3], 1 }
 0x3fd   :  { %7041 = vsyncpa [#allocation3 + $0x1], 1 }
 0x3fe   :  { %7042 = vsyncpa [#allocation4], 1 }
 0x3ff   :  { %7044 = vsyncpa [#allocation4 + $0x1], 1 }
 0x400   :  { %7045 = vsyncpa [#allocation7], 1 }
 0x401   :  { %7047 = vsyncpa [#allocation7 + $0x1], 1 }

</bundles_post_ra>
